<compile_context>
chip_gen: v6e
topology: v6e:2x2x1
jax: 0.10.0
libtpu: 0.0.40
codegen_flags: <defaults>
</compile_context>

<pallas_src>
import functools

import jax
import jax.numpy as jnp
from jax.experimental import pallas as pl
from jax.experimental.pallas import tpu as pltpu


def _make_drec_kernel(layer_dims, lag, L):
    """layer_dims = [(d_out, d_in), ...]; layer 0 is the lag-window conv."""
    n_layers = len(layer_dims)

    def kernel(*refs):
        x_ref = refs[0]                                   # VMEM (G, T) f32
        w_refs = refs[1:1 + n_layers]                     # SMEM (D, d_out*d_in)
        b_refs = refs[1 + n_layers:1 + 2 * n_layers]      # SMEM (D, d_out)
        out_ref = refs[1 + 2 * n_layers]                  # VMEM (2, G, L)

        d = pl.program_id(0)                              # series id (outer axis)

        x = x_ref[...]                                    # (G, T), G on sublanes
        # lag shifted views of the series, shared by every output channel.
        xs = [x[:, k:k + L] for k in range(lag)]          # lag x (G, L)

        # Layer 0: Conv1d(1, hidden0, lag) == lag scalar-weight FMAs / channel,
        # each FMA covering all G rows and L time steps at once.
        h0_out, _ = layer_dims[0]
        h = []
        for c in range(h0_out):
            acc = xs[0] * w_refs[0][d, c * lag]
            for k in range(1, lag):
                acc = acc + xs[k] * w_refs[0][d, c * lag + k]
            h.append(acc + b_refs[0][d, c])

        # Layers 1..: ReLU then Conv1d(d_in, d_out, 1) as scalar-weight FMAs.
        for j in range(1, n_layers):
            d_out, d_in = layer_dims[j]
            h = [jnp.maximum(v, 0.0) for v in h]
            new_h = []
            for c in range(d_out):
                acc = h[0] * w_refs[j][d, c * d_in]
                for i in range(1, d_in):
                    acc = acc + h[i] * w_refs[j][d, c * d_in + i]
                new_h.append(acc + b_refs[j][d, c])
            h = new_h

        for c in range(layer_dims[-1][0]):                # final d_out == 2
            out_ref[c] = h[c].astype(out_ref.dtype)

    return kernel


def _pick_row_group(B, T, L, budget_bytes=8 * 1024 * 1024):
    """Largest divisor of B whose double-buffered (G,T)+(2,G,L) blocks fit."""
    lanes = 128
    t_pad = -(-T // lanes) * lanes
    l_pad = -(-L // lanes) * lanes
    per_row = 2 * 4 * (t_pad + 2 * l_pad)      # f32, x2 for double buffering
    fits = [g for g in range(1, B + 1)
            if B % g == 0 and g * per_row <= budget_bytes]
    if not fits:
        return 1                                # prime/huge B: correct but slow
    # Prefer sublane-dense groups (multiple of 8, or the whole batch).
    dense = [g for g in fits if g % 8 == 0 or g == B]
    return max(dense) if dense else max(fits)


def _vmem_limit_bytes():
    try:
        cap = int(pltpu.get_tpu_info().vmem_capacity_bytes)
    except Exception:
        cap = 64 * 1024 * 1024                  # conservative fallback
    return min(96 * 1024 * 1024, max(32 * 1024 * 1024, (3 * cap) // 4))


@functools.partial(jax.jit, static_argnames=("type_flag", "lag", "out_dtype"))
def drec_forward(X, type_flag, params, lag, out_dtype=jnp.float32):
    """
    X:         (B, T, p) float32
    type_flag: length-p tuple; 1 = continuous, 0 = discrete
    returns:   (B, T - lag + 1, D_dis, 2)
    """
    B, T, p = X.shape
    L = T - lag + 1
    if L <= 0:
        raise ValueError(f"series length {T} shorter than lag {lag}")
    dis_idx = tuple(i for i in range(p) if type_flag[i] == 0)
    D = len(dis_idx)
    if D == 0:
        return jnp.zeros((B, L, 0, 2), dtype=out_dtype)

    # (B, T, p) -> (D, B, T): one dense row per (series, batch) pair.
    X_rows = jnp.transpose(X[:, :, jnp.array(dis_idx)], (2, 0, 1))
    X_rows = X_rows.astype(jnp.float32)

    weights = params["weights"]                 # [(D, d_out, d_in), ...]
    biases = params["biases"]                   # [(D, d_out, 1), ...]
    n_layers = len(weights)
    layer_dims = tuple((w.shape[1], w.shape[2]) for w in weights)

    # Tiny per-series parameters -> flat SMEM scalar tables.
    w_flat = [w.reshape(D, -1).astype(jnp.float32) for w in weights]
    b_flat = [b.reshape(D, -1).astype(jnp.float32) for b in biases]

    G = _pick_row_group(B, T, L)
    grid = (D, B // G)

    smem_spec = pl.BlockSpec(memory_space=pltpu.MemorySpace.SMEM)
    in_specs = ([pl.BlockSpec((None, G, T), lambda d, b: (d, b, 0))]
                + [smem_spec] * (2 * n_layers))
    out_specs = pl.BlockSpec((None, 2, G, L), lambda d, b: (d, 0, b, 0))

    out = pl.pallas_call(
        _make_drec_kernel(layer_dims, lag, L),
        out_shape=jax.ShapeDtypeStruct((D, 2, B, L), out_dtype),
        grid=grid,
        in_specs=in_specs,
        out_specs=out_specs,
        compiler_params=pltpu.CompilerParams(
            dimension_semantics=("parallel", "parallel"),
            vmem_limit_bytes=_vmem_limit_bytes()),
    )(X_rows, *w_flat, *b_flat)

    # (D, 2, B, L) -> (B, L, D, 2): matches the PyTorch module's output layout.
    return jnp.transpose(out, (2, 3, 0, 1))


def init_drec_params(key, num_dis_series, lag, hidden):
    """Deterministic parameter init matching Decoder_rec_uni layer shapes.

    layer 0: (D, hidden[0], lag)   (== Conv1d(1, hidden[0], lag) weight)
    layer j: (D, d_out, d_in)      (== Conv1d(d_in, d_out, 1) weight)
    biases:  (D, d_out, 1)
    """
    dims = [(hidden[0], lag)] + [(d_out, d_in)
                                 for d_in, d_out in zip(hidden, hidden[1:] + [2])]
    weights, biases = [], []
    for (d_out, d_in) in dims:
        key, kw, kb = jax.random.split(key, 3)
        weights.append(0.1 * jax.random.normal(
            kw, (num_dis_series, d_out, d_in), dtype=jnp.float32))
        biases.append(0.1 * jax.random.normal(
            kb, (num_dis_series, d_out, 1), dtype=jnp.float32))
    return {"weights": weights, "biases": biases}


def drec_reference(X, type_flag, params, lag):
    """Pure-JAX reference of the PyTorch forward (for verification)."""
    B, T, p = X.shape
    L = T - lag + 1
    dis_idx = [i for i in range(p) if type_flag[i] == 0]
    win = jnp.arange(L)[:, None] + jnp.arange(lag)[None, :]        # (L, lag)
    outs = []
    for ind, i in enumerate(dis_idx):
        h = X[:, :, i][:, win].reshape(B * L, lag)                 # im2col
        for j, (w, b) in enumerate(zip(params["weights"], params["biases"])):
            if j > 0:
                h = jnp.maximum(h, 0.0)
            h = jnp.dot(h, w[ind].T,
                        precision=jax.lax.Precision.HIGHEST) + b[ind][:, 0]
        outs.append(h.reshape(B, L, 1, 2))
    return jnp.concatenate(outs, axis=2)


if __name__ == "__main__":
    # Small shapes consistent with DREC's forward:
    #   batch=2, T=16, p=5 variables, lag=4, hidden=[32],
    #   type_flag marks 3 discrete variables -> num_dis_series = 3.
    B, T, p = 2, 16, 5
    lag = 4
    hidden = [32]
    type_flag = (1, 0, 0, 1, 0)
    num_dis = sum(1 for f in type_flag if f == 0)

    key = jax.random.PRNGKey(0)
    kx, kp = jax.random.split(key)
    X = jax.random.normal(kx, (B, T, p), dtype=jnp.float32)
    params = init_drec_params(kp, num_dis, lag, hidden)

    out = jax.block_until_ready(drec_forward(X, type_flag, params, lag))
    ref = drec_reference(X, type_flag, params, lag)

    assert out.shape == (B, T - lag + 1, num_dis, 2), out.shape
    err = float(jnp.max(jnp.abs(out - ref)))
    assert jnp.allclose(out, ref, atol=1e-4, rtol=1e-4), f"mismatch vs reference: {err}"

    print("KERNEL_OK")
</pallas_src>

<mosaic_0001>
module attributes {stable_mosaic.version = 11 : i64} {
  func.func @kernel(%arg0: i32, %arg1: i32, %arg2: memref<1x2x16xf32, #tpu.memory_space<vmem>>, %arg3: memref<3x128xf32, #tpu.memory_space<smem>>, %arg4: memref<3x64xf32, #tpu.memory_space<smem>>, %arg5: memref<3x32xf32, #tpu.memory_space<smem>>, %arg6: memref<3x2xf32, #tpu.memory_space<smem>>, %arg7: memref<1x2x2x13xf32, #tpu.memory_space<vmem>>) attributes {dimension_semantics = [#tpu.dimension_semantics<parallel>, #tpu.dimension_semantics<parallel>], iteration_bounds = array<i64: 3, 1>, scalar_prefetch = 0 : i64, scratch_operands = 0 : i64, tpu.core_type = #tpu.core_type<tc>, window_params = [{transform_indices = @transform_0, window_bounds = array<i64: 1, 2, 16>}, {transform_indices = @transform_1, window_bounds = array<i64: 3, 128>}, {transform_indices = @transform_2, window_bounds = array<i64: 3, 64>}, {transform_indices = @transform_3, window_bounds = array<i64: 3, 32>}, {transform_indices = @transform_4, window_bounds = array<i64: 3, 2>}, {transform_indices = @transform_5, window_bounds = array<i64: 1, 2, 2, 13>}]} {
    %c0 = arith.constant 0 : index
    %c0_0 = arith.constant 0 : index
    %c0_1 = arith.constant 0 : index
    %0 = vector.load %arg2[%c0, %c0_0, %c0_1] : memref<1x2x16xf32, #tpu.memory_space<vmem>>, vector<1x2x16xf32>
    %1 = vector.shape_cast %0 : vector<1x2x16xf32> to vector<2x16xf32>
    %2 = vector.extract_strided_slice %1 {offsets = [0, 0], sizes = [2, 13], strides = [1, 1]} : vector<2x16xf32> to vector<2x13xf32>
    %3 = vector.extract_strided_slice %1 {offsets = [0, 1], sizes = [2, 13], strides = [1, 1]} : vector<2x16xf32> to vector<2x13xf32>
    %4 = vector.extract_strided_slice %1 {offsets = [0, 2], sizes = [2, 13], strides = [1, 1]} : vector<2x16xf32> to vector<2x13xf32>
    %5 = vector.extract_strided_slice %1 {offsets = [0, 3], sizes = [2, 13], strides = [1, 1]} : vector<2x16xf32> to vector<2x13xf32>
    %6 = arith.index_cast %arg0 : i32 to index
    %c0_2 = arith.constant 0 : index
    %7 = memref.load %arg3[%6, %c0_2] : memref<3x128xf32, #tpu.memory_space<smem>>
    %8 = vector.broadcast %7 : f32 to vector<2x13xf32>
    %9 = arith.mulf %2, %8 : vector<2x13xf32>
    %10 = arith.index_cast %arg0 : i32 to index
    %c1 = arith.constant 1 : index
    %11 = memref.load %arg3[%10, %c1] : memref<3x128xf32, #tpu.memory_space<smem>>
    %12 = vector.broadcast %11 : f32 to vector<2x13xf32>
    %13 = arith.mulf %3, %12 : vector<2x13xf32>
    %14 = arith.addf %9, %13 : vector<2x13xf32>
    %15 = arith.index_cast %arg0 : i32 to index
    %c2 = arith.constant 2 : index
    %16 = memref.load %arg3[%15, %c2] : memref<3x128xf32, #tpu.memory_space<smem>>
    %17 = vector.broadcast %16 : f32 to vector<2x13xf32>
    %18 = arith.mulf %4, %17 : vector<2x13xf32>
    %19 = arith.addf %14, %18 : vector<2x13xf32>
    %20 = arith.index_cast %arg0 : i32 to index
    %c3 = arith.constant 3 : index
    %21 = memref.load %arg3[%20, %c3] : memref<3x128xf32, #tpu.memory_space<smem>>
    %22 = vector.broadcast %21 : f32 to vector<2x13xf32>
    %23 = arith.mulf %5, %22 : vector<2x13xf32>
    %24 = arith.addf %19, %23 : vector<2x13xf32>
    %25 = arith.index_cast %arg0 : i32 to index
    %c0_3 = arith.constant 0 : index
    %26 = memref.load %arg5[%25, %c0_3] : memref<3x32xf32, #tpu.memory_space<smem>>
    %27 = vector.broadcast %26 : f32 to vector<2x13xf32>
    %28 = arith.addf %24, %27 : vector<2x13xf32>
    %29 = arith.index_cast %arg0 : i32 to index
    %c4 = arith.constant 4 : index
    %30 = memref.load %arg3[%29, %c4] : memref<3x128xf32, #tpu.memory_space<smem>>
    %31 = vector.broadcast %30 : f32 to vector<2x13xf32>
    %32 = arith.mulf %2, %31 : vector<2x13xf32>
    %33 = arith.index_cast %arg0 : i32 to index
    %c5 = arith.constant 5 : index
    %34 = memref.load %arg3[%33, %c5] : memref<3x128xf32, #tpu.memory_space<smem>>
    %35 = vector.broadcast %34 : f32 to vector<2x13xf32>
    %36 = arith.mulf %3, %35 : vector<2x13xf32>
    %37 = arith.addf %32, %36 : vector<2x13xf32>
    %38 = arith.index_cast %arg0 : i32 to index
    %c6 = arith.constant 6 : index
    %39 = memref.load %arg3[%38, %c6] : memref<3x128xf32, #tpu.memory_space<smem>>
    %40 = vector.broadcast %39 : f32 to vector<2x13xf32>
    %41 = arith.mulf %4, %40 : vector<2x13xf32>
    %42 = arith.addf %37, %41 : vector<2x13xf32>
    %43 = arith.index_cast %arg0 : i32 to index
    %c7 = arith.constant 7 : index
    %44 = memref.load %arg3[%43, %c7] : memref<3x128xf32, #tpu.memory_space<smem>>
    %45 = vector.broadcast %44 : f32 to vector<2x13xf32>
    %46 = arith.mulf %5, %45 : vector<2x13xf32>
    %47 = arith.addf %42, %46 : vector<2x13xf32>
    %48 = arith.index_cast %arg0 : i32 to index
    %c1_4 = arith.constant 1 : index
    %49 = memref.load %arg5[%48, %c1_4] : memref<3x32xf32, #tpu.memory_space<smem>>
    %50 = vector.broadcast %49 : f32 to vector<2x13xf32>
    %51 = arith.addf %47, %50 : vector<2x13xf32>
    %52 = arith.index_cast %arg0 : i32 to index
    %c8 = arith.constant 8 : index
    %53 = memref.load %arg3[%52, %c8] : memref<3x128xf32, #tpu.memory_space<smem>>
    %54 = vector.broadcast %53 : f32 to vector<2x13xf32>
    %55 = arith.mulf %2, %54 : vector<2x13xf32>
    %56 = arith.index_cast %arg0 : i32 to index
    %c9 = arith.constant 9 : index
    %57 = memref.load %arg3[%56, %c9] : memref<3x128xf32, #tpu.memory_space<smem>>
    %58 = vector.broadcast %57 : f32 to vector<2x13xf32>
    %59 = arith.mulf %3, %58 : vector<2x13xf32>
    %60 = arith.addf %55, %59 : vector<2x13xf32>
    %61 = arith.index_cast %arg0 : i32 to index
    %c10 = arith.constant 10 : index
    %62 = memref.load %arg3[%61, %c10] : memref<3x128xf32, #tpu.memory_space<smem>>
    %63 = vector.broadcast %62 : f32 to vector<2x13xf32>
    %64 = arith.mulf %4, %63 : vector<2x13xf32>
    %65 = arith.addf %60, %64 : vector<2x13xf32>
    %66 = arith.index_cast %arg0 : i32 to index
    %c11 = arith.constant 11 : index
    %67 = memref.load %arg3[%66, %c11] : memref<3x128xf32, #tpu.memory_space<smem>>
    %68 = vector.broadcast %67 : f32 to vector<2x13xf32>
    %69 = arith.mulf %5, %68 : vector<2x13xf32>
    %70 = arith.addf %65, %69 : vector<2x13xf32>
    %71 = arith.index_cast %arg0 : i32 to index
    %c2_5 = arith.constant 2 : index
    %72 = memref.load %arg5[%71, %c2_5] : memref<3x32xf32, #tpu.memory_space<smem>>
    %73 = vector.broadcast %72 : f32 to vector<2x13xf32>
    %74 = arith.addf %70, %73 : vector<2x13xf32>
    %75 = arith.index_cast %arg0 : i32 to index
    %c12 = arith.constant 12 : index
    %76 = memref.load %arg3[%75, %c12] : memref<3x128xf32, #tpu.memory_space<smem>>
    %77 = vector.broadcast %76 : f32 to vector<2x13xf32>
    %78 = arith.mulf %2, %77 : vector<2x13xf32>
    %79 = arith.index_cast %arg0 : i32 to index
    %c13 = arith.constant 13 : index
    %80 = memref.load %arg3[%79, %c13] : memref<3x128xf32, #tpu.memory_space<smem>>
    %81 = vector.broadcast %80 : f32 to vector<2x13xf32>
    %82 = arith.mulf %3, %81 : vector<2x13xf32>
    %83 = arith.addf %78, %82 : vector<2x13xf32>
    %84 = arith.index_cast %arg0 : i32 to index
    %c14 = arith.constant 14 : index
    %85 = memref.load %arg3[%84, %c14] : memref<3x128xf32, #tpu.memory_space<smem>>
    %86 = vector.broadcast %85 : f32 to vector<2x13xf32>
    %87 = arith.mulf %4, %86 : vector<2x13xf32>
    %88 = arith.addf %83, %87 : vector<2x13xf32>
    %89 = arith.index_cast %arg0 : i32 to index
    %c15 = arith.constant 15 : index
    %90 = memref.load %arg3[%89, %c15] : memref<3x128xf32, #tpu.memory_space<smem>>
    %91 = vector.broadcast %90 : f32 to vector<2x13xf32>
    %92 = arith.mulf %5, %91 : vector<2x13xf32>
    %93 = arith.addf %88, %92 : vector<2x13xf32>
    %94 = arith.index_cast %arg0 : i32 to index
    %c3_6 = arith.constant 3 : index
    %95 = memref.load %arg5[%94, %c3_6] : memref<3x32xf32, #tpu.memory_space<smem>>
    %96 = vector.broadcast %95 : f32 to vector<2x13xf32>
    %97 = arith.addf %93, %96 : vector<2x13xf32>
    %98 = arith.index_cast %arg0 : i32 to index
    %c16 = arith.constant 16 : index
    %99 = memref.load %arg3[%98, %c16] : memref<3x128xf32, #tpu.memory_space<smem>>
    %100 = vector.broadcast %99 : f32 to vector<2x13xf32>
    %101 = arith.mulf %2, %100 : vector<2x13xf32>
    %102 = arith.index_cast %arg0 : i32 to index
    %c17 = arith.constant 17 : index
    %103 = memref.load %arg3[%102, %c17] : memref<3x128xf32, #tpu.memory_space<smem>>
    %104 = vector.broadcast %103 : f32 to vector<2x13xf32>
    %105 = arith.mulf %3, %104 : vector<2x13xf32>
    %106 = arith.addf %101, %105 : vector<2x13xf32>
    %107 = arith.index_cast %arg0 : i32 to index
    %c18 = arith.constant 18 : index
    %108 = memref.load %arg3[%107, %c18] : memref<3x128xf32, #tpu.memory_space<smem>>
    %109 = vector.broadcast %108 : f32 to vector<2x13xf32>
    %110 = arith.mulf %4, %109 : vector<2x13xf32>
    %111 = arith.addf %106, %110 : vector<2x13xf32>
    %112 = arith.index_cast %arg0 : i32 to index
    %c19 = arith.constant 19 : index
    %113 = memref.load %arg3[%112, %c19] : memref<3x128xf32, #tpu.memory_space<smem>>
    %114 = vector.broadcast %113 : f32 to vector<2x13xf32>
    %115 = arith.mulf %5, %114 : vector<2x13xf32>
    %116 = arith.addf %111, %115 : vector<2x13xf32>
    %117 = arith.index_cast %arg0 : i32 to index
    %c4_7 = arith.constant 4 : index
    %118 = memref.load %arg5[%117, %c4_7] : memref<3x32xf32, #tpu.memory_space<smem>>
    %119 = vector.broadcast %118 : f32 to vector<2x13xf32>
    %120 = arith.addf %116, %119 : vector<2x13xf32>
    %121 = arith.index_cast %arg0 : i32 to index
    %c20 = arith.constant 20 : index
    %122 = memref.load %arg3[%121, %c20] : memref<3x128xf32, #tpu.memory_space<smem>>
    %123 = vector.broadcast %122 : f32 to vector<2x13xf32>
    %124 = arith.mulf %2, %123 : vector<2x13xf32>
    %125 = arith.index_cast %arg0 : i32 to index
    %c21 = arith.constant 21 : index
    %126 = memref.load %arg3[%125, %c21] : memref<3x128xf32, #tpu.memory_space<smem>>
    %127 = vector.broadcast %126 : f32 to vector<2x13xf32>
    %128 = arith.mulf %3, %127 : vector<2x13xf32>
    %129 = arith.addf %124, %128 : vector<2x13xf32>
    %130 = arith.index_cast %arg0 : i32 to index
    %c22 = arith.constant 22 : index
    %131 = memref.load %arg3[%130, %c22] : memref<3x128xf32, #tpu.memory_space<smem>>
    %132 = vector.broadcast %131 : f32 to vector<2x13xf32>
    %133 = arith.mulf %4, %132 : vector<2x13xf32>
    %134 = arith.addf %129, %133 : vector<2x13xf32>
    %135 = arith.index_cast %arg0 : i32 to index
    %c23 = arith.constant 23 : index
    %136 = memref.load %arg3[%135, %c23] : memref<3x128xf32, #tpu.memory_space<smem>>
    %137 = vector.broadcast %136 : f32 to vector<2x13xf32>
    %138 = arith.mulf %5, %137 : vector<2x13xf32>
    %139 = arith.addf %134, %138 : vector<2x13xf32>
    %140 = arith.index_cast %arg0 : i32 to index
    %c5_8 = arith.constant 5 : index
    %141 = memref.load %arg5[%140, %c5_8] : memref<3x32xf32, #tpu.memory_space<smem>>
    %142 = vector.broadcast %141 : f32 to vector<2x13xf32>
    %143 = arith.addf %139, %142 : vector<2x13xf32>
    %144 = arith.index_cast %arg0 : i32 to index
    %c24 = arith.constant 24 : index
    %145 = memref.load %arg3[%144, %c24] : memref<3x128xf32, #tpu.memory_space<smem>>
    %146 = vector.broadcast %145 : f32 to vector<2x13xf32>
    %147 = arith.mulf %2, %146 : vector<2x13xf32>
    %148 = arith.index_cast %arg0 : i32 to index
    %c25 = arith.constant 25 : index
    %149 = memref.load %arg3[%148, %c25] : memref<3x128xf32, #tpu.memory_space<smem>>
    %150 = vector.broadcast %149 : f32 to vector<2x13xf32>
    %151 = arith.mulf %3, %150 : vector<2x13xf32>
    %152 = arith.addf %147, %151 : vector<2x13xf32>
    %153 = arith.index_cast %arg0 : i32 to index
    %c26 = arith.constant 26 : index
    %154 = memref.load %arg3[%153, %c26] : memref<3x128xf32, #tpu.memory_space<smem>>
    %155 = vector.broadcast %154 : f32 to vector<2x13xf32>
    %156 = arith.mulf %4, %155 : vector<2x13xf32>
    %157 = arith.addf %152, %156 : vector<2x13xf32>
    %158 = arith.index_cast %arg0 : i32 to index
    %c27 = arith.constant 27 : index
    %159 = memref.load %arg3[%158, %c27] : memref<3x128xf32, #tpu.memory_space<smem>>
    %160 = vector.broadcast %159 : f32 to vector<2x13xf32>
    %161 = arith.mulf %5, %160 : vector<2x13xf32>
    %162 = arith.addf %157, %161 : vector<2x13xf32>
    %163 = arith.index_cast %arg0 : i32 to index
    %c6_9 = arith.constant 6 : index
    %164 = memref.load %arg5[%163, %c6_9] : memref<3x32xf32, #tpu.memory_space<smem>>
    %165 = vector.broadcast %164 : f32 to vector<2x13xf32>
    %166 = arith.addf %162, %165 : vector<2x13xf32>
    %167 = arith.index_cast %arg0 : i32 to index
    %c28 = arith.constant 28 : index
    %168 = memref.load %arg3[%167, %c28] : memref<3x128xf32, #tpu.memory_space<smem>>
    %169 = vector.broadcast %168 : f32 to vector<2x13xf32>
    %170 = arith.mulf %2, %169 : vector<2x13xf32>
    %171 = arith.index_cast %arg0 : i32 to index
    %c29 = arith.constant 29 : index
    %172 = memref.load %arg3[%171, %c29] : memref<3x128xf32, #tpu.memory_space<smem>>
    %173 = vector.broadcast %172 : f32 to vector<2x13xf32>
    %174 = arith.mulf %3, %173 : vector<2x13xf32>
    %175 = arith.addf %170, %174 : vector<2x13xf32>
    %176 = arith.index_cast %arg0 : i32 to index
    %c30 = arith.constant 30 : index
    %177 = memref.load %arg3[%176, %c30] : memref<3x128xf32, #tpu.memory_space<smem>>
    %178 = vector.broadcast %177 : f32 to vector<2x13xf32>
    %179 = arith.mulf %4, %178 : vector<2x13xf32>
    %180 = arith.addf %175, %179 : vector<2x13xf32>
    %181 = arith.index_cast %arg0 : i32 to index
    %c31 = arith.constant 31 : index
    %182 = memref.load %arg3[%181, %c31] : memref<3x128xf32, #tpu.memory_space<smem>>
    %183 = vector.broadcast %182 : f32 to vector<2x13xf32>
    %184 = arith.mulf %5, %183 : vector<2x13xf32>
    %185 = arith.addf %180, %184 : vector<2x13xf32>
    %186 = arith.index_cast %arg0 : i32 to index
    %c7_10 = arith.constant 7 : index
    %187 = memref.load %arg5[%186, %c7_10] : memref<3x32xf32, #tpu.memory_space<smem>>
    %188 = vector.broadcast %187 : f32 to vector<2x13xf32>
    %189 = arith.addf %185, %188 : vector<2x13xf32>
    %190 = arith.index_cast %arg0 : i32 to index
    %c32 = arith.constant 32 : index
    %191 = memref.load %arg3[%190, %c32] : memref<3x128xf32, #tpu.memory_space<smem>>
    %192 = vector.broadcast %191 : f32 to vector<2x13xf32>
    %193 = arith.mulf %2, %192 : vector<2x13xf32>
    %194 = arith.index_cast %arg0 : i32 to index
    %c33 = arith.constant 33 : index
    %195 = memref.load %arg3[%194, %c33] : memref<3x128xf32, #tpu.memory_space<smem>>
    %196 = vector.broadcast %195 : f32 to vector<2x13xf32>
    %197 = arith.mulf %3, %196 : vector<2x13xf32>
    %198 = arith.addf %193, %197 : vector<2x13xf32>
    %199 = arith.index_cast %arg0 : i32 to index
    %c34 = arith.constant 34 : index
    %200 = memref.load %arg3[%199, %c34] : memref<3x128xf32, #tpu.memory_space<smem>>
    %201 = vector.broadcast %200 : f32 to vector<2x13xf32>
    %202 = arith.mulf %4, %201 : vector<2x13xf32>
    %203 = arith.addf %198, %202 : vector<2x13xf32>
    %204 = arith.index_cast %arg0 : i32 to index
    %c35 = arith.constant 35 : index
    %205 = memref.load %arg3[%204, %c35] : memref<3x128xf32, #tpu.memory_space<smem>>
    %206 = vector.broadcast %205 : f32 to vector<2x13xf32>
    %207 = arith.mulf %5, %206 : vector<2x13xf32>
    %208 = arith.addf %203, %207 : vector<2x13xf32>
    %209 = arith.index_cast %arg0 : i32 to index
    %c8_11 = arith.constant 8 : index
    %210 = memref.load %arg5[%209, %c8_11] : memref<3x32xf32, #tpu.memory_space<smem>>
    %211 = vector.broadcast %210 : f32 to vector<2x13xf32>
    %212 = arith.addf %208, %211 : vector<2x13xf32>
    %213 = arith.index_cast %arg0 : i32 to index
    %c36 = arith.constant 36 : index
    %214 = memref.load %arg3[%213, %c36] : memref<3x128xf32, #tpu.memory_space<smem>>
    %215 = vector.broadcast %214 : f32 to vector<2x13xf32>
    %216 = arith.mulf %2, %215 : vector<2x13xf32>
    %217 = arith.index_cast %arg0 : i32 to index
    %c37 = arith.constant 37 : index
    %218 = memref.load %arg3[%217, %c37] : memref<3x128xf32, #tpu.memory_space<smem>>
    %219 = vector.broadcast %218 : f32 to vector<2x13xf32>
    %220 = arith.mulf %3, %219 : vector<2x13xf32>
    %221 = arith.addf %216, %220 : vector<2x13xf32>
    %222 = arith.index_cast %arg0 : i32 to index
    %c38 = arith.constant 38 : index
    %223 = memref.load %arg3[%222, %c38] : memref<3x128xf32, #tpu.memory_space<smem>>
    %224 = vector.broadcast %223 : f32 to vector<2x13xf32>
    %225 = arith.mulf %4, %224 : vector<2x13xf32>
    %226 = arith.addf %221, %225 : vector<2x13xf32>
    %227 = arith.index_cast %arg0 : i32 to index
    %c39 = arith.constant 39 : index
    %228 = memref.load %arg3[%227, %c39] : memref<3x128xf32, #tpu.memory_space<smem>>
    %229 = vector.broadcast %228 : f32 to vector<2x13xf32>
    %230 = arith.mulf %5, %229 : vector<2x13xf32>
    %231 = arith.addf %226, %230 : vector<2x13xf32>
    %232 = arith.index_cast %arg0 : i32 to index
    %c9_12 = arith.constant 9 : index
    %233 = memref.load %arg5[%232, %c9_12] : memref<3x32xf32, #tpu.memory_space<smem>>
    %234 = vector.broadcast %233 : f32 to vector<2x13xf32>
    %235 = arith.addf %231, %234 : vector<2x13xf32>
    %236 = arith.index_cast %arg0 : i32 to index
    %c40 = arith.constant 40 : index
    %237 = memref.load %arg3[%236, %c40] : memref<3x128xf32, #tpu.memory_space<smem>>
    %238 = vector.broadcast %237 : f32 to vector<2x13xf32>
    %239 = arith.mulf %2, %238 : vector<2x13xf32>
    %240 = arith.index_cast %arg0 : i32 to index
    %c41 = arith.constant 41 : index
    %241 = memref.load %arg3[%240, %c41] : memref<3x128xf32, #tpu.memory_space<smem>>
    %242 = vector.broadcast %241 : f32 to vector<2x13xf32>
    %243 = arith.mulf %3, %242 : vector<2x13xf32>
    %244 = arith.addf %239, %243 : vector<2x13xf32>
    %245 = arith.index_cast %arg0 : i32 to index
    %c42 = arith.constant 42 : index
    %246 = memref.load %arg3[%245, %c42] : memref<3x128xf32, #tpu.memory_space<smem>>
    %247 = vector.broadcast %246 : f32 to vector<2x13xf32>
    %248 = arith.mulf %4, %247 : vector<2x13xf32>
    %249 = arith.addf %244, %248 : vector<2x13xf32>
    %250 = arith.index_cast %arg0 : i32 to index
    %c43 = arith.constant 43 : index
    %251 = memref.load %arg3[%250, %c43] : memref<3x128xf32, #tpu.memory_space<smem>>
    %252 = vector.broadcast %251 : f32 to vector<2x13xf32>
    %253 = arith.mulf %5, %252 : vector<2x13xf32>
    %254 = arith.addf %249, %253 : vector<2x13xf32>
    %255 = arith.index_cast %arg0 : i32 to index
    %c10_13 = arith.constant 10 : index
    %256 = memref.load %arg5[%255, %c10_13] : memref<3x32xf32, #tpu.memory_space<smem>>
    %257 = vector.broadcast %256 : f32 to vector<2x13xf32>
    %258 = arith.addf %254, %257 : vector<2x13xf32>
    %259 = arith.index_cast %arg0 : i32 to index
    %c44 = arith.constant 44 : index
    %260 = memref.load %arg3[%259, %c44] : memref<3x128xf32, #tpu.memory_space<smem>>
    %261 = vector.broadcast %260 : f32 to vector<2x13xf32>
    %262 = arith.mulf %2, %261 : vector<2x13xf32>
    %263 = arith.index_cast %arg0 : i32 to index
    %c45 = arith.constant 45 : index
    %264 = memref.load %arg3[%263, %c45] : memref<3x128xf32, #tpu.memory_space<smem>>
    %265 = vector.broadcast %264 : f32 to vector<2x13xf32>
    %266 = arith.mulf %3, %265 : vector<2x13xf32>
    %267 = arith.addf %262, %266 : vector<2x13xf32>
    %268 = arith.index_cast %arg0 : i32 to index
    %c46 = arith.constant 46 : index
    %269 = memref.load %arg3[%268, %c46] : memref<3x128xf32, #tpu.memory_space<smem>>
    %270 = vector.broadcast %269 : f32 to vector<2x13xf32>
    %271 = arith.mulf %4, %270 : vector<2x13xf32>
    %272 = arith.addf %267, %271 : vector<2x13xf32>
    %273 = arith.index_cast %arg0 : i32 to index
    %c47 = arith.constant 47 : index
    %274 = memref.load %arg3[%273, %c47] : memref<3x128xf32, #tpu.memory_space<smem>>
    %275 = vector.broadcast %274 : f32 to vector<2x13xf32>
    %276 = arith.mulf %5, %275 : vector<2x13xf32>
    %277 = arith.addf %272, %276 : vector<2x13xf32>
    %278 = arith.index_cast %arg0 : i32 to index
    %c11_14 = arith.constant 11 : index
    %279 = memref.load %arg5[%278, %c11_14] : memref<3x32xf32, #tpu.memory_space<smem>>
    %280 = vector.broadcast %279 : f32 to vector<2x13xf32>
    %281 = arith.addf %277, %280 : vector<2x13xf32>
    %282 = arith.index_cast %arg0 : i32 to index
    %c48 = arith.constant 48 : index
    %283 = memref.load %arg3[%282, %c48] : memref<3x128xf32, #tpu.memory_space<smem>>
    %284 = vector.broadcast %283 : f32 to vector<2x13xf32>
    %285 = arith.mulf %2, %284 : vector<2x13xf32>
    %286 = arith.index_cast %arg0 : i32 to index
    %c49 = arith.constant 49 : index
    %287 = memref.load %arg3[%286, %c49] : memref<3x128xf32, #tpu.memory_space<smem>>
    %288 = vector.broadcast %287 : f32 to vector<2x13xf32>
    %289 = arith.mulf %3, %288 : vector<2x13xf32>
    %290 = arith.addf %285, %289 : vector<2x13xf32>
    %291 = arith.index_cast %arg0 : i32 to index
    %c50 = arith.constant 50 : index
    %292 = memref.load %arg3[%291, %c50] : memref<3x128xf32, #tpu.memory_space<smem>>
    %293 = vector.broadcast %292 : f32 to vector<2x13xf32>
    %294 = arith.mulf %4, %293 : vector<2x13xf32>
    %295 = arith.addf %290, %294 : vector<2x13xf32>
    %296 = arith.index_cast %arg0 : i32 to index
    %c51 = arith.constant 51 : index
    %297 = memref.load %arg3[%296, %c51] : memref<3x128xf32, #tpu.memory_space<smem>>
    %298 = vector.broadcast %297 : f32 to vector<2x13xf32>
    %299 = arith.mulf %5, %298 : vector<2x13xf32>
    %300 = arith.addf %295, %299 : vector<2x13xf32>
    %301 = arith.index_cast %arg0 : i32 to index
    %c12_15 = arith.constant 12 : index
    %302 = memref.load %arg5[%301, %c12_15] : memref<3x32xf32, #tpu.memory_space<smem>>
    %303 = vector.broadcast %302 : f32 to vector<2x13xf32>
    %304 = arith.addf %300, %303 : vector<2x13xf32>
    %305 = arith.index_cast %arg0 : i32 to index
    %c52 = arith.constant 52 : index
    %306 = memref.load %arg3[%305, %c52] : memref<3x128xf32, #tpu.memory_space<smem>>
    %307 = vector.broadcast %306 : f32 to vector<2x13xf32>
    %308 = arith.mulf %2, %307 : vector<2x13xf32>
    %309 = arith.index_cast %arg0 : i32 to index
    %c53 = arith.constant 53 : index
    %310 = memref.load %arg3[%309, %c53] : memref<3x128xf32, #tpu.memory_space<smem>>
    %311 = vector.broadcast %310 : f32 to vector<2x13xf32>
    %312 = arith.mulf %3, %311 : vector<2x13xf32>
    %313 = arith.addf %308, %312 : vector<2x13xf32>
    %314 = arith.index_cast %arg0 : i32 to index
    %c54 = arith.constant 54 : index
    %315 = memref.load %arg3[%314, %c54] : memref<3x128xf32, #tpu.memory_space<smem>>
    %316 = vector.broadcast %315 : f32 to vector<2x13xf32>
    %317 = arith.mulf %4, %316 : vector<2x13xf32>
    %318 = arith.addf %313, %317 : vector<2x13xf32>
    %319 = arith.index_cast %arg0 : i32 to index
    %c55 = arith.constant 55 : index
    %320 = memref.load %arg3[%319, %c55] : memref<3x128xf32, #tpu.memory_space<smem>>
    %321 = vector.broadcast %320 : f32 to vector<2x13xf32>
    %322 = arith.mulf %5, %321 : vector<2x13xf32>
    %323 = arith.addf %318, %322 : vector<2x13xf32>
    %324 = arith.index_cast %arg0 : i32 to index
    %c13_16 = arith.constant 13 : index
    %325 = memref.load %arg5[%324, %c13_16] : memref<3x32xf32, #tpu.memory_space<smem>>
    %326 = vector.broadcast %325 : f32 to vector<2x13xf32>
    %327 = arith.addf %323, %326 : vector<2x13xf32>
    %328 = arith.index_cast %arg0 : i32 to index
    %c56 = arith.constant 56 : index
    %329 = memref.load %arg3[%328, %c56] : memref<3x128xf32, #tpu.memory_space<smem>>
    %330 = vector.broadcast %329 : f32 to vector<2x13xf32>
    %331 = arith.mulf %2, %330 : vector<2x13xf32>
    %332 = arith.index_cast %arg0 : i32 to index
    %c57 = arith.constant 57 : index
    %333 = memref.load %arg3[%332, %c57] : memref<3x128xf32, #tpu.memory_space<smem>>
    %334 = vector.broadcast %333 : f32 to vector<2x13xf32>
    %335 = arith.mulf %3, %334 : vector<2x13xf32>
    %336 = arith.addf %331, %335 : vector<2x13xf32>
    %337 = arith.index_cast %arg0 : i32 to index
    %c58 = arith.constant 58 : index
    %338 = memref.load %arg3[%337, %c58] : memref<3x128xf32, #tpu.memory_space<smem>>
    %339 = vector.broadcast %338 : f32 to vector<2x13xf32>
    %340 = arith.mulf %4, %339 : vector<2x13xf32>
    %341 = arith.addf %336, %340 : vector<2x13xf32>
    %342 = arith.index_cast %arg0 : i32 to index
    %c59 = arith.constant 59 : index
    %343 = memref.load %arg3[%342, %c59] : memref<3x128xf32, #tpu.memory_space<smem>>
    %344 = vector.broadcast %343 : f32 to vector<2x13xf32>
    %345 = arith.mulf %5, %344 : vector<2x13xf32>
    %346 = arith.addf %341, %345 : vector<2x13xf32>
    %347 = arith.index_cast %arg0 : i32 to index
    %c14_17 = arith.constant 14 : index
    %348 = memref.load %arg5[%347, %c14_17] : memref<3x32xf32, #tpu.memory_space<smem>>
    %349 = vector.broadcast %348 : f32 to vector<2x13xf32>
    %350 = arith.addf %346, %349 : vector<2x13xf32>
    %351 = arith.index_cast %arg0 : i32 to index
    %c60 = arith.constant 60 : index
    %352 = memref.load %arg3[%351, %c60] : memref<3x128xf32, #tpu.memory_space<smem>>
    %353 = vector.broadcast %352 : f32 to vector<2x13xf32>
    %354 = arith.mulf %2, %353 : vector<2x13xf32>
    %355 = arith.index_cast %arg0 : i32 to index
    %c61 = arith.constant 61 : index
    %356 = memref.load %arg3[%355, %c61] : memref<3x128xf32, #tpu.memory_space<smem>>
    %357 = vector.broadcast %356 : f32 to vector<2x13xf32>
    %358 = arith.mulf %3, %357 : vector<2x13xf32>
    %359 = arith.addf %354, %358 : vector<2x13xf32>
    %360 = arith.index_cast %arg0 : i32 to index
    %c62 = arith.constant 62 : index
    %361 = memref.load %arg3[%360, %c62] : memref<3x128xf32, #tpu.memory_space<smem>>
    %362 = vector.broadcast %361 : f32 to vector<2x13xf32>
    %363 = arith.mulf %4, %362 : vector<2x13xf32>
    %364 = arith.addf %359, %363 : vector<2x13xf32>
    %365 = arith.index_cast %arg0 : i32 to index
    %c63 = arith.constant 63 : index
    %366 = memref.load %arg3[%365, %c63] : memref<3x128xf32, #tpu.memory_space<smem>>
    %367 = vector.broadcast %366 : f32 to vector<2x13xf32>
    %368 = arith.mulf %5, %367 : vector<2x13xf32>
    %369 = arith.addf %364, %368 : vector<2x13xf32>
    %370 = arith.index_cast %arg0 : i32 to index
    %c15_18 = arith.constant 15 : index
    %371 = memref.load %arg5[%370, %c15_18] : memref<3x32xf32, #tpu.memory_space<smem>>
    %372 = vector.broadcast %371 : f32 to vector<2x13xf32>
    %373 = arith.addf %369, %372 : vector<2x13xf32>
    %374 = arith.index_cast %arg0 : i32 to index
    %c64 = arith.constant 64 : index
    %375 = memref.load %arg3[%374, %c64] : memref<3x128xf32, #tpu.memory_space<smem>>
    %376 = vector.broadcast %375 : f32 to vector<2x13xf32>
    %377 = arith.mulf %2, %376 : vector<2x13xf32>
    %378 = arith.index_cast %arg0 : i32 to index
    %c65 = arith.constant 65 : index
    %379 = memref.load %arg3[%378, %c65] : memref<3x128xf32, #tpu.memory_space<smem>>
    %380 = vector.broadcast %379 : f32 to vector<2x13xf32>
    %381 = arith.mulf %3, %380 : vector<2x13xf32>
    %382 = arith.addf %377, %381 : vector<2x13xf32>
    %383 = arith.index_cast %arg0 : i32 to index
    %c66 = arith.constant 66 : index
    %384 = memref.load %arg3[%383, %c66] : memref<3x128xf32, #tpu.memory_space<smem>>
    %385 = vector.broadcast %384 : f32 to vector<2x13xf32>
    %386 = arith.mulf %4, %385 : vector<2x13xf32>
    %387 = arith.addf %382, %386 : vector<2x13xf32>
    %388 = arith.index_cast %arg0 : i32 to index
    %c67 = arith.constant 67 : index
    %389 = memref.load %arg3[%388, %c67] : memref<3x128xf32, #tpu.memory_space<smem>>
    %390 = vector.broadcast %389 : f32 to vector<2x13xf32>
    %391 = arith.mulf %5, %390 : vector<2x13xf32>
    %392 = arith.addf %387, %391 : vector<2x13xf32>
    %393 = arith.index_cast %arg0 : i32 to index
    %c16_19 = arith.constant 16 : index
    %394 = memref.load %arg5[%393, %c16_19] : memref<3x32xf32, #tpu.memory_space<smem>>
    %395 = vector.broadcast %394 : f32 to vector<2x13xf32>
    %396 = arith.addf %392, %395 : vector<2x13xf32>
    %397 = arith.index_cast %arg0 : i32 to index
    %c68 = arith.constant 68 : index
    %398 = memref.load %arg3[%397, %c68] : memref<3x128xf32, #tpu.memory_space<smem>>
    %399 = vector.broadcast %398 : f32 to vector<2x13xf32>
    %400 = arith.mulf %2, %399 : vector<2x13xf32>
    %401 = arith.index_cast %arg0 : i32 to index
    %c69 = arith.constant 69 : index
    %402 = memref.load %arg3[%401, %c69] : memref<3x128xf32, #tpu.memory_space<smem>>
    %403 = vector.broadcast %402 : f32 to vector<2x13xf32>
    %404 = arith.mulf %3, %403 : vector<2x13xf32>
    %405 = arith.addf %400, %404 : vector<2x13xf32>
    %406 = arith.index_cast %arg0 : i32 to index
    %c70 = arith.constant 70 : index
    %407 = memref.load %arg3[%406, %c70] : memref<3x128xf32, #tpu.memory_space<smem>>
    %408 = vector.broadcast %407 : f32 to vector<2x13xf32>
    %409 = arith.mulf %4, %408 : vector<2x13xf32>
    %410 = arith.addf %405, %409 : vector<2x13xf32>
    %411 = arith.index_cast %arg0 : i32 to index
    %c71 = arith.constant 71 : index
    %412 = memref.load %arg3[%411, %c71] : memref<3x128xf32, #tpu.memory_space<smem>>
    %413 = vector.broadcast %412 : f32 to vector<2x13xf32>
    %414 = arith.mulf %5, %413 : vector<2x13xf32>
    %415 = arith.addf %410, %414 : vector<2x13xf32>
    %416 = arith.index_cast %arg0 : i32 to index
    %c17_20 = arith.constant 17 : index
    %417 = memref.load %arg5[%416, %c17_20] : memref<3x32xf32, #tpu.memory_space<smem>>
    %418 = vector.broadcast %417 : f32 to vector<2x13xf32>
    %419 = arith.addf %415, %418 : vector<2x13xf32>
    %420 = arith.index_cast %arg0 : i32 to index
    %c72 = arith.constant 72 : index
    %421 = memref.load %arg3[%420, %c72] : memref<3x128xf32, #tpu.memory_space<smem>>
    %422 = vector.broadcast %421 : f32 to vector<2x13xf32>
    %423 = arith.mulf %2, %422 : vector<2x13xf32>
    %424 = arith.index_cast %arg0 : i32 to index
    %c73 = arith.constant 73 : index
    %425 = memref.load %arg3[%424, %c73] : memref<3x128xf32, #tpu.memory_space<smem>>
    %426 = vector.broadcast %425 : f32 to vector<2x13xf32>
    %427 = arith.mulf %3, %426 : vector<2x13xf32>
    %428 = arith.addf %423, %427 : vector<2x13xf32>
    %429 = arith.index_cast %arg0 : i32 to index
    %c74 = arith.constant 74 : index
    %430 = memref.load %arg3[%429, %c74] : memref<3x128xf32, #tpu.memory_space<smem>>
    %431 = vector.broadcast %430 : f32 to vector<2x13xf32>
    %432 = arith.mulf %4, %431 : vector<2x13xf32>
    %433 = arith.addf %428, %432 : vector<2x13xf32>
    %434 = arith.index_cast %arg0 : i32 to index
    %c75 = arith.constant 75 : index
    %435 = memref.load %arg3[%434, %c75] : memref<3x128xf32, #tpu.memory_space<smem>>
    %436 = vector.broadcast %435 : f32 to vector<2x13xf32>
    %437 = arith.mulf %5, %436 : vector<2x13xf32>
    %438 = arith.addf %433, %437 : vector<2x13xf32>
    %439 = arith.index_cast %arg0 : i32 to index
    %c18_21 = arith.constant 18 : index
    %440 = memref.load %arg5[%439, %c18_21] : memref<3x32xf32, #tpu.memory_space<smem>>
    %441 = vector.broadcast %440 : f32 to vector<2x13xf32>
    %442 = arith.addf %438, %441 : vector<2x13xf32>
    %443 = arith.index_cast %arg0 : i32 to index
    %c76 = arith.constant 76 : index
    %444 = memref.load %arg3[%443, %c76] : memref<3x128xf32, #tpu.memory_space<smem>>
    %445 = vector.broadcast %444 : f32 to vector<2x13xf32>
    %446 = arith.mulf %2, %445 : vector<2x13xf32>
    %447 = arith.index_cast %arg0 : i32 to index
    %c77 = arith.constant 77 : index
    %448 = memref.load %arg3[%447, %c77] : memref<3x128xf32, #tpu.memory_space<smem>>
    %449 = vector.broadcast %448 : f32 to vector<2x13xf32>
    %450 = arith.mulf %3, %449 : vector<2x13xf32>
    %451 = arith.addf %446, %450 : vector<2x13xf32>
    %452 = arith.index_cast %arg0 : i32 to index
    %c78 = arith.constant 78 : index
    %453 = memref.load %arg3[%452, %c78] : memref<3x128xf32, #tpu.memory_space<smem>>
    %454 = vector.broadcast %453 : f32 to vector<2x13xf32>
    %455 = arith.mulf %4, %454 : vector<2x13xf32>
    %456 = arith.addf %451, %455 : vector<2x13xf32>
    %457 = arith.index_cast %arg0 : i32 to index
    %c79 = arith.constant 79 : index
    %458 = memref.load %arg3[%457, %c79] : memref<3x128xf32, #tpu.memory_space<smem>>
    %459 = vector.broadcast %458 : f32 to vector<2x13xf32>
    %460 = arith.mulf %5, %459 : vector<2x13xf32>
    %461 = arith.addf %456, %460 : vector<2x13xf32>
    %462 = arith.index_cast %arg0 : i32 to index
    %c19_22 = arith.constant 19 : index
    %463 = memref.load %arg5[%462, %c19_22] : memref<3x32xf32, #tpu.memory_space<smem>>
    %464 = vector.broadcast %463 : f32 to vector<2x13xf32>
    %465 = arith.addf %461, %464 : vector<2x13xf32>
    %466 = arith.index_cast %arg0 : i32 to index
    %c80 = arith.constant 80 : index
    %467 = memref.load %arg3[%466, %c80] : memref<3x128xf32, #tpu.memory_space<smem>>
    %468 = vector.broadcast %467 : f32 to vector<2x13xf32>
    %469 = arith.mulf %2, %468 : vector<2x13xf32>
    %470 = arith.index_cast %arg0 : i32 to index
    %c81 = arith.constant 81 : index
    %471 = memref.load %arg3[%470, %c81] : memref<3x128xf32, #tpu.memory_space<smem>>
    %472 = vector.broadcast %471 : f32 to vector<2x13xf32>
    %473 = arith.mulf %3, %472 : vector<2x13xf32>
    %474 = arith.addf %469, %473 : vector<2x13xf32>
    %475 = arith.index_cast %arg0 : i32 to index
    %c82 = arith.constant 82 : index
    %476 = memref.load %arg3[%475, %c82] : memref<3x128xf32, #tpu.memory_space<smem>>
    %477 = vector.broadcast %476 : f32 to vector<2x13xf32>
    %478 = arith.mulf %4, %477 : vector<2x13xf32>
    %479 = arith.addf %474, %478 : vector<2x13xf32>
    %480 = arith.index_cast %arg0 : i32 to index
    %c83 = arith.constant 83 : index
    %481 = memref.load %arg3[%480, %c83] : memref<3x128xf32, #tpu.memory_space<smem>>
    %482 = vector.broadcast %481 : f32 to vector<2x13xf32>
    %483 = arith.mulf %5, %482 : vector<2x13xf32>
    %484 = arith.addf %479, %483 : vector<2x13xf32>
    %485 = arith.index_cast %arg0 : i32 to index
    %c20_23 = arith.constant 20 : index
    %486 = memref.load %arg5[%485, %c20_23] : memref<3x32xf32, #tpu.memory_space<smem>>
    %487 = vector.broadcast %486 : f32 to vector<2x13xf32>
    %488 = arith.addf %484, %487 : vector<2x13xf32>
    %489 = arith.index_cast %arg0 : i32 to index
    %c84 = arith.constant 84 : index
    %490 = memref.load %arg3[%489, %c84] : memref<3x128xf32, #tpu.memory_space<smem>>
    %491 = vector.broadcast %490 : f32 to vector<2x13xf32>
    %492 = arith.mulf %2, %491 : vector<2x13xf32>
    %493 = arith.index_cast %arg0 : i32 to index
    %c85 = arith.constant 85 : index
    %494 = memref.load %arg3[%493, %c85] : memref<3x128xf32, #tpu.memory_space<smem>>
    %495 = vector.broadcast %494 : f32 to vector<2x13xf32>
    %496 = arith.mulf %3, %495 : vector<2x13xf32>
    %497 = arith.addf %492, %496 : vector<2x13xf32>
    %498 = arith.index_cast %arg0 : i32 to index
    %c86 = arith.constant 86 : index
    %499 = memref.load %arg3[%498, %c86] : memref<3x128xf32, #tpu.memory_space<smem>>
    %500 = vector.broadcast %499 : f32 to vector<2x13xf32>
    %501 = arith.mulf %4, %500 : vector<2x13xf32>
    %502 = arith.addf %497, %501 : vector<2x13xf32>
    %503 = arith.index_cast %arg0 : i32 to index
    %c87 = arith.constant 87 : index
    %504 = memref.load %arg3[%503, %c87] : memref<3x128xf32, #tpu.memory_space<smem>>
    %505 = vector.broadcast %504 : f32 to vector<2x13xf32>
    %506 = arith.mulf %5, %505 : vector<2x13xf32>
    %507 = arith.addf %502, %506 : vector<2x13xf32>
    %508 = arith.index_cast %arg0 : i32 to index
    %c21_24 = arith.constant 21 : index
    %509 = memref.load %arg5[%508, %c21_24] : memref<3x32xf32, #tpu.memory_space<smem>>
    %510 = vector.broadcast %509 : f32 to vector<2x13xf32>
    %511 = arith.addf %507, %510 : vector<2x13xf32>
    %512 = arith.index_cast %arg0 : i32 to index
    %c88 = arith.constant 88 : index
    %513 = memref.load %arg3[%512, %c88] : memref<3x128xf32, #tpu.memory_space<smem>>
    %514 = vector.broadcast %513 : f32 to vector<2x13xf32>
    %515 = arith.mulf %2, %514 : vector<2x13xf32>
    %516 = arith.index_cast %arg0 : i32 to index
    %c89 = arith.constant 89 : index
    %517 = memref.load %arg3[%516, %c89] : memref<3x128xf32, #tpu.memory_space<smem>>
    %518 = vector.broadcast %517 : f32 to vector<2x13xf32>
    %519 = arith.mulf %3, %518 : vector<2x13xf32>
    %520 = arith.addf %515, %519 : vector<2x13xf32>
    %521 = arith.index_cast %arg0 : i32 to index
    %c90 = arith.constant 90 : index
    %522 = memref.load %arg3[%521, %c90] : memref<3x128xf32, #tpu.memory_space<smem>>
    %523 = vector.broadcast %522 : f32 to vector<2x13xf32>
    %524 = arith.mulf %4, %523 : vector<2x13xf32>
    %525 = arith.addf %520, %524 : vector<2x13xf32>
    %526 = arith.index_cast %arg0 : i32 to index
    %c91 = arith.constant 91 : index
    %527 = memref.load %arg3[%526, %c91] : memref<3x128xf32, #tpu.memory_space<smem>>
    %528 = vector.broadcast %527 : f32 to vector<2x13xf32>
    %529 = arith.mulf %5, %528 : vector<2x13xf32>
    %530 = arith.addf %525, %529 : vector<2x13xf32>
    %531 = arith.index_cast %arg0 : i32 to index
    %c22_25 = arith.constant 22 : index
    %532 = memref.load %arg5[%531, %c22_25] : memref<3x32xf32, #tpu.memory_space<smem>>
    %533 = vector.broadcast %532 : f32 to vector<2x13xf32>
    %534 = arith.addf %530, %533 : vector<2x13xf32>
    %535 = arith.index_cast %arg0 : i32 to index
    %c92 = arith.constant 92 : index
    %536 = memref.load %arg3[%535, %c92] : memref<3x128xf32, #tpu.memory_space<smem>>
    %537 = vector.broadcast %536 : f32 to vector<2x13xf32>
    %538 = arith.mulf %2, %537 : vector<2x13xf32>
    %539 = arith.index_cast %arg0 : i32 to index
    %c93 = arith.constant 93 : index
    %540 = memref.load %arg3[%539, %c93] : memref<3x128xf32, #tpu.memory_space<smem>>
    %541 = vector.broadcast %540 : f32 to vector<2x13xf32>
    %542 = arith.mulf %3, %541 : vector<2x13xf32>
    %543 = arith.addf %538, %542 : vector<2x13xf32>
    %544 = arith.index_cast %arg0 : i32 to index
    %c94 = arith.constant 94 : index
    %545 = memref.load %arg3[%544, %c94] : memref<3x128xf32, #tpu.memory_space<smem>>
    %546 = vector.broadcast %545 : f32 to vector<2x13xf32>
    %547 = arith.mulf %4, %546 : vector<2x13xf32>
    %548 = arith.addf %543, %547 : vector<2x13xf32>
    %549 = arith.index_cast %arg0 : i32 to index
    %c95 = arith.constant 95 : index
    %550 = memref.load %arg3[%549, %c95] : memref<3x128xf32, #tpu.memory_space<smem>>
    %551 = vector.broadcast %550 : f32 to vector<2x13xf32>
    %552 = arith.mulf %5, %551 : vector<2x13xf32>
    %553 = arith.addf %548, %552 : vector<2x13xf32>
    %554 = arith.index_cast %arg0 : i32 to index
    %c23_26 = arith.constant 23 : index
    %555 = memref.load %arg5[%554, %c23_26] : memref<3x32xf32, #tpu.memory_space<smem>>
    %556 = vector.broadcast %555 : f32 to vector<2x13xf32>
    %557 = arith.addf %553, %556 : vector<2x13xf32>
    %558 = arith.index_cast %arg0 : i32 to index
    %c96 = arith.constant 96 : index
    %559 = memref.load %arg3[%558, %c96] : memref<3x128xf32, #tpu.memory_space<smem>>
    %560 = vector.broadcast %559 : f32 to vector<2x13xf32>
    %561 = arith.mulf %2, %560 : vector<2x13xf32>
    %562 = arith.index_cast %arg0 : i32 to index
    %c97 = arith.constant 97 : index
    %563 = memref.load %arg3[%562, %c97] : memref<3x128xf32, #tpu.memory_space<smem>>
    %564 = vector.broadcast %563 : f32 to vector<2x13xf32>
    %565 = arith.mulf %3, %564 : vector<2x13xf32>
    %566 = arith.addf %561, %565 : vector<2x13xf32>
    %567 = arith.index_cast %arg0 : i32 to index
    %c98 = arith.constant 98 : index
    %568 = memref.load %arg3[%567, %c98] : memref<3x128xf32, #tpu.memory_space<smem>>
    %569 = vector.broadcast %568 : f32 to vector<2x13xf32>
    %570 = arith.mulf %4, %569 : vector<2x13xf32>
    %571 = arith.addf %566, %570 : vector<2x13xf32>
    %572 = arith.index_cast %arg0 : i32 to index
    %c99 = arith.constant 99 : index
    %573 = memref.load %arg3[%572, %c99] : memref<3x128xf32, #tpu.memory_space<smem>>
    %574 = vector.broadcast %573 : f32 to vector<2x13xf32>
    %575 = arith.mulf %5, %574 : vector<2x13xf32>
    %576 = arith.addf %571, %575 : vector<2x13xf32>
    %577 = arith.index_cast %arg0 : i32 to index
    %c24_27 = arith.constant 24 : index
    %578 = memref.load %arg5[%577, %c24_27] : memref<3x32xf32, #tpu.memory_space<smem>>
    %579 = vector.broadcast %578 : f32 to vector<2x13xf32>
    %580 = arith.addf %576, %579 : vector<2x13xf32>
    %581 = arith.index_cast %arg0 : i32 to index
    %c100 = arith.constant 100 : index
    %582 = memref.load %arg3[%581, %c100] : memref<3x128xf32, #tpu.memory_space<smem>>
    %583 = vector.broadcast %582 : f32 to vector<2x13xf32>
    %584 = arith.mulf %2, %583 : vector<2x13xf32>
    %585 = arith.index_cast %arg0 : i32 to index
    %c101 = arith.constant 101 : index
    %586 = memref.load %arg3[%585, %c101] : memref<3x128xf32, #tpu.memory_space<smem>>
    %587 = vector.broadcast %586 : f32 to vector<2x13xf32>
    %588 = arith.mulf %3, %587 : vector<2x13xf32>
    %589 = arith.addf %584, %588 : vector<2x13xf32>
    %590 = arith.index_cast %arg0 : i32 to index
    %c102 = arith.constant 102 : index
    %591 = memref.load %arg3[%590, %c102] : memref<3x128xf32, #tpu.memory_space<smem>>
    %592 = vector.broadcast %591 : f32 to vector<2x13xf32>
    %593 = arith.mulf %4, %592 : vector<2x13xf32>
    %594 = arith.addf %589, %593 : vector<2x13xf32>
    %595 = arith.index_cast %arg0 : i32 to index
    %c103 = arith.constant 103 : index
    %596 = memref.load %arg3[%595, %c103] : memref<3x128xf32, #tpu.memory_space<smem>>
    %597 = vector.broadcast %596 : f32 to vector<2x13xf32>
    %598 = arith.mulf %5, %597 : vector<2x13xf32>
    %599 = arith.addf %594, %598 : vector<2x13xf32>
    %600 = arith.index_cast %arg0 : i32 to index
    %c25_28 = arith.constant 25 : index
    %601 = memref.load %arg5[%600, %c25_28] : memref<3x32xf32, #tpu.memory_space<smem>>
    %602 = vector.broadcast %601 : f32 to vector<2x13xf32>
    %603 = arith.addf %599, %602 : vector<2x13xf32>
    %604 = arith.index_cast %arg0 : i32 to index
    %c104 = arith.constant 104 : index
    %605 = memref.load %arg3[%604, %c104] : memref<3x128xf32, #tpu.memory_space<smem>>
    %606 = vector.broadcast %605 : f32 to vector<2x13xf32>
    %607 = arith.mulf %2, %606 : vector<2x13xf32>
    %608 = arith.index_cast %arg0 : i32 to index
    %c105 = arith.constant 105 : index
    %609 = memref.load %arg3[%608, %c105] : memref<3x128xf32, #tpu.memory_space<smem>>
    %610 = vector.broadcast %609 : f32 to vector<2x13xf32>
    %611 = arith.mulf %3, %610 : vector<2x13xf32>
    %612 = arith.addf %607, %611 : vector<2x13xf32>
    %613 = arith.index_cast %arg0 : i32 to index
    %c106 = arith.constant 106 : index
    %614 = memref.load %arg3[%613, %c106] : memref<3x128xf32, #tpu.memory_space<smem>>
    %615 = vector.broadcast %614 : f32 to vector<2x13xf32>
    %616 = arith.mulf %4, %615 : vector<2x13xf32>
    %617 = arith.addf %612, %616 : vector<2x13xf32>
    %618 = arith.index_cast %arg0 : i32 to index
    %c107 = arith.constant 107 : index
    %619 = memref.load %arg3[%618, %c107] : memref<3x128xf32, #tpu.memory_space<smem>>
    %620 = vector.broadcast %619 : f32 to vector<2x13xf32>
    %621 = arith.mulf %5, %620 : vector<2x13xf32>
    %622 = arith.addf %617, %621 : vector<2x13xf32>
    %623 = arith.index_cast %arg0 : i32 to index
    %c26_29 = arith.constant 26 : index
    %624 = memref.load %arg5[%623, %c26_29] : memref<3x32xf32, #tpu.memory_space<smem>>
    %625 = vector.broadcast %624 : f32 to vector<2x13xf32>
    %626 = arith.addf %622, %625 : vector<2x13xf32>
    %627 = arith.index_cast %arg0 : i32 to index
    %c108 = arith.constant 108 : index
    %628 = memref.load %arg3[%627, %c108] : memref<3x128xf32, #tpu.memory_space<smem>>
    %629 = vector.broadcast %628 : f32 to vector<2x13xf32>
    %630 = arith.mulf %2, %629 : vector<2x13xf32>
    %631 = arith.index_cast %arg0 : i32 to index
    %c109 = arith.constant 109 : index
    %632 = memref.load %arg3[%631, %c109] : memref<3x128xf32, #tpu.memory_space<smem>>
    %633 = vector.broadcast %632 : f32 to vector<2x13xf32>
    %634 = arith.mulf %3, %633 : vector<2x13xf32>
    %635 = arith.addf %630, %634 : vector<2x13xf32>
    %636 = arith.index_cast %arg0 : i32 to index
    %c110 = arith.constant 110 : index
    %637 = memref.load %arg3[%636, %c110] : memref<3x128xf32, #tpu.memory_space<smem>>
    %638 = vector.broadcast %637 : f32 to vector<2x13xf32>
    %639 = arith.mulf %4, %638 : vector<2x13xf32>
    %640 = arith.addf %635, %639 : vector<2x13xf32>
    %641 = arith.index_cast %arg0 : i32 to index
    %c111 = arith.constant 111 : index
    %642 = memref.load %arg3[%641, %c111] : memref<3x128xf32, #tpu.memory_space<smem>>
    %643 = vector.broadcast %642 : f32 to vector<2x13xf32>
    %644 = arith.mulf %5, %643 : vector<2x13xf32>
    %645 = arith.addf %640, %644 : vector<2x13xf32>
    %646 = arith.index_cast %arg0 : i32 to index
    %c27_30 = arith.constant 27 : index
    %647 = memref.load %arg5[%646, %c27_30] : memref<3x32xf32, #tpu.memory_space<smem>>
    %648 = vector.broadcast %647 : f32 to vector<2x13xf32>
    %649 = arith.addf %645, %648 : vector<2x13xf32>
    %650 = arith.index_cast %arg0 : i32 to index
    %c112 = arith.constant 112 : index
    %651 = memref.load %arg3[%650, %c112] : memref<3x128xf32, #tpu.memory_space<smem>>
    %652 = vector.broadcast %651 : f32 to vector<2x13xf32>
    %653 = arith.mulf %2, %652 : vector<2x13xf32>
    %654 = arith.index_cast %arg0 : i32 to index
    %c113 = arith.constant 113 : index
    %655 = memref.load %arg3[%654, %c113] : memref<3x128xf32, #tpu.memory_space<smem>>
    %656 = vector.broadcast %655 : f32 to vector<2x13xf32>
    %657 = arith.mulf %3, %656 : vector<2x13xf32>
    %658 = arith.addf %653, %657 : vector<2x13xf32>
    %659 = arith.index_cast %arg0 : i32 to index
    %c114 = arith.constant 114 : index
    %660 = memref.load %arg3[%659, %c114] : memref<3x128xf32, #tpu.memory_space<smem>>
    %661 = vector.broadcast %660 : f32 to vector<2x13xf32>
    %662 = arith.mulf %4, %661 : vector<2x13xf32>
    %663 = arith.addf %658, %662 : vector<2x13xf32>
    %664 = arith.index_cast %arg0 : i32 to index
    %c115 = arith.constant 115 : index
    %665 = memref.load %arg3[%664, %c115] : memref<3x128xf32, #tpu.memory_space<smem>>
    %666 = vector.broadcast %665 : f32 to vector<2x13xf32>
    %667 = arith.mulf %5, %666 : vector<2x13xf32>
    %668 = arith.addf %663, %667 : vector<2x13xf32>
    %669 = arith.index_cast %arg0 : i32 to index
    %c28_31 = arith.constant 28 : index
    %670 = memref.load %arg5[%669, %c28_31] : memref<3x32xf32, #tpu.memory_space<smem>>
    %671 = vector.broadcast %670 : f32 to vector<2x13xf32>
    %672 = arith.addf %668, %671 : vector<2x13xf32>
    %673 = arith.index_cast %arg0 : i32 to index
    %c116 = arith.constant 116 : index
    %674 = memref.load %arg3[%673, %c116] : memref<3x128xf32, #tpu.memory_space<smem>>
    %675 = vector.broadcast %674 : f32 to vector<2x13xf32>
    %676 = arith.mulf %2, %675 : vector<2x13xf32>
    %677 = arith.index_cast %arg0 : i32 to index
    %c117 = arith.constant 117 : index
    %678 = memref.load %arg3[%677, %c117] : memref<3x128xf32, #tpu.memory_space<smem>>
    %679 = vector.broadcast %678 : f32 to vector<2x13xf32>
    %680 = arith.mulf %3, %679 : vector<2x13xf32>
    %681 = arith.addf %676, %680 : vector<2x13xf32>
    %682 = arith.index_cast %arg0 : i32 to index
    %c118 = arith.constant 118 : index
    %683 = memref.load %arg3[%682, %c118] : memref<3x128xf32, #tpu.memory_space<smem>>
    %684 = vector.broadcast %683 : f32 to vector<2x13xf32>
    %685 = arith.mulf %4, %684 : vector<2x13xf32>
    %686 = arith.addf %681, %685 : vector<2x13xf32>
    %687 = arith.index_cast %arg0 : i32 to index
    %c119 = arith.constant 119 : index
    %688 = memref.load %arg3[%687, %c119] : memref<3x128xf32, #tpu.memory_space<smem>>
    %689 = vector.broadcast %688 : f32 to vector<2x13xf32>
    %690 = arith.mulf %5, %689 : vector<2x13xf32>
    %691 = arith.addf %686, %690 : vector<2x13xf32>
    %692 = arith.index_cast %arg0 : i32 to index
    %c29_32 = arith.constant 29 : index
    %693 = memref.load %arg5[%692, %c29_32] : memref<3x32xf32, #tpu.memory_space<smem>>
    %694 = vector.broadcast %693 : f32 to vector<2x13xf32>
    %695 = arith.addf %691, %694 : vector<2x13xf32>
    %696 = arith.index_cast %arg0 : i32 to index
    %c120 = arith.constant 120 : index
    %697 = memref.load %arg3[%696, %c120] : memref<3x128xf32, #tpu.memory_space<smem>>
    %698 = vector.broadcast %697 : f32 to vector<2x13xf32>
    %699 = arith.mulf %2, %698 : vector<2x13xf32>
    %700 = arith.index_cast %arg0 : i32 to index
    %c121 = arith.constant 121 : index
    %701 = memref.load %arg3[%700, %c121] : memref<3x128xf32, #tpu.memory_space<smem>>
    %702 = vector.broadcast %701 : f32 to vector<2x13xf32>
    %703 = arith.mulf %3, %702 : vector<2x13xf32>
    %704 = arith.addf %699, %703 : vector<2x13xf32>
    %705 = arith.index_cast %arg0 : i32 to index
    %c122 = arith.constant 122 : index
    %706 = memref.load %arg3[%705, %c122] : memref<3x128xf32, #tpu.memory_space<smem>>
    %707 = vector.broadcast %706 : f32 to vector<2x13xf32>
    %708 = arith.mulf %4, %707 : vector<2x13xf32>
    %709 = arith.addf %704, %708 : vector<2x13xf32>
    %710 = arith.index_cast %arg0 : i32 to index
    %c123 = arith.constant 123 : index
    %711 = memref.load %arg3[%710, %c123] : memref<3x128xf32, #tpu.memory_space<smem>>
    %712 = vector.broadcast %711 : f32 to vector<2x13xf32>
    %713 = arith.mulf %5, %712 : vector<2x13xf32>
    %714 = arith.addf %709, %713 : vector<2x13xf32>
    %715 = arith.index_cast %arg0 : i32 to index
    %c30_33 = arith.constant 30 : index
    %716 = memref.load %arg5[%715, %c30_33] : memref<3x32xf32, #tpu.memory_space<smem>>
    %717 = vector.broadcast %716 : f32 to vector<2x13xf32>
    %718 = arith.addf %714, %717 : vector<2x13xf32>
    %719 = arith.index_cast %arg0 : i32 to index
    %c124 = arith.constant 124 : index
    %720 = memref.load %arg3[%719, %c124] : memref<3x128xf32, #tpu.memory_space<smem>>
    %721 = vector.broadcast %720 : f32 to vector<2x13xf32>
    %722 = arith.mulf %2, %721 : vector<2x13xf32>
    %723 = arith.index_cast %arg0 : i32 to index
    %c125 = arith.constant 125 : index
    %724 = memref.load %arg3[%723, %c125] : memref<3x128xf32, #tpu.memory_space<smem>>
    %725 = vector.broadcast %724 : f32 to vector<2x13xf32>
    %726 = arith.mulf %3, %725 : vector<2x13xf32>
    %727 = arith.addf %722, %726 : vector<2x13xf32>
    %728 = arith.index_cast %arg0 : i32 to index
    %c126 = arith.constant 126 : index
    %729 = memref.load %arg3[%728, %c126] : memref<3x128xf32, #tpu.memory_space<smem>>
    %730 = vector.broadcast %729 : f32 to vector<2x13xf32>
    %731 = arith.mulf %4, %730 : vector<2x13xf32>
    %732 = arith.addf %727, %731 : vector<2x13xf32>
    %733 = arith.index_cast %arg0 : i32 to index
    %c127 = arith.constant 127 : index
    %734 = memref.load %arg3[%733, %c127] : memref<3x128xf32, #tpu.memory_space<smem>>
    %735 = vector.broadcast %734 : f32 to vector<2x13xf32>
    %736 = arith.mulf %5, %735 : vector<2x13xf32>
    %737 = arith.addf %732, %736 : vector<2x13xf32>
    %738 = arith.index_cast %arg0 : i32 to index
    %c31_34 = arith.constant 31 : index
    %739 = memref.load %arg5[%738, %c31_34] : memref<3x32xf32, #tpu.memory_space<smem>>
    %740 = vector.broadcast %739 : f32 to vector<2x13xf32>
    %741 = arith.addf %737, %740 : vector<2x13xf32>
    %cst = arith.constant 0.000000e+00 : f32
    %742 = vector.broadcast %cst : f32 to vector<2x13xf32>
    %743 = arith.maximumf %28, %742 : vector<2x13xf32>
    %cst_35 = arith.constant 0.000000e+00 : f32
    %744 = vector.broadcast %cst_35 : f32 to vector<2x13xf32>
    %745 = arith.maximumf %51, %744 : vector<2x13xf32>
    %cst_36 = arith.constant 0.000000e+00 : f32
    %746 = vector.broadcast %cst_36 : f32 to vector<2x13xf32>
    %747 = arith.maximumf %74, %746 : vector<2x13xf32>
    %cst_37 = arith.constant 0.000000e+00 : f32
    %748 = vector.broadcast %cst_37 : f32 to vector<2x13xf32>
    %749 = arith.maximumf %97, %748 : vector<2x13xf32>
    %cst_38 = arith.constant 0.000000e+00 : f32
    %750 = vector.broadcast %cst_38 : f32 to vector<2x13xf32>
    %751 = arith.maximumf %120, %750 : vector<2x13xf32>
    %cst_39 = arith.constant 0.000000e+00 : f32
    %752 = vector.broadcast %cst_39 : f32 to vector<2x13xf32>
    %753 = arith.maximumf %143, %752 : vector<2x13xf32>
    %cst_40 = arith.constant 0.000000e+00 : f32
    %754 = vector.broadcast %cst_40 : f32 to vector<2x13xf32>
    %755 = arith.maximumf %166, %754 : vector<2x13xf32>
    %cst_41 = arith.constant 0.000000e+00 : f32
    %756 = vector.broadcast %cst_41 : f32 to vector<2x13xf32>
    %757 = arith.maximumf %189, %756 : vector<2x13xf32>
    %cst_42 = arith.constant 0.000000e+00 : f32
    %758 = vector.broadcast %cst_42 : f32 to vector<2x13xf32>
    %759 = arith.maximumf %212, %758 : vector<2x13xf32>
    %cst_43 = arith.constant 0.000000e+00 : f32
    %760 = vector.broadcast %cst_43 : f32 to vector<2x13xf32>
    %761 = arith.maximumf %235, %760 : vector<2x13xf32>
    %cst_44 = arith.constant 0.000000e+00 : f32
    %762 = vector.broadcast %cst_44 : f32 to vector<2x13xf32>
    %763 = arith.maximumf %258, %762 : vector<2x13xf32>
    %cst_45 = arith.constant 0.000000e+00 : f32
    %764 = vector.broadcast %cst_45 : f32 to vector<2x13xf32>
    %765 = arith.maximumf %281, %764 : vector<2x13xf32>
    %cst_46 = arith.constant 0.000000e+00 : f32
    %766 = vector.broadcast %cst_46 : f32 to vector<2x13xf32>
    %767 = arith.maximumf %304, %766 : vector<2x13xf32>
    %cst_47 = arith.constant 0.000000e+00 : f32
    %768 = vector.broadcast %cst_47 : f32 to vector<2x13xf32>
    %769 = arith.maximumf %327, %768 : vector<2x13xf32>
    %cst_48 = arith.constant 0.000000e+00 : f32
    %770 = vector.broadcast %cst_48 : f32 to vector<2x13xf32>
    %771 = arith.maximumf %350, %770 : vector<2x13xf32>
    %cst_49 = arith.constant 0.000000e+00 : f32
    %772 = vector.broadcast %cst_49 : f32 to vector<2x13xf32>
    %773 = arith.maximumf %373, %772 : vector<2x13xf32>
    %cst_50 = arith.constant 0.000000e+00 : f32
    %774 = vector.broadcast %cst_50 : f32 to vector<2x13xf32>
    %775 = arith.maximumf %396, %774 : vector<2x13xf32>
    %cst_51 = arith.constant 0.000000e+00 : f32
    %776 = vector.broadcast %cst_51 : f32 to vector<2x13xf32>
    %777 = arith.maximumf %419, %776 : vector<2x13xf32>
    %cst_52 = arith.constant 0.000000e+00 : f32
    %778 = vector.broadcast %cst_52 : f32 to vector<2x13xf32>
    %779 = arith.maximumf %442, %778 : vector<2x13xf32>
    %cst_53 = arith.constant 0.000000e+00 : f32
    %780 = vector.broadcast %cst_53 : f32 to vector<2x13xf32>
    %781 = arith.maximumf %465, %780 : vector<2x13xf32>
    %cst_54 = arith.constant 0.000000e+00 : f32
    %782 = vector.broadcast %cst_54 : f32 to vector<2x13xf32>
    %783 = arith.maximumf %488, %782 : vector<2x13xf32>
    %cst_55 = arith.constant 0.000000e+00 : f32
    %784 = vector.broadcast %cst_55 : f32 to vector<2x13xf32>
    %785 = arith.maximumf %511, %784 : vector<2x13xf32>
    %cst_56 = arith.constant 0.000000e+00 : f32
    %786 = vector.broadcast %cst_56 : f32 to vector<2x13xf32>
    %787 = arith.maximumf %534, %786 : vector<2x13xf32>
    %cst_57 = arith.constant 0.000000e+00 : f32
    %788 = vector.broadcast %cst_57 : f32 to vector<2x13xf32>
    %789 = arith.maximumf %557, %788 : vector<2x13xf32>
    %cst_58 = arith.constant 0.000000e+00 : f32
    %790 = vector.broadcast %cst_58 : f32 to vector<2x13xf32>
    %791 = arith.maximumf %580, %790 : vector<2x13xf32>
    %cst_59 = arith.constant 0.000000e+00 : f32
    %792 = vector.broadcast %cst_59 : f32 to vector<2x13xf32>
    %793 = arith.maximumf %603, %792 : vector<2x13xf32>
    %cst_60 = arith.constant 0.000000e+00 : f32
    %794 = vector.broadcast %cst_60 : f32 to vector<2x13xf32>
    %795 = arith.maximumf %626, %794 : vector<2x13xf32>
    %cst_61 = arith.constant 0.000000e+00 : f32
    %796 = vector.broadcast %cst_61 : f32 to vector<2x13xf32>
    %797 = arith.maximumf %649, %796 : vector<2x13xf32>
    %cst_62 = arith.constant 0.000000e+00 : f32
    %798 = vector.broadcast %cst_62 : f32 to vector<2x13xf32>
    %799 = arith.maximumf %672, %798 : vector<2x13xf32>
    %cst_63 = arith.constant 0.000000e+00 : f32
    %800 = vector.broadcast %cst_63 : f32 to vector<2x13xf32>
    %801 = arith.maximumf %695, %800 : vector<2x13xf32>
    %cst_64 = arith.constant 0.000000e+00 : f32
    %802 = vector.broadcast %cst_64 : f32 to vector<2x13xf32>
    %803 = arith.maximumf %718, %802 : vector<2x13xf32>
    %cst_65 = arith.constant 0.000000e+00 : f32
    %804 = vector.broadcast %cst_65 : f32 to vector<2x13xf32>
    %805 = arith.maximumf %741, %804 : vector<2x13xf32>
    %806 = arith.index_cast %arg0 : i32 to index
    %c0_66 = arith.constant 0 : index
    %807 = memref.load %arg4[%806, %c0_66] : memref<3x64xf32, #tpu.memory_space<smem>>
    %808 = vector.broadcast %807 : f32 to vector<2x13xf32>
    %809 = arith.mulf %743, %808 : vector<2x13xf32>
    %810 = arith.index_cast %arg0 : i32 to index
    %c1_67 = arith.constant 1 : index
    %811 = memref.load %arg4[%810, %c1_67] : memref<3x64xf32, #tpu.memory_space<smem>>
    %812 = vector.broadcast %811 : f32 to vector<2x13xf32>
    %813 = arith.mulf %745, %812 : vector<2x13xf32>
    %814 = arith.addf %809, %813 : vector<2x13xf32>
    %815 = arith.index_cast %arg0 : i32 to index
    %c2_68 = arith.constant 2 : index
    %816 = memref.load %arg4[%815, %c2_68] : memref<3x64xf32, #tpu.memory_space<smem>>
    %817 = vector.broadcast %816 : f32 to vector<2x13xf32>
    %818 = arith.mulf %747, %817 : vector<2x13xf32>
    %819 = arith.addf %814, %818 : vector<2x13xf32>
    %820 = arith.index_cast %arg0 : i32 to index
    %c3_69 = arith.constant 3 : index
    %821 = memref.load %arg4[%820, %c3_69] : memref<3x64xf32, #tpu.memory_space<smem>>
    %822 = vector.broadcast %821 : f32 to vector<2x13xf32>
    %823 = arith.mulf %749, %822 : vector<2x13xf32>
    %824 = arith.addf %819, %823 : vector<2x13xf32>
    %825 = arith.index_cast %arg0 : i32 to index
    %c4_70 = arith.constant 4 : index
    %826 = memref.load %arg4[%825, %c4_70] : memref<3x64xf32, #tpu.memory_space<smem>>
    %827 = vector.broadcast %826 : f32 to vector<2x13xf32>
    %828 = arith.mulf %751, %827 : vector<2x13xf32>
    %829 = arith.addf %824, %828 : vector<2x13xf32>
    %830 = arith.index_cast %arg0 : i32 to index
    %c5_71 = arith.constant 5 : index
    %831 = memref.load %arg4[%830, %c5_71] : memref<3x64xf32, #tpu.memory_space<smem>>
    %832 = vector.broadcast %831 : f32 to vector<2x13xf32>
    %833 = arith.mulf %753, %832 : vector<2x13xf32>
    %834 = arith.addf %829, %833 : vector<2x13xf32>
    %835 = arith.index_cast %arg0 : i32 to index
    %c6_72 = arith.constant 6 : index
    %836 = memref.load %arg4[%835, %c6_72] : memref<3x64xf32, #tpu.memory_space<smem>>
    %837 = vector.broadcast %836 : f32 to vector<2x13xf32>
    %838 = arith.mulf %755, %837 : vector<2x13xf32>
    %839 = arith.addf %834, %838 : vector<2x13xf32>
    %840 = arith.index_cast %arg0 : i32 to index
    %c7_73 = arith.constant 7 : index
    %841 = memref.load %arg4[%840, %c7_73] : memref<3x64xf32, #tpu.memory_space<smem>>
    %842 = vector.broadcast %841 : f32 to vector<2x13xf32>
    %843 = arith.mulf %757, %842 : vector<2x13xf32>
    %844 = arith.addf %839, %843 : vector<2x13xf32>
    %845 = arith.index_cast %arg0 : i32 to index
    %c8_74 = arith.constant 8 : index
    %846 = memref.load %arg4[%845, %c8_74] : memref<3x64xf32, #tpu.memory_space<smem>>
    %847 = vector.broadcast %846 : f32 to vector<2x13xf32>
    %848 = arith.mulf %759, %847 : vector<2x13xf32>
    %849 = arith.addf %844, %848 : vector<2x13xf32>
    %850 = arith.index_cast %arg0 : i32 to index
    %c9_75 = arith.constant 9 : index
    %851 = memref.load %arg4[%850, %c9_75] : memref<3x64xf32, #tpu.memory_space<smem>>
    %852 = vector.broadcast %851 : f32 to vector<2x13xf32>
    %853 = arith.mulf %761, %852 : vector<2x13xf32>
    %854 = arith.addf %849, %853 : vector<2x13xf32>
    %855 = arith.index_cast %arg0 : i32 to index
    %c10_76 = arith.constant 10 : index
    %856 = memref.load %arg4[%855, %c10_76] : memref<3x64xf32, #tpu.memory_space<smem>>
    %857 = vector.broadcast %856 : f32 to vector<2x13xf32>
    %858 = arith.mulf %763, %857 : vector<2x13xf32>
    %859 = arith.addf %854, %858 : vector<2x13xf32>
    %860 = arith.index_cast %arg0 : i32 to index
    %c11_77 = arith.constant 11 : index
    %861 = memref.load %arg4[%860, %c11_77] : memref<3x64xf32, #tpu.memory_space<smem>>
    %862 = vector.broadcast %861 : f32 to vector<2x13xf32>
    %863 = arith.mulf %765, %862 : vector<2x13xf32>
    %864 = arith.addf %859, %863 : vector<2x13xf32>
    %865 = arith.index_cast %arg0 : i32 to index
    %c12_78 = arith.constant 12 : index
    %866 = memref.load %arg4[%865, %c12_78] : memref<3x64xf32, #tpu.memory_space<smem>>
    %867 = vector.broadcast %866 : f32 to vector<2x13xf32>
    %868 = arith.mulf %767, %867 : vector<2x13xf32>
    %869 = arith.addf %864, %868 : vector<2x13xf32>
    %870 = arith.index_cast %arg0 : i32 to index
    %c13_79 = arith.constant 13 : index
    %871 = memref.load %arg4[%870, %c13_79] : memref<3x64xf32, #tpu.memory_space<smem>>
    %872 = vector.broadcast %871 : f32 to vector<2x13xf32>
    %873 = arith.mulf %769, %872 : vector<2x13xf32>
    %874 = arith.addf %869, %873 : vector<2x13xf32>
    %875 = arith.index_cast %arg0 : i32 to index
    %c14_80 = arith.constant 14 : index
    %876 = memref.load %arg4[%875, %c14_80] : memref<3x64xf32, #tpu.memory_space<smem>>
    %877 = vector.broadcast %876 : f32 to vector<2x13xf32>
    %878 = arith.mulf %771, %877 : vector<2x13xf32>
    %879 = arith.addf %874, %878 : vector<2x13xf32>
    %880 = arith.index_cast %arg0 : i32 to index
    %c15_81 = arith.constant 15 : index
    %881 = memref.load %arg4[%880, %c15_81] : memref<3x64xf32, #tpu.memory_space<smem>>
    %882 = vector.broadcast %881 : f32 to vector<2x13xf32>
    %883 = arith.mulf %773, %882 : vector<2x13xf32>
    %884 = arith.addf %879, %883 : vector<2x13xf32>
    %885 = arith.index_cast %arg0 : i32 to index
    %c16_82 = arith.constant 16 : index
    %886 = memref.load %arg4[%885, %c16_82] : memref<3x64xf32, #tpu.memory_space<smem>>
    %887 = vector.broadcast %886 : f32 to vector<2x13xf32>
    %888 = arith.mulf %775, %887 : vector<2x13xf32>
    %889 = arith.addf %884, %888 : vector<2x13xf32>
    %890 = arith.index_cast %arg0 : i32 to index
    %c17_83 = arith.constant 17 : index
    %891 = memref.load %arg4[%890, %c17_83] : memref<3x64xf32, #tpu.memory_space<smem>>
    %892 = vector.broadcast %891 : f32 to vector<2x13xf32>
    %893 = arith.mulf %777, %892 : vector<2x13xf32>
    %894 = arith.addf %889, %893 : vector<2x13xf32>
    %895 = arith.index_cast %arg0 : i32 to index
    %c18_84 = arith.constant 18 : index
    %896 = memref.load %arg4[%895, %c18_84] : memref<3x64xf32, #tpu.memory_space<smem>>
    %897 = vector.broadcast %896 : f32 to vector<2x13xf32>
    %898 = arith.mulf %779, %897 : vector<2x13xf32>
    %899 = arith.addf %894, %898 : vector<2x13xf32>
    %900 = arith.index_cast %arg0 : i32 to index
    %c19_85 = arith.constant 19 : index
    %901 = memref.load %arg4[%900, %c19_85] : memref<3x64xf32, #tpu.memory_space<smem>>
    %902 = vector.broadcast %901 : f32 to vector<2x13xf32>
    %903 = arith.mulf %781, %902 : vector<2x13xf32>
    %904 = arith.addf %899, %903 : vector<2x13xf32>
    %905 = arith.index_cast %arg0 : i32 to index
    %c20_86 = arith.constant 20 : index
    %906 = memref.load %arg4[%905, %c20_86] : memref<3x64xf32, #tpu.memory_space<smem>>
    %907 = vector.broadcast %906 : f32 to vector<2x13xf32>
    %908 = arith.mulf %783, %907 : vector<2x13xf32>
    %909 = arith.addf %904, %908 : vector<2x13xf32>
    %910 = arith.index_cast %arg0 : i32 to index
    %c21_87 = arith.constant 21 : index
    %911 = memref.load %arg4[%910, %c21_87] : memref<3x64xf32, #tpu.memory_space<smem>>
    %912 = vector.broadcast %911 : f32 to vector<2x13xf32>
    %913 = arith.mulf %785, %912 : vector<2x13xf32>
    %914 = arith.addf %909, %913 : vector<2x13xf32>
    %915 = arith.index_cast %arg0 : i32 to index
    %c22_88 = arith.constant 22 : index
    %916 = memref.load %arg4[%915, %c22_88] : memref<3x64xf32, #tpu.memory_space<smem>>
    %917 = vector.broadcast %916 : f32 to vector<2x13xf32>
    %918 = arith.mulf %787, %917 : vector<2x13xf32>
    %919 = arith.addf %914, %918 : vector<2x13xf32>
    %920 = arith.index_cast %arg0 : i32 to index
    %c23_89 = arith.constant 23 : index
    %921 = memref.load %arg4[%920, %c23_89] : memref<3x64xf32, #tpu.memory_space<smem>>
    %922 = vector.broadcast %921 : f32 to vector<2x13xf32>
    %923 = arith.mulf %789, %922 : vector<2x13xf32>
    %924 = arith.addf %919, %923 : vector<2x13xf32>
    %925 = arith.index_cast %arg0 : i32 to index
    %c24_90 = arith.constant 24 : index
    %926 = memref.load %arg4[%925, %c24_90] : memref<3x64xf32, #tpu.memory_space<smem>>
    %927 = vector.broadcast %926 : f32 to vector<2x13xf32>
    %928 = arith.mulf %791, %927 : vector<2x13xf32>
    %929 = arith.addf %924, %928 : vector<2x13xf32>
    %930 = arith.index_cast %arg0 : i32 to index
    %c25_91 = arith.constant 25 : index
    %931 = memref.load %arg4[%930, %c25_91] : memref<3x64xf32, #tpu.memory_space<smem>>
    %932 = vector.broadcast %931 : f32 to vector<2x13xf32>
    %933 = arith.mulf %793, %932 : vector<2x13xf32>
    %934 = arith.addf %929, %933 : vector<2x13xf32>
    %935 = arith.index_cast %arg0 : i32 to index
    %c26_92 = arith.constant 26 : index
    %936 = memref.load %arg4[%935, %c26_92] : memref<3x64xf32, #tpu.memory_space<smem>>
    %937 = vector.broadcast %936 : f32 to vector<2x13xf32>
    %938 = arith.mulf %795, %937 : vector<2x13xf32>
    %939 = arith.addf %934, %938 : vector<2x13xf32>
    %940 = arith.index_cast %arg0 : i32 to index
    %c27_93 = arith.constant 27 : index
    %941 = memref.load %arg4[%940, %c27_93] : memref<3x64xf32, #tpu.memory_space<smem>>
    %942 = vector.broadcast %941 : f32 to vector<2x13xf32>
    %943 = arith.mulf %797, %942 : vector<2x13xf32>
    %944 = arith.addf %939, %943 : vector<2x13xf32>
    %945 = arith.index_cast %arg0 : i32 to index
    %c28_94 = arith.constant 28 : index
    %946 = memref.load %arg4[%945, %c28_94] : memref<3x64xf32, #tpu.memory_space<smem>>
    %947 = vector.broadcast %946 : f32 to vector<2x13xf32>
    %948 = arith.mulf %799, %947 : vector<2x13xf32>
    %949 = arith.addf %944, %948 : vector<2x13xf32>
    %950 = arith.index_cast %arg0 : i32 to index
    %c29_95 = arith.constant 29 : index
    %951 = memref.load %arg4[%950, %c29_95] : memref<3x64xf32, #tpu.memory_space<smem>>
    %952 = vector.broadcast %951 : f32 to vector<2x13xf32>
    %953 = arith.mulf %801, %952 : vector<2x13xf32>
    %954 = arith.addf %949, %953 : vector<2x13xf32>
    %955 = arith.index_cast %arg0 : i32 to index
    %c30_96 = arith.constant 30 : index
    %956 = memref.load %arg4[%955, %c30_96] : memref<3x64xf32, #tpu.memory_space<smem>>
    %957 = vector.broadcast %956 : f32 to vector<2x13xf32>
    %958 = arith.mulf %803, %957 : vector<2x13xf32>
    %959 = arith.addf %954, %958 : vector<2x13xf32>
    %960 = arith.index_cast %arg0 : i32 to index
    %c31_97 = arith.constant 31 : index
    %961 = memref.load %arg4[%960, %c31_97] : memref<3x64xf32, #tpu.memory_space<smem>>
    %962 = vector.broadcast %961 : f32 to vector<2x13xf32>
    %963 = arith.mulf %805, %962 : vector<2x13xf32>
    %964 = arith.addf %959, %963 : vector<2x13xf32>
    %965 = arith.index_cast %arg0 : i32 to index
    %c0_98 = arith.constant 0 : index
    %966 = memref.load %arg6[%965, %c0_98] : memref<3x2xf32, #tpu.memory_space<smem>>
    %967 = vector.broadcast %966 : f32 to vector<2x13xf32>
    %968 = arith.addf %964, %967 : vector<2x13xf32>
    %969 = arith.index_cast %arg0 : i32 to index
    %c32_99 = arith.constant 32 : index
    %970 = memref.load %arg4[%969, %c32_99] : memref<3x64xf32, #tpu.memory_space<smem>>
    %971 = vector.broadcast %970 : f32 to vector<2x13xf32>
    %972 = arith.mulf %743, %971 : vector<2x13xf32>
    %973 = arith.index_cast %arg0 : i32 to index
    %c33_100 = arith.constant 33 : index
    %974 = memref.load %arg4[%973, %c33_100] : memref<3x64xf32, #tpu.memory_space<smem>>
    %975 = vector.broadcast %974 : f32 to vector<2x13xf32>
    %976 = arith.mulf %745, %975 : vector<2x13xf32>
    %977 = arith.addf %972, %976 : vector<2x13xf32>
    %978 = arith.index_cast %arg0 : i32 to index
    %c34_101 = arith.constant 34 : index
    %979 = memref.load %arg4[%978, %c34_101] : memref<3x64xf32, #tpu.memory_space<smem>>
    %980 = vector.broadcast %979 : f32 to vector<2x13xf32>
    %981 = arith.mulf %747, %980 : vector<2x13xf32>
    %982 = arith.addf %977, %981 : vector<2x13xf32>
    %983 = arith.index_cast %arg0 : i32 to index
    %c35_102 = arith.constant 35 : index
    %984 = memref.load %arg4[%983, %c35_102] : memref<3x64xf32, #tpu.memory_space<smem>>
    %985 = vector.broadcast %984 : f32 to vector<2x13xf32>
    %986 = arith.mulf %749, %985 : vector<2x13xf32>
    %987 = arith.addf %982, %986 : vector<2x13xf32>
    %988 = arith.index_cast %arg0 : i32 to index
    %c36_103 = arith.constant 36 : index
    %989 = memref.load %arg4[%988, %c36_103] : memref<3x64xf32, #tpu.memory_space<smem>>
    %990 = vector.broadcast %989 : f32 to vector<2x13xf32>
    %991 = arith.mulf %751, %990 : vector<2x13xf32>
    %992 = arith.addf %987, %991 : vector<2x13xf32>
    %993 = arith.index_cast %arg0 : i32 to index
    %c37_104 = arith.constant 37 : index
    %994 = memref.load %arg4[%993, %c37_104] : memref<3x64xf32, #tpu.memory_space<smem>>
    %995 = vector.broadcast %994 : f32 to vector<2x13xf32>
    %996 = arith.mulf %753, %995 : vector<2x13xf32>
    %997 = arith.addf %992, %996 : vector<2x13xf32>
    %998 = arith.index_cast %arg0 : i32 to index
    %c38_105 = arith.constant 38 : index
    %999 = memref.load %arg4[%998, %c38_105] : memref<3x64xf32, #tpu.memory_space<smem>>
    %1000 = vector.broadcast %999 : f32 to vector<2x13xf32>
    %1001 = arith.mulf %755, %1000 : vector<2x13xf32>
    %1002 = arith.addf %997, %1001 : vector<2x13xf32>
    %1003 = arith.index_cast %arg0 : i32 to index
    %c39_106 = arith.constant 39 : index
    %1004 = memref.load %arg4[%1003, %c39_106] : memref<3x64xf32, #tpu.memory_space<smem>>
    %1005 = vector.broadcast %1004 : f32 to vector<2x13xf32>
    %1006 = arith.mulf %757, %1005 : vector<2x13xf32>
    %1007 = arith.addf %1002, %1006 : vector<2x13xf32>
    %1008 = arith.index_cast %arg0 : i32 to index
    %c40_107 = arith.constant 40 : index
    %1009 = memref.load %arg4[%1008, %c40_107] : memref<3x64xf32, #tpu.memory_space<smem>>
    %1010 = vector.broadcast %1009 : f32 to vector<2x13xf32>
    %1011 = arith.mulf %759, %1010 : vector<2x13xf32>
    %1012 = arith.addf %1007, %1011 : vector<2x13xf32>
    %1013 = arith.index_cast %arg0 : i32 to index
    %c41_108 = arith.constant 41 : index
    %1014 = memref.load %arg4[%1013, %c41_108] : memref<3x64xf32, #tpu.memory_space<smem>>
    %1015 = vector.broadcast %1014 : f32 to vector<2x13xf32>
    %1016 = arith.mulf %761, %1015 : vector<2x13xf32>
    %1017 = arith.addf %1012, %1016 : vector<2x13xf32>
    %1018 = arith.index_cast %arg0 : i32 to index
    %c42_109 = arith.constant 42 : index
    %1019 = memref.load %arg4[%1018, %c42_109] : memref<3x64xf32, #tpu.memory_space<smem>>
    %1020 = vector.broadcast %1019 : f32 to vector<2x13xf32>
    %1021 = arith.mulf %763, %1020 : vector<2x13xf32>
    %1022 = arith.addf %1017, %1021 : vector<2x13xf32>
    %1023 = arith.index_cast %arg0 : i32 to index
    %c43_110 = arith.constant 43 : index
    %1024 = memref.load %arg4[%1023, %c43_110] : memref<3x64xf32, #tpu.memory_space<smem>>
    %1025 = vector.broadcast %1024 : f32 to vector<2x13xf32>
    %1026 = arith.mulf %765, %1025 : vector<2x13xf32>
    %1027 = arith.addf %1022, %1026 : vector<2x13xf32>
    %1028 = arith.index_cast %arg0 : i32 to index
    %c44_111 = arith.constant 44 : index
    %1029 = memref.load %arg4[%1028, %c44_111] : memref<3x64xf32, #tpu.memory_space<smem>>
    %1030 = vector.broadcast %1029 : f32 to vector<2x13xf32>
    %1031 = arith.mulf %767, %1030 : vector<2x13xf32>
    %1032 = arith.addf %1027, %1031 : vector<2x13xf32>
    %1033 = arith.index_cast %arg0 : i32 to index
    %c45_112 = arith.constant 45 : index
    %1034 = memref.load %arg4[%1033, %c45_112] : memref<3x64xf32, #tpu.memory_space<smem>>
    %1035 = vector.broadcast %1034 : f32 to vector<2x13xf32>
    %1036 = arith.mulf %769, %1035 : vector<2x13xf32>
    %1037 = arith.addf %1032, %1036 : vector<2x13xf32>
    %1038 = arith.index_cast %arg0 : i32 to index
    %c46_113 = arith.constant 46 : index
    %1039 = memref.load %arg4[%1038, %c46_113] : memref<3x64xf32, #tpu.memory_space<smem>>
    %1040 = vector.broadcast %1039 : f32 to vector<2x13xf32>
    %1041 = arith.mulf %771, %1040 : vector<2x13xf32>
    %1042 = arith.addf %1037, %1041 : vector<2x13xf32>
    %1043 = arith.index_cast %arg0 : i32 to index
    %c47_114 = arith.constant 47 : index
    %1044 = memref.load %arg4[%1043, %c47_114] : memref<3x64xf32, #tpu.memory_space<smem>>
    %1045 = vector.broadcast %1044 : f32 to vector<2x13xf32>
    %1046 = arith.mulf %773, %1045 : vector<2x13xf32>
    %1047 = arith.addf %1042, %1046 : vector<2x13xf32>
    %1048 = arith.index_cast %arg0 : i32 to index
    %c48_115 = arith.constant 48 : index
    %1049 = memref.load %arg4[%1048, %c48_115] : memref<3x64xf32, #tpu.memory_space<smem>>
    %1050 = vector.broadcast %1049 : f32 to vector<2x13xf32>
    %1051 = arith.mulf %775, %1050 : vector<2x13xf32>
    %1052 = arith.addf %1047, %1051 : vector<2x13xf32>
    %1053 = arith.index_cast %arg0 : i32 to index
    %c49_116 = arith.constant 49 : index
    %1054 = memref.load %arg4[%1053, %c49_116] : memref<3x64xf32, #tpu.memory_space<smem>>
    %1055 = vector.broadcast %1054 : f32 to vector<2x13xf32>
    %1056 = arith.mulf %777, %1055 : vector<2x13xf32>
    %1057 = arith.addf %1052, %1056 : vector<2x13xf32>
    %1058 = arith.index_cast %arg0 : i32 to index
    %c50_117 = arith.constant 50 : index
    %1059 = memref.load %arg4[%1058, %c50_117] : memref<3x64xf32, #tpu.memory_space<smem>>
    %1060 = vector.broadcast %1059 : f32 to vector<2x13xf32>
    %1061 = arith.mulf %779, %1060 : vector<2x13xf32>
    %1062 = arith.addf %1057, %1061 : vector<2x13xf32>
    %1063 = arith.index_cast %arg0 : i32 to index
    %c51_118 = arith.constant 51 : index
    %1064 = memref.load %arg4[%1063, %c51_118] : memref<3x64xf32, #tpu.memory_space<smem>>
    %1065 = vector.broadcast %1064 : f32 to vector<2x13xf32>
    %1066 = arith.mulf %781, %1065 : vector<2x13xf32>
    %1067 = arith.addf %1062, %1066 : vector<2x13xf32>
    %1068 = arith.index_cast %arg0 : i32 to index
    %c52_119 = arith.constant 52 : index
    %1069 = memref.load %arg4[%1068, %c52_119] : memref<3x64xf32, #tpu.memory_space<smem>>
    %1070 = vector.broadcast %1069 : f32 to vector<2x13xf32>
    %1071 = arith.mulf %783, %1070 : vector<2x13xf32>
    %1072 = arith.addf %1067, %1071 : vector<2x13xf32>
    %1073 = arith.index_cast %arg0 : i32 to index
    %c53_120 = arith.constant 53 : index
    %1074 = memref.load %arg4[%1073, %c53_120] : memref<3x64xf32, #tpu.memory_space<smem>>
    %1075 = vector.broadcast %1074 : f32 to vector<2x13xf32>
    %1076 = arith.mulf %785, %1075 : vector<2x13xf32>
    %1077 = arith.addf %1072, %1076 : vector<2x13xf32>
    %1078 = arith.index_cast %arg0 : i32 to index
    %c54_121 = arith.constant 54 : index
    %1079 = memref.load %arg4[%1078, %c54_121] : memref<3x64xf32, #tpu.memory_space<smem>>
    %1080 = vector.broadcast %1079 : f32 to vector<2x13xf32>
    %1081 = arith.mulf %787, %1080 : vector<2x13xf32>
    %1082 = arith.addf %1077, %1081 : vector<2x13xf32>
    %1083 = arith.index_cast %arg0 : i32 to index
    %c55_122 = arith.constant 55 : index
    %1084 = memref.load %arg4[%1083, %c55_122] : memref<3x64xf32, #tpu.memory_space<smem>>
    %1085 = vector.broadcast %1084 : f32 to vector<2x13xf32>
    %1086 = arith.mulf %789, %1085 : vector<2x13xf32>
    %1087 = arith.addf %1082, %1086 : vector<2x13xf32>
    %1088 = arith.index_cast %arg0 : i32 to index
    %c56_123 = arith.constant 56 : index
    %1089 = memref.load %arg4[%1088, %c56_123] : memref<3x64xf32, #tpu.memory_space<smem>>
    %1090 = vector.broadcast %1089 : f32 to vector<2x13xf32>
    %1091 = arith.mulf %791, %1090 : vector<2x13xf32>
    %1092 = arith.addf %1087, %1091 : vector<2x13xf32>
    %1093 = arith.index_cast %arg0 : i32 to index
    %c57_124 = arith.constant 57 : index
    %1094 = memref.load %arg4[%1093, %c57_124] : memref<3x64xf32, #tpu.memory_space<smem>>
    %1095 = vector.broadcast %1094 : f32 to vector<2x13xf32>
    %1096 = arith.mulf %793, %1095 : vector<2x13xf32>
    %1097 = arith.addf %1092, %1096 : vector<2x13xf32>
    %1098 = arith.index_cast %arg0 : i32 to index
    %c58_125 = arith.constant 58 : index
    %1099 = memref.load %arg4[%1098, %c58_125] : memref<3x64xf32, #tpu.memory_space<smem>>
    %1100 = vector.broadcast %1099 : f32 to vector<2x13xf32>
    %1101 = arith.mulf %795, %1100 : vector<2x13xf32>
    %1102 = arith.addf %1097, %1101 : vector<2x13xf32>
    %1103 = arith.index_cast %arg0 : i32 to index
    %c59_126 = arith.constant 59 : index
    %1104 = memref.load %arg4[%1103, %c59_126] : memref<3x64xf32, #tpu.memory_space<smem>>
    %1105 = vector.broadcast %1104 : f32 to vector<2x13xf32>
    %1106 = arith.mulf %797, %1105 : vector<2x13xf32>
    %1107 = arith.addf %1102, %1106 : vector<2x13xf32>
    %1108 = arith.index_cast %arg0 : i32 to index
    %c60_127 = arith.constant 60 : index
    %1109 = memref.load %arg4[%1108, %c60_127] : memref<3x64xf32, #tpu.memory_space<smem>>
    %1110 = vector.broadcast %1109 : f32 to vector<2x13xf32>
    %1111 = arith.mulf %799, %1110 : vector<2x13xf32>
    %1112 = arith.addf %1107, %1111 : vector<2x13xf32>
    %1113 = arith.index_cast %arg0 : i32 to index
    %c61_128 = arith.constant 61 : index
    %1114 = memref.load %arg4[%1113, %c61_128] : memref<3x64xf32, #tpu.memory_space<smem>>
    %1115 = vector.broadcast %1114 : f32 to vector<2x13xf32>
    %1116 = arith.mulf %801, %1115 : vector<2x13xf32>
    %1117 = arith.addf %1112, %1116 : vector<2x13xf32>
    %1118 = arith.index_cast %arg0 : i32 to index
    %c62_129 = arith.constant 62 : index
    %1119 = memref.load %arg4[%1118, %c62_129] : memref<3x64xf32, #tpu.memory_space<smem>>
    %1120 = vector.broadcast %1119 : f32 to vector<2x13xf32>
    %1121 = arith.mulf %803, %1120 : vector<2x13xf32>
    %1122 = arith.addf %1117, %1121 : vector<2x13xf32>
    %1123 = arith.index_cast %arg0 : i32 to index
    %c63_130 = arith.constant 63 : index
    %1124 = memref.load %arg4[%1123, %c63_130] : memref<3x64xf32, #tpu.memory_space<smem>>
    %1125 = vector.broadcast %1124 : f32 to vector<2x13xf32>
    %1126 = arith.mulf %805, %1125 : vector<2x13xf32>
    %1127 = arith.addf %1122, %1126 : vector<2x13xf32>
    %1128 = arith.index_cast %arg0 : i32 to index
    %c1_131 = arith.constant 1 : index
    %1129 = memref.load %arg6[%1128, %c1_131] : memref<3x2xf32, #tpu.memory_space<smem>>
    %1130 = vector.broadcast %1129 : f32 to vector<2x13xf32>
    %1131 = arith.addf %1127, %1130 : vector<2x13xf32>
    %c0_132 = arith.constant 0 : index
    %c0_133 = arith.constant 0 : index
    %c0_134 = arith.constant 0 : index
    %c0_135 = arith.constant 0 : index
    %1132 = vector.load %arg7[%c0_132, %c0_133, %c0_134, %c0_135] : memref<1x2x2x13xf32, #tpu.memory_space<vmem>>, vector<1x1x2x13xf32>
    %1133 = vector.shape_cast %1132 : vector<1x1x2x13xf32> to vector<2x13xf32>
    %1134 = vector.shape_cast %968 : vector<2x13xf32> to vector<1x1x2x13xf32>
    tpu.vector_store %arg7[%c0_132, %c0_133, %c0_134, %c0_135], %1134 {strides = array<i32>} : memref<1x2x2x13xf32, #tpu.memory_space<vmem>>, vector<1x1x2x13xf32>,
    %c0_136 = arith.constant 0 : index
    %c1_137 = arith.constant 1 : index
    %c0_138 = arith.constant 0 : index
    %c0_139 = arith.constant 0 : index
    %1135 = vector.load %arg7[%c0_136, %c1_137, %c0_138, %c0_139] : memref<1x2x2x13xf32, #tpu.memory_space<vmem>>, vector<1x1x2x13xf32>
    %1136 = vector.shape_cast %1135 : vector<1x1x2x13xf32> to vector<2x13xf32>
    %1137 = vector.shape_cast %1131 : vector<2x13xf32> to vector<1x1x2x13xf32>
    tpu.vector_store %arg7[%c0_136, %c1_137, %c0_138, %c0_139], %1137 {strides = array<i32>} : memref<1x2x2x13xf32, #tpu.memory_space<vmem>>, vector<1x1x2x13xf32>,
    return
  }
  func.func @transform_0(%arg0: i32, %arg1: i32) -> (i32, i32, i32) {
    %c0_i32 = arith.constant 0 : i32
    %c0_i32_0 = arith.constant 0 : i32
    return %arg0, %arg1, %c0_i32 : i32, i32, i32
  }
  func.func @transform_1(%arg0: i32, %arg1: i32) -> (i32, i32) {
    %c0_i32 = arith.constant 0 : i32
    %c0_i32_0 = arith.constant 0 : i32
    %c0_i32_1 = arith.constant 0 : i32
    return %c0_i32, %c0_i32_0 : i32, i32
  }
  func.func @transform_2(%arg0: i32, %arg1: i32) -> (i32, i32) {
    %c0_i32 = arith.constant 0 : i32
    %c0_i32_0 = arith.constant 0 : i32
    %c0_i32_1 = arith.constant 0 : i32
    return %c0_i32, %c0_i32_0 : i32, i32
  }
  func.func @transform_3(%arg0: i32, %arg1: i32) -> (i32, i32) {
    %c0_i32 = arith.constant 0 : i32
    %c0_i32_0 = arith.constant 0 : i32
    %c0_i32_1 = arith.constant 0 : i32
    return %c0_i32, %c0_i32_0 : i32, i32
  }
  func.func @transform_4(%arg0: i32, %arg1: i32) -> (i32, i32) {
    %c0_i32 = arith.constant 0 : i32
    %c0_i32_0 = arith.constant 0 : i32
    %c0_i32_1 = arith.constant 0 : i32
    return %c0_i32, %c0_i32_0 : i32, i32
  }
  func.func @transform_5(%arg0: i32, %arg1: i32) -> (i32, i32, i32, i32) {
    %c0_i32 = arith.constant 0 : i32
    %c0_i32_0 = arith.constant 0 : i32
    %c0_i32_1 = arith.constant 0 : i32
    return %arg0, %c0_i32, %arg1, %c0_i32_0 : i32, i32, i32, i32
  }
}

</mosaic_0001>

<bundles_post_ra>
// kernel: drec_forward.1
= control target key start
LH: loop header
LB: loop body
LE: loop exit
PB: predicated region body
PF: predicated region fallthrough
CT: control target
= control target key end

     0   :  { %s3495_s0 = inlined_call_operand.vmem [shape: f32[3,2,16], index: 0, kind: input, shape index: {}]   ;;  %s3496_s1 = inlined_call_operand.vmem [shape: f32[3,128], index: 1, kind: input, shape index: {}]   ;;  %s3497_s2 = inlined_call_operand.vmem [shape: f32[3,64], index: 2, kind: input, shape index: {}]   ;;  %s3498_s3 = inlined_call_operand.vmem [shape: f32[3,32], index: 3, kind: input, shape index: {}]   ;;  %s3499_s4 = inlined_call_operand.vmem [shape: f32[3,2], index: 4, kind: input, shape index: {}]   ;;  %s3500_s5 = inlined_call_operand.vmem [shape: f32[3,2,2,13], index: 5, kind: output, shape index: {}]  }
   0x1   :  { %3606 = sst [smem:[#allocation44_spill]] %s3495_s0 }
   0x2   :  { %3607 = sst [smem:[#allocation45_spill]] %s3496_s1 }
   0x3   :  { %3608 = sst [smem:[#allocation46_spill]] %s3497_s2 }
   0x4   :  { %3609 = sst [smem:[#allocation47_spill]] %s3498_s3 }
   0x5   :  { %3610 = sst [smem:[#allocation48_spill]] %s3499_s4 }
   0x6   :  { %3611 = sst [smem:[#allocation49_spill]] %s3500_s5 }
   0x7   :  { %10 = vsyncpa [#allocation3], 0 }
   0x8   :  { %11 = vsyncpa [#allocation5], 0 }
   0x9   :  { %12 = vsyncpa [#allocation8], 0  ;;  %s2036_s18 = smov 0   ;;  %s2038_s19 = smov 0  }
   0xa   :  { %s2040_s20 = smov 0  }
   0xb LB: > { %3612 = sst [smem:[#allocation12_spill]] %s1993_s19  ;;  %s1812_s24 = sadd.s32 4294967295, %s1997_s20   ;;  %s1997_s20 = sphi %s2040_s20, %s18_s20   ;;  %s1993_s19 = sphi %s2038_s19, %s3764_s19   ;;  %s1989_s18 = sphi %s2036_s18, %s3763_s18  }
   0xc   : > { %3613 = sst [smem:[#allocation13_spill]] %s1997_s20  ;;  %p1814_p0 = scmp.ge.s32.totalorder %s1997_s20, 1 }
   0xd   : > { %s3614_s2 = sld [smem:[#allocation46_spill]]  ;;  %p175_p1 = scmp.lt.s32.totalorder %s1997_s20, 4 }
   0xe   : > { %p2057_p2 = scmp.eq.s32.totalorder %s1812_s24, 0  ;;  %s30_s27 = sadd.s32 1, %s1993_s19 }
   0xf   : > { %p2061_p3 = pnand %p1814_p0, %p175_p1  ;;  %s3617_s1 = sld [smem:[#allocation45_spill]] }
  0x10   : > { %s3615_s25 = scalar_select %p2057_p2, 1, 0 }
  0x11   : > { %s3616_s26 = scalar_select %p2061_p3, 1, 0 }
  0x12   : > { %p1849_p4 = pneg %p2061_p3  ;;  %p2077_p6 = scmp.ge.s32.totalorder %s30_s27, 3 }
  0x13   : > { %s199_s23 = sshll.u32 %s3614_s2, 4  ;;  %s3620_s3 = sld [smem:[#allocation47_spill]]  ;;  %s200_s23 = int_to_ptr.vmem [resolvable:$true] %s199_s23 }
  0x14   : > { %p2073_p5 = pnand %p2057_p2, %p1849_p4  ;;  %s1903_s11 = scalar_lea.vmem %s200_s23, 64 }
  0x15   : > { %s188_s30 = sshll.u32 %s3617_s1, 4  ;;  %p1904_p7 = scmp.ne.s32.totalorder %s200_s23, %s1903_s11  ;;  %s189_s30 = int_to_ptr.vmem [resolvable:$true] %s188_s30 }
  0x16   : > { %p1905_p8 = pneg %p2073_p5  ;;  %p1911_p11 = scmp.lt.s32.totalorder %s200_s23, %s200_s23 }
  0x17   : > { %p1912_p12 = scmp.lt.s32.totalorder %s1903_s11, %s1903_s11 }
  0x18   : > { %p1906_p9 = pnand %p1905_p8, %p1904_p7 }
  0x19   : > { %s210_s10 = sshll.u32 %s3620_s3, 4  ;;  %p1913_p13 = por %p1912_p12, %p1911_p11  ;;  %s211_s10 = int_to_ptr.vmem [resolvable:$true] %s210_s10 }
  0x1a   : > { %p1907_p10 = pneg %p1906_p9 }
  0x1c   : > { %p1914_p0 = pnand %p1913_p13, %p1907_p10 }
  0x1e   : > { %1917 = shalt.err (!%p1914_p0)
}
  0x1f   : > { %s1999_s12 = smov [#allocation4]   ;;  %s3766_s27 = smov (%p2077_p6, %s30_s27), 0 }
  0x20   : > { %1855 = dma.vmem_to_smem (!%p2073_p5), %s200_s23, 64, %s1999_s12, [#allocation5]  }
  0x21   : > { %3621 = sst [smem:[#allocation14_spill]] %s3766_s27  ;;  %s1918_s13 = scalar_lea.vmem %s189_s30, 64 }
  0x22   : > { %p1919_p1 = scmp.ne.s32.totalorder %s189_s30, %s1918_s13  ;;  %p1926_p9 = scmp.lt.s32.totalorder %s189_s30, %s189_s30 }
  0x23   : > { %p1927_p2 = scmp.lt.s32.totalorder %s1918_s13, %s1918_s13 }
  0x24   : > { %p1921_p4 = pnand %p1919_p1, %p1905_p8 }
  0x25   : > { %p1928_p11 = por %p1927_p2, %p1926_p9 }
  0x26   : > { %p1922_p7 = pneg %p1921_p4 }
  0x28   : > { %p1929_p10 = pnand %p1928_p11, %p1922_p7 }
  0x2a   : > { %1932 = shalt.err (!%p1929_p10)
}
  0x2b   : > { %s2000_s14 = smov [#allocation2]   ;;  %s1933_s15 = scalar_lea.vmem %s211_s10, 64 }
  0x2c   : > { %1852 = dma.vmem_to_smem (!%p2073_p5), %s189_s30, 64, %s2000_s14, [#allocation3]  }
  0x2d   : > { %p1934_p6 = scmp.ne.s32.totalorder %s211_s10, %s1933_s15  ;;  %p1941_p0 = scmp.lt.s32.totalorder %s211_s10, %s211_s10 }
  0x2e   : > { %p1942_p1 = scmp.lt.s32.totalorder %s1933_s15, %s1933_s15 }
  0x2f   : > { %p1936_p12 = pnand %p1934_p6, %p1905_p8 }
  0x30   : > { %p1943_p4 = por %p1942_p1, %p1941_p0 }
  0x31   : > { %p1937_p13 = pneg %p1936_p12 }
  0x33   : > { %p1944_p3 = pnand %p1943_p4, %p1937_p13 }
  0x35   : > { %1947 = shalt.err (!%p1944_p3)
}
  0x36   : > { %s2001_s16 = smov [#allocation6]   ;;  %s3622_s4 = sld [smem:[#allocation48_spill]] }
  0x37   : > { %1858 = dma.vmem_to_smem (!%p2073_p5), %s211_s10, 64, %s2001_s16, [#allocation5]  }
  0x3c   : > { %s221_s22 = sshll.u32 %s3622_s4, 4  ;;  %s222_s22 = int_to_ptr.vmem [resolvable:$true] %s221_s22 }
  0x3d   : > { %s1948_s23 = scalar_lea.vmem %s222_s22, 64  ;;  %p1956_p11 = scmp.lt.s32.totalorder %s222_s22, %s222_s22 }
  0x3e   : > { %p1949_p2 = scmp.ne.s32.totalorder %s222_s22, %s1948_s23  ;;  %p1957_p10 = scmp.lt.s32.totalorder %s1948_s23, %s1948_s23 }
  0x40   : > { %p1951_p7 = pnand %p1949_p2, %p1905_p8  ;;  %p1958_p6 = por %p1957_p10, %p1956_p11 }
  0x42   : > { %p1952_p9 = pneg %p1951_p7 }
  0x44   : > { %p1959_p3 = pnand %p1958_p6, %p1952_p9 }
  0x46   : > { %1962 = shalt.err (!%p1959_p3)
}
  0x47   : > { %s2002_s24 = smov [#allocation7]   ;;  %p3623_p12 = scmp.ne.s32.totalorder %s3616_s26, 0 }
  0x48   : > { %1861 = dma.vmem_to_smem (!%p2073_p5), %s222_s22, 64, %s2002_s24, [#allocation8]  }
  0x49   : > { %244 = sbr.rel (%p3623_p12) target bundleno = 420 (0x1a4), region = 40 }
  0x4e   : > { %p3624_p13 = scmp.ne.s32.totalorder %s3615_s25, 0 }
  0x50   : > { %1976 = dma.done.wait (%p3624_p13), [#allocation3], 64  }
  0x51   : > { %1978 = vsyncadd (%p3624_p13), [#allocation3], 4294967232 }
  0x52   : > { %1980 = dma.done.wait (%p3624_p13), [#allocation5], 128  }
  0x53   : > { %1982 = vsyncadd (%p3624_p13), [#allocation5], 4294967168 }
  0x54   : > { %1984 = dma.done.wait (%p3624_p13), [#allocation8], 64  }
  0x55   : > { %1986 = vsyncadd (%p3624_p13), [#allocation8], 4294967232 }
  0x56   : > { %262 = sfence }
  0x57   : > { %p290_p5 = scmp.lt.s32.totalorder %s1989_s18, 2  ;;  %s2129_s26 = sshll.u32 %s1989_s18, 7  ;;  %vm1686_vm0 = vcmask 99328  }
  0x58   : > { %s2132_s28 = sadd.s32 3, %s2129_s26  ;;  %s2139_s29 = sadd.s32 1, %s2129_s26 }
  0x59   : > { %s3768_s18 = smov (!%p290_p5, %s1989_s18), 2  ;;  %s329_s25 = sld [smem:[#allocation2 + %s2132_s28]] }
  0x5a   : > { %3625 = sst [smem:[#allocation15_spill]] %s3768_s18  ;;  %s1825_s30 = sshll.u32 %s3768_s18, 1 }
  0x5b   : > { %3626 = sst [smem:[#allocation16_spill]] %s2139_s29  ;;  %s2149_s10 = sadd.s32 5, %s2129_s26 }
  0x5c   : > { %s3627_s0 = sld [smem:[#allocation44_spill]]  ;;  %s2156_s12 = sadd.s32 2, %s2129_s26 }
  0x5d   : > { %s311_s9 = sld [smem:[#allocation2 + %s2139_s29]]  ;;  %s2160_s14 = sadd.s32 7, %s2129_s26 }
  0x5e   : > { %s345_s11 = sld [smem:[#allocation2 + %s2149_s10]]  ;;  %s2163_s15 = sadd.s32 6, %s2129_s26 }
  0x5f   : > { %s320_s13 = sld [smem:[#allocation2 + %s2156_s12]]  ;;  %v330_v1 = vstv %s329_s25  ;;  %s2168_s17 = sadd.s32 10, %s2129_s26 }
  0x60   : > { %3629 = sst [smem:[#allocation18_spill]] %s2160_s14  ;;  %s2172_s22 = sadd.s32 9, %s2129_s26 }
  0x61   : > { %3630 = sst [smem:[#allocation19_spill]] %s2163_s15  ;;  %s3504_s23 = smov 125  }
  0x62   : > { %s2145_s8 = scalar_lea.vmem %s3627_s0, %s1825_s30  ;;  %s363_s16 = sld [smem:[#allocation2 + %s2160_s14]] }
  0x63   : > { %3628 = sst [smem:[#allocation17_spill]] %s2145_s8  ;;  %v2152_v0 = vld [vmem:[%s2145_s8] sm:$0x3]  ;;  %v312_v3 = vstv %s311_s9  ;;  %s2178_s25 = sadd.s32 13, %s2129_s26 }
  0x64   : > { %v331_v2 = vmul.f32 %v330_v1, %v2152_v0  ;;  %3631 = sst [smem:[#allocation20_spill]] %s2168_s17  ;;  %v313_v4 = vmul.f32 %v312_v3, %v2152_v0  ;;  %v346_v5 = vstv %s345_s11  ;;  %s2182_s6 = sadd.s32 11, %s2129_s26 }
  0x65   : > { %s354_s21 = sld [smem:[#allocation2 + %s2163_s15]]  ;;  %s3506_s7 = smov 127   ;;  %v347_v6 = vmul.f32 %v346_v5, %v2152_v0  ;;  %v321_v7 = vstv %s320_s13 }
  0x66   : > { %3632 = sst [smem:[#allocation21_spill]] %s2172_s22  ;;  %333 = vrot.lane.b32.xlu1 %v331_v2, %s3504_s23  ;;  %315 = vrot.lane.b32.xlu0 %v313_v4, %s3506_s7  ;;  %s2188_s23 = sadd.s32 15, %s2129_s26  ;;  %v322_v8 = vmul.f32 %v321_v7, %v2152_v0 }
  0x67   : > { %s388_s24 = sld [smem:[#allocation2 + %s2168_s17]]  ;;  %s2196_s11 = sadd.s32 14, %s2129_s26 }
  0x68   : > { %3633 = sst [smem:[#allocation22_spill]] %s2178_s25  ;;  %v364_v9 = vstv %s363_s16  ;;  %s3509_s1 = smov 126  }
  0x69   : > { %s379_s30 = sld [smem:[#allocation2 + %s2172_s22]]  ;;  %v365_v10 = vmul.f32 %v364_v9, %v2152_v0  ;;  %s2203_s2 = sadd.s32 18, %s2129_s26 }
  0x6a   : > { %3634 = sst [smem:[#allocation23_spill]] %s2182_s6  ;;  %349 = vrot.lane.b32.xlu1 %v347_v6, %s3506_s7  ;;  %324 = vrot.lane.b32.xlu0 %v322_v8, %s3509_s1  ;;  %s3638_s7 = smov 125  }
  0x6b   : > { %s413_s9 = sld [smem:[#allocation2 + %s2178_s25]]  ;;  %v355_v11 = vstv %s354_s21  ;;  %s2209_s21 = sadd.s32 17, %s2129_s26 }
  0x6c   : > { %3635 = sst [smem:[#allocation24_spill]] %s2188_s23  ;;  %v356_v12 = vmul.f32 %v355_v11, %v2152_v0  ;;  %s2222_s4 = sadd.s32 19, %s2129_s26 }
  0x6d   : > { %s2192_s0 = sld [smem:[#allocation2 + %s2182_s6]]  ;;  %v389_v13 = vstv %s388_s24  ;;  %s2215_s24 = sadd.s32 21, %s2129_s26 }
  0x6e   : > { %3636 = sst [smem:[#allocation25_spill]] %s2196_s11  ;;  %367 = vrot.lane.b32.xlu1 %v365_v10, %s3638_s7  ;;  %v390_v15 = vmul.f32 %v389_v13, %v2152_v0  ;;  %358 = vrot.lane.b32.xlu0 %v356_v12, %s3509_s1  ;;  %s3642_s27 = smov 127  }
  0x6f   : > { %s431_s13 = sld [smem:[#allocation2 + %s2188_s23]]  ;;  %v380_v14 = vstv %s379_s30  ;;  %s2228_s19 = sadd.s32 23, %s2129_s26 }
  0x70   : > { %3637 = sst [smem:[#allocation26_spill]] %s2203_s2  ;;  %v381_v17 = vmul.f32 %v380_v14, %v2152_v0  ;;  %s2240_s20 = sadd.s32 26, %s2129_s26 }
  0x71   : > { %s422_s16 = sld [smem:[#allocation2 + %s2196_s11]]  ;;  %v414_v16 = vstv %s413_s9  ;;  %s2246_s5 = sadd.s32 25, %s2129_s26 }
  0x72   : > { %3639 = sst [smem:[#allocation27_spill]] %s2209_s21  ;;  %392 = vrot.lane.b32.xlu1 %v390_v15, %s3509_s1  ;;  %v415_v19 = vmul.f32 %v414_v16, %v2152_v0  ;;  %383 = vrot.lane.b32.xlu0 %v381_v17, %s3642_s27  ;;  %s2234_s1 = sadd.s32 22, %s2129_s26 }
  0x73   : > { %s456_s3 = sld [smem:[#allocation2 + %s2203_s2]]  ;;  %v398_v18 = vstv %s2192_s0  ;;  %s3647_s18 = smov 126  }
  0x74   : > { %3640 = sst [smem:[#allocation28_spill]] %s2215_s24  ;;  %v399_v21 = vmul.f32 %v398_v18, %v2152_v0  ;;  %s3653_s2 = sadd.s32 37, %s2129_s26 }
  0x75   : > { %s447_s30 = sld [smem:[#allocation2 + %s2209_s21]]  ;;  %v432_v20 = vstv %s431_s13  ;;  %s3658_s25 = sadd.s32 41, %s2129_s26 }
  0x76   : > { %3641 = sst [smem:[#allocation29_spill]] %s2222_s4  ;;  %417 = vrot.lane.b32.xlu1 %v415_v19, %s3642_s27  ;;  %v433_v23 = vmul.f32 %v432_v20, %v2152_v0  ;;  %401 = vrot.lane.b32.xlu0 %v399_v21, %s3638_s7  ;;  %s2484_s6 = sadd.s32 4, %s2129_s26 }
  0x77   : > { %s481_s9 = sld [smem:[#allocation2 + %s2215_s24]]  ;;  %v423_v22 = vstv %s422_s16  ;;  %s3652_s24 = sadd.s32 33, %s2129_s26 }
  0x78   : > { %3643 = sst [smem:[#allocation30_spill]] %s2228_s19  ;;  %v424_v25 = vmul.f32 %v423_v22, %v2152_v0  ;;  %s1008_s17 = sadd.s32 83, %s2129_s26 }
  0x79   : > { %s465_s0 = sld [smem:[#allocation2 + %s2222_s4]]  ;;  %v457_v24 = vstv %s456_s3  ;;  %s1033_s14 = sadd.s32 86, %s2129_s26 }
  0x7a   : > { %3644 = sst [smem:[#allocation31_spill]] %s2234_s1  ;;  %435 = vrot.lane.b32.xlu1 %v433_v23, %s3638_s7  ;;  %v458_v27 = vmul.f32 %v457_v24, %v2152_v0  ;;  %426 = vrot.lane.b32.xlu0 %v424_v25, %s3647_s18  ;;  %s2544_s8 = sadd.s32 12, %s2129_s26 }
  0x7b   : > { %s499_s13 = sld [smem:[#allocation2 + %s2228_s19]]  ;;  %v448_v26 = vstv %s447_s30  ;;  %s2252_s19 = sadd.s32 29, %s2129_s26 }
  0x7c   : > { %3645 = sst [smem:[#allocation32_spill]] %s2240_s20  ;;  %v449_v29 = vmul.f32 %v448_v26, %v2152_v0  ;;  %s2593_s15 = sadd.s32 16, %s2129_s26 }
  0x7d   : > { %s490_s16 = sld [smem:[#allocation2 + %s2234_s1]]  ;;  %v482_v28 = vstv %s481_s9  ;;  %s2258_s1 = sadd.s32 27, %s2129_s26 }
  0x7e   : > { %3646 = sst [smem:[#allocation33_spill]] %s2246_s5  ;;  %460 = vrot.lane.b32.xlu1 %v458_v27, %s3647_s18  ;;  %v483_v31 = vmul.f32 %v482_v28, %v2152_v0  ;;  %451 = vrot.lane.b32.xlu0 %v449_v29, %s3642_s27 }
  0x7f   : > { %s524_s3 = sld [smem:[#allocation2 + %s2240_s20]]  ;;  %v466_v30 = vstv %s465_s0  ;;  %s2264_s20 = sadd.s32 31, %s2129_s26 }
  0x80   : > { %3648 = sst [smem:[#allocation34_spill]] %s2252_s19  ;;  %v467_v33 = vmul.f32 %v466_v30, %v2152_v0 }
  0x81   : > { %s515_s30 = sld [smem:[#allocation2 + %s2246_s5]]  ;;  %v500_v32 = vstv %s499_s13  ;;  %s2270_s5 = sadd.s32 30, %s2129_s26 }
  0x82   : > { %3649 = sst [smem:[#allocation35_spill]] %s2258_s1  ;;  %485 = vrot.lane.b32.xlu1 %v483_v31, %s3642_s27  ;;  %v501_v35 = vmul.f32 %v500_v32, %v2152_v0  ;;  %469 = vrot.lane.b32.xlu0 %v467_v33, %s3638_s7 }
  0x83   : > { %s549_s9 = sld [smem:[#allocation2 + %s2252_s19]]  ;;  %v491_v34 = vstv %s490_s16  ;;  %s3529_s19 = sadd.s32 34, %s2129_s26 }
  0x84   : > { %3650 = sst [smem:[#allocation36_spill]] %s2264_s20  ;;  %v492_v37 = vmul.f32 %v491_v34, %v2152_v0 }
  0x85   : > { %s533_s0 = sld [smem:[#allocation2 + %s2258_s1]]  ;;  %v525_v36 = vstv %s524_s3  ;;  %s3530_s1 = sadd.s32 33, %s2129_s26 }
  0x86   : > { %3651 = sst [smem:[#allocation37_spill]] %s2270_s5  ;;  %503 = vrot.lane.b32.xlu1 %v501_v35, %s3638_s7  ;;  %v526_v39 = vmul.f32 %v525_v36, %v2152_v0  ;;  %494 = vrot.lane.b32.xlu0 %v492_v37, %s3647_s18 }
  0x87   : > { %s567_s13 = sld [smem:[#allocation2 + %s2264_s20]]  ;;  %v516_v38 = vstv %s515_s30  ;;  %s3531_s20 = sadd.s32 37, %s2129_s26 }
  0x88   : > { %s558_s16 = sld [smem:[#allocation2 + %s2270_s5]]  ;;  %v517_v41 = vmul.f32 %v516_v38, %v2152_v0  ;;  %s3532_s5 = sadd.s32 35, %s2129_s26 }
  0x89   : > { %v550_v40 = vstv %s549_s9  ;;  %s592_s3 = sld [smem:[#allocation2 + %s3529_s19]]  ;;  %s3533_s19 = sadd.s32 39, %s2129_s26 }
  0x8a   : > { %s583_s30 = sld [smem:[#allocation2 + %s3530_s1]]  ;;  %528 = vrot.lane.b32.xlu1 %v526_v39, %s3647_s18  ;;  %v551_v43 = vmul.f32 %v550_v40, %v2152_v0  ;;  %519 = vrot.lane.b32.xlu0 %v517_v41, %s3642_s27  ;;  %s3534_s1 = sadd.s32 38, %s2129_s26 }
  0x8b   : > { %v534_v42 = vstv %s533_s0  ;;  %s617_s9 = sld [smem:[#allocation2 + %s3531_s20]]  ;;  %s3535_s20 = sadd.s32 42, %s2129_s26 }
  0x8c   : > { %v535_v45 = vmul.f32 %v534_v42, %v2152_v0  ;;  %s601_s0 = sld [smem:[#allocation2 + %s3532_s5]]  ;;  %s3536_s5 = sadd.s32 41, %s2129_s26 }
  0x8d   : > { %v568_v44 = vstv %s567_s13  ;;  %s635_s13 = sld [smem:[#allocation2 + %s3533_s19]]  ;;  %s3537_s19 = sadd.s32 45, %s2129_s26 }
  0x8e   : > { %v559_v46 = vstv %s558_s16  ;;  %553 = vrot.lane.b32.xlu1 %v551_v43, %s3642_s27  ;;  %v569_v47 = vmul.f32 %v568_v44, %v2152_v0  ;;  %537 = vrot.lane.b32.xlu0 %v535_v45, %s3638_s7  ;;  %s626_s16 = sld [smem:[#allocation2 + %s3534_s1]]  ;;  %s3538_s1 = sadd.s32 43, %s2129_s26 }
  0x8f   : > { %v593_v48 = vstv %s592_s3  ;;  %v560_v49 = vmul.f32 %v559_v46, %v2152_v0  ;;  %s660_s3 = sld [smem:[#allocation2 + %s3535_s20]]  ;;  %s3539_s20 = sadd.s32 47, %s2129_s26 }
  0x90   : > { %v584_v50 = vstv %s583_s30  ;;  %v594_v51 = vmul.f32 %v593_v48, %v2152_v0  ;;  %s651_s30 = sld [smem:[#allocation2 + %s3536_s5]]  ;;  %s3540_s5 = sadd.s32 46, %s2129_s26 }
  0x91   : > { %v618_v52 = vstv %s617_s9  ;;  %v585_v53 = vmul.f32 %v584_v50, %v2152_v0  ;;  %s685_s9 = sld [smem:[#allocation2 + %s3537_s19]]  ;;  %s3541_s19 = sadd.s32 50, %s2129_s26 }
  0x92   : > { %571 = vrot.lane.b32.xlu1 %v569_v47, %s3638_s7  ;;  %562 = vrot.lane.b32.xlu0 %v560_v49, %s3647_s18  ;;  %v602_v54 = vstv %s601_s0  ;;  %v619_v55 = vmul.f32 %v618_v52, %v2152_v0  ;;  %s669_s0 = sld [smem:[#allocation2 + %s3538_s1]]  ;;  %s3542_s1 = sadd.s32 49, %s2129_s26 }
  0x93   : > { %v636_v56 = vstv %s635_s13  ;;  %v603_v57 = vmul.f32 %v602_v54, %v2152_v0  ;;  %s703_s13 = sld [smem:[#allocation2 + %s3539_s20]]  ;;  %s3543_s20 = sadd.s32 53, %s2129_s26 }
  0x94   : > { %v627_v58 = vstv %s626_s16  ;;  %v637_v59 = vmul.f32 %v636_v56, %v2152_v0  ;;  %s694_s16 = sld [smem:[#allocation2 + %s3540_s5]]  ;;  %s3544_s5 = sadd.s32 51, %s2129_s26 }
  0x95   : > { %v661_v60 = vstv %s660_s3  ;;  %v628_v61 = vmul.f32 %v627_v58, %v2152_v0  ;;  %s728_s3 = sld [smem:[#allocation2 + %s3541_s19]]  ;;  %s3545_s19 = sadd.s32 55, %s2129_s26 }
  0x96   : > { %596 = vrot.lane.b32.xlu1 %v594_v51, %s3647_s18  ;;  %587 = vrot.lane.b32.xlu0 %v585_v53, %s3642_s27  ;;  %v652_v62 = vstv %s651_s30  ;;  %v662_v63 = vmul.f32 %v661_v60, %v2152_v0  ;;  %s719_s30 = sld [smem:[#allocation2 + %s3542_s1]]  ;;  %s3546_s1 = sadd.s32 54, %s2129_s26 }
  0x97   : > { %v686_v1 = vstv %s685_s9  ;;  %v653_v2 = vmul.f32 %v652_v62, %v2152_v0  ;;  %s753_s9 = sld [smem:[#allocation2 + %s3543_s20]]  ;;  %s3547_s20 = sadd.s32 58, %s2129_s26 }
  0x98   : > { %v670_v3 = vstv %s669_s0  ;;  %v687_v4 = vmul.f32 %v686_v1, %v2152_v0  ;;  %s737_s0 = sld [smem:[#allocation2 + %s3544_s5]]  ;;  %s3548_s5 = sadd.s32 57, %s2129_s26 }
  0x99   : > { %v704_v5 = vstv %s703_s13  ;;  %v671_v6 = vmul.f32 %v670_v3, %v2152_v0  ;;  %s771_s13 = sld [smem:[#allocation2 + %s3545_s19]]  ;;  %s3549_s19 = sadd.s32 59, %s2129_s26 }
  0x9a   : > { %621 = vrot.lane.b32.xlu1 %v619_v55, %s3642_s27  ;;  %605 = vrot.lane.b32.xlu0 %v603_v57, %s3638_s7  ;;  %v695_v7 = vstv %s694_s16  ;;  %v705_v8 = vmul.f32 %v704_v5, %v2152_v0  ;;  %s762_s16 = sld [smem:[#allocation2 + %s3546_s1]]  ;;  %s3550_s1 = sadd.s32 61, %s2129_s26 }
  0x9b   : > { %v729_v9 = vstv %s728_s3  ;;  %v696_v10 = vmul.f32 %v695_v7, %v2152_v0  ;;  %s796_s3 = sld [smem:[#allocation2 + %s3547_s20]]  ;;  %s854_s20 = sadd.s32 65, %s2129_s26 }
  0x9c   : > { %v720_v11 = vstv %s719_s30  ;;  %v730_v12 = vmul.f32 %v729_v9, %v2152_v0  ;;  %s787_s30 = sld [smem:[#allocation2 + %s3548_s5]]  ;;  %s3551_s5 = sadd.s32 62, %s2129_s26 }
  0x9d   : > { %v754_v13 = vstv %s753_s9  ;;  %v721_v14 = vmul.f32 %v720_v11, %v2152_v0  ;;  %s805_s9 = sld [smem:[#allocation2 + %s3549_s19]]  ;;  %s863_s19 = sadd.s32 66, %s2129_s26 }
  0x9e   : > { %639 = vrot.lane.b32.xlu1 %v637_v59, %s3638_s7  ;;  %630 = vrot.lane.b32.xlu0 %v628_v61, %s3647_s18  ;;  %v738_v15 = vstv %s737_s0  ;;  %v755_v16 = vmul.f32 %v754_v13, %v2152_v0  ;;  %s821_s0 = sld [smem:[#allocation2 + %s3550_s1]]  ;;  %s3552_s1 = sadd.s32 63, %s2129_s26 }
  0x9f   : > { %v772_v17 = vstv %s771_s13  ;;  %v739_v18 = vmul.f32 %v738_v15, %v2152_v0  ;;  %s855_s13 = sld [smem:[#allocation2 + %s854_s20]] }
  0xa0   : > { %v763_v19 = vstv %s762_s16  ;;  %v773_v20 = vmul.f32 %v772_v17, %v2152_v0  ;;  %s2395_s16 = sld [smem:[#allocation2 + %s3551_s5]] }
  0xa1   : > { %v797_v21 = vstv %s796_s3  ;;  %v764_v22 = vmul.f32 %v763_v19, %v2152_v0  ;;  %s2400_s20 = sld [smem:[#allocation2 + %s863_s19]]  ;;  %s872_s3 = sadd.s32 67, %s2129_s26 }
  0xa2   : > { %664 = vrot.lane.b32.xlu1 %v662_v63, %s3647_s18  ;;  %655 = vrot.lane.b32.xlu0 %v653_v2, %s3642_s27  ;;  %v788_v23 = vstv %s787_s30  ;;  %v798_v24 = vmul.f32 %v797_v21, %v2152_v0  ;;  %s2407_s30 = sld [smem:[#allocation2 + %s3552_s1]] }
  0xa3   : > { %v806_v25 = vstv %s805_s9  ;;  %v789_v26 = vmul.f32 %v788_v23, %v2152_v0  ;;  %s888_s9 = sadd.s32 69, %s2129_s26  ;;  %s2412_s19 = sld [smem:[#allocation2 + %s872_s3]] }
  0xa4   : > { %v822_v27 = vstv %s821_s0  ;;  %v807_v28 = vmul.f32 %v806_v25, %v2152_v0  ;;  %s2415_s5 = sld [smem:[#allocation4 + %s2132_s28]]  ;;  %s922_s0 = sadd.s32 73, %s2129_s26 }
  0xa5   : > { %v856_v29 = vstv %s855_s13  ;;  %v823_v30 = vmul.f32 %v822_v27, %v2152_v0  ;;  %s2421_s1 = sld [smem:[#allocation2 + %s888_s9]]  ;;  %s897_s13 = sadd.s32 70, %s2129_s26 }
  0xa6   : > { %689 = vrot.lane.b32.xlu1 %v687_v4, %s3642_s27  ;;  %673 = vrot.lane.b32.xlu0 %v671_v6, %s3638_s7  ;;  %v831_v31 = vstv %s2395_s16  ;;  %s2425_s4 = sld [smem:[#allocation4 + %s3652_s24]]  ;;  %v857_v32 = vmul.f32 %v856_v29, %v2152_v0  ;;  %s931_s24 = sadd.s32 74, %s2129_s26 }
  0xa7   : > { %v865_v33 = vstv %s2400_s20  ;;  %s2431_s3 = sld [smem:[#allocation2 + %s922_s0]]  ;;  %v832_v34 = vmul.f32 %v831_v31, %v2152_v0  ;;  %s3655_s9 = sadd.s32 35, %s2129_s26 }
  0xa8   : > { %s2435_s21 = sld [smem:[#allocation4 + %s3653_s2]]  ;;  %v840_v35 = vstv %s2407_s30  ;;  %v866_v36 = vmul.f32 %v865_v33, %v2152_v0  ;;  %s906_s2 = sadd.s32 71, %s2129_s26 }
  0xa9   : > { %s2441_s16 = sld [smem:[#allocation2 + %s897_s13]]  ;;  %v874_v37 = vstv %s2412_s19  ;;  %s3656_s0 = sadd.s32 39, %s2129_s26  ;;  %v841_v38 = vmul.f32 %v840_v35, %v2152_v0 }
  0xaa   : > { %707 = vrot.lane.b32.xlu1 %v705_v8, %s3638_s7  ;;  %698 = vrot.lane.b32.xlu0 %v696_v10, %s3647_s18  ;;  %s2445_s23 = sld [smem:[#allocation4 + %s3655_s9]]  ;;  %s940_s30 = sadd.s32 75, %s2129_s26  ;;  %v875_v40 = vmul.f32 %v874_v37, %v2152_v0 }
  0xab   : > { %s2451_s20 = sld [smem:[#allocation2 + %s931_s24]]  ;;  %v890_v39 = vstv %s2421_s1  ;;  %s956_s9 = sadd.s32 77, %s2129_s26 }
  0xac   : > { %s2455_s11 = sld [smem:[#allocation4 + %s3656_s0]]  ;;  %s990_s0 = sadd.s32 81, %s2129_s26  ;;  %v891_v42 = vmul.f32 %v890_v39, %v2152_v0 }
  0xad   : > { %s2461_s13 = sld [smem:[#allocation2 + %s906_s2]]  ;;  %v924_v41 = vstv %s2431_s3 }
  0xae   : > { %732 = vrot.lane.b32.xlu1 %v730_v12, %s3647_s18  ;;  %723 = vrot.lane.b32.xlu0 %v721_v14, %s3642_s27  ;;  %3654 = sst [smem:[#allocation38_spill]] %s2435_s21  ;;  %v925_v44 = vmul.f32 %v924_v41, %v2152_v0  ;;  %s1058_s21 = sadd.s32 89, %s2129_s26 }
  0xaf   : > { %s2466_s19 = sld [smem:[#allocation4 + %s3658_s25]]  ;;  %s965_s25 = sadd.s32 78, %s2129_s26  ;;  %v899_v43 = vstv %s2441_s16 }
  0xb0   : > { %s2471_s24 = sld [smem:[#allocation2 + %s940_s30]]  ;;  %v900_v46 = vmul.f32 %v899_v43, %v2152_v0 }
  0xb1   : > { %s2476_s1 = sld [smem:[#allocation2 + %s956_s9]]  ;;  %v933_v45 = vstv %s2451_s20  ;;  %s999_s9 = sadd.s32 82, %s2129_s26 }
  0xb2   : > { %757 = vrot.lane.b32.xlu1 %v755_v16, %s3642_s27  ;;  %741 = vrot.lane.b32.xlu0 %v739_v18, %s3638_s7  ;;  %3657 = sst [smem:[#allocation39_spill]] %s2455_s11  ;;  %v934_v48 = vmul.f32 %v933_v45, %v2152_v0  ;;  %s1024_s11 = sadd.s32 85, %s2129_s26 }
  0xb3   : > { %s2481_s2 = sld [smem:[#allocation2 + %s2129_s26]]  ;;  %v908_v47 = vstv %s2461_s13 }
  0xb4   : > { %s2488_s3 = sld [smem:[#allocation2 + %s990_s0]]  ;;  %s974_s0 = sadd.s32 79, %s2129_s26  ;;  %v909_v50 = vmul.f32 %v908_v47, %v2152_v0 }
  0xb5   : > { %3659 = sst [smem:[#allocation40_spill]] %s2466_s19 }
  0xb6   : > { %775 = vrot.lane.b32.xlu1 %v773_v20, %s3638_s7  ;;  %766 = vrot.lane.b32.xlu0 %v764_v22, %s3647_s18  ;;  %s2491_s30 = sld [smem:[#allocation2 + %s965_s25]]  ;;  %v942_v49 = vstv %s2471_s24 }
  0xb7   : > { %s2496_s16 = sld [smem:[#allocation2 + %s2484_s6]]  ;;  %v958_v51 = vstv %s2476_s1  ;;  %v943_v52 = vmul.f32 %v942_v49, %v2152_v0 }
  0xb8   : > { %s2501_s19 = sld [smem:[#allocation6 + %s2129_s26]]  ;;  %v959_v54 = vmul.f32 %v958_v51, %v2152_v0 }
  0xb9   : > { %s2507_s20 = sld [smem:[#allocation4 + %s2129_s26]]  ;;  %v308_v56 = vstv %s2481_s2  ;;  %s1067_s2 = sadd.s32 90, %s2129_s26 }
  0xba   : > { %800 = vrot.lane.b32.xlu1 %v798_v24, %s3647_s18  ;;  %791 = vrot.lane.b32.xlu0 %v789_v26, %s3642_s27  ;;  %s2510_s25 = sld [smem:[#allocation2 + %s999_s9]]  ;;  %s2528_s9 = sadd.s32 8, %s2129_s26  ;;  %v992_v53 = vstv %s2488_s3  ;;  %v309_v62 = vmul.f32 %v308_v56, %v2152_v0 }
  0xbb   : > { %s2514_s13 = sld [smem:[#allocation2 + %s974_s0]]  ;;  %v993_v57 = vmul.f32 %v992_v53, %v2152_v0 }
  0xbc   : > { %s2519_s22 = sld [smem:[#allocation6 + %s2139_s29]]  ;;  %v967_v55 = vstv %s2491_s30  ;;  %s1042_s30 = sadd.s32 87, %s2129_s26 }
  0xbd   : > { %s2525_s24 = sld [smem:[#allocation4 + %s2139_s29]]  ;;  %v968_v60 = vmul.f32 %v967_v55, %v2152_v0  ;;  %v342_v61 = vstv %s2496_s16 }
  0xbe   : > { %809 = vrot.lane.b32.xlu1 %v807_v28, %s3638_s7  ;;  %825 = vrot.lane.b32.xlu0 %v823_v30, %s3642_s27  ;;  %3660 = sst [smem:[#allocation41_spill]] %s2528_s9  ;;  %v343_v3 = vmul.f32 %v342_v61, %v2152_v0  ;;  %v338_v14 = vstv %s2501_s19 }
  0xbf   : > { %s2531_s0 = sld [smem:[#allocation2 + %s1008_s17]] }
  0xc0   : > { %s2536_s1 = sld [smem:[#allocation2 + %s1024_s11]]  ;;  %v1001_v58 = vstv %s2510_s25  ;;  %s1076_s25 = sadd.s32 91, %s2129_s26 }
  0xc1   : > { %s2541_s29 = sld [smem:[#allocation2 + %s2528_s9]]  ;;  %v976_v63 = vstv %s2514_s13  ;;  %v1002_v2 = vmul.f32 %v1001_v58, %v2152_v0  ;;  %s3662_s13 = sadd.s32 34, %s2129_s26 }
  0xc2   : > { %859 = vrot.lane.b32.xlu1 %v857_v32, %s3642_s27  ;;  %834 = vrot.lane.b32.xlu0 %v832_v34, %s3647_s18  ;;  %3661 = sst [smem:[#allocation42_spill]] %s2544_s8  ;;  %v977_v6 = vmul.f32 %v976_v63, %v2152_v0  ;;  %v372_v26 = vstv %s2519_s22  ;;  %v1427_v32 = vstv %s2507_s20  ;;  %s1144_s20 = sadd.s32 99, %s2129_s26 }
  0xc3   : > { %s2549_s17 = sld [smem:[#allocation2 + %s1058_s21]]  ;;  %v1430_v41 = vstv %s2525_s24  ;;  %s1160_s24 = sadd.s32 101, %s2129_s26 }
  0xc4   : > { %s2552_s11 = sld [smem:[#allocation2 + %s1033_s14]] }
  0xc5   : > { %s2558_s3 = sld [smem:[#allocation2 + %s2544_s8]]  ;;  %v1010_v4 = vstv %s2531_s0 }
  0xc6   : > { %868 = vrot.lane.b32.xlu1 %v866_v36, %s3647_s18  ;;  %843 = vrot.lane.b32.xlu0 %v841_v38, %s3638_s7  ;;  %s2564_s21 = sld [smem:[#allocation6 + %s2156_s12]]  ;;  %v1026_v8 = vstv %s2536_s1  ;;  %v1011_v10 = vmul.f32 %v1010_v4, %v2152_v0  ;;  %s1126_s1 = sadd.s32 97, %s2129_s26 }
  0xc7   : > { %s2569_s14 = sld [smem:[#allocation4 + %s2156_s12]]  ;;  %s3584_s12 = sadd.s32 32, %s2129_s26  ;;  %v1027_v16 = vmul.f32 %v1026_v8, %v2152_v0  ;;  %v376_v17 = vstv %s2541_s29 }
  0xc8   : > { %s2574_s16 = sld [smem:[#allocation2 + %s1067_s2]]  ;;  %s1092_s2 = sadd.s32 93, %s2129_s26  ;;  %v377_v24 = vmul.f32 %v376_v17, %v2152_v0 }
  0xc9   : > { %s2581_s8 = sld [smem:[#allocation4 + %s3662_s13]]  ;;  %v1060_v13 = vstv %s2549_s17  ;;  %s1101_s13 = sadd.s32 94, %s2129_s26 }
  0xca   : > { %877 = vrot.lane.b32.xlu1 %v875_v40, %s3638_s7  ;;  %893 = vrot.lane.b32.xlu0 %v891_v42, %s3642_s27  ;;  %s2585_s0 = sld [smem:[#allocation2 + %s1042_s30]]  ;;  %v1035_v19 = vstv %s2552_s11  ;;  %v1061_v21 = vmul.f32 %v1060_v13, %v2152_v0  ;;  %v1560_v42 = vstv %s2425_s4 }
  0xcb   : > { %s2590_s9 = sld [smem:[#allocation2 + %s1076_s25]]  ;;  %v1036_v28 = vmul.f32 %v1035_v19, %v2152_v0  ;;  %v410_v29 = vstv %s2558_s3  ;;  %s1110_s3 = sadd.s32 95, %s2129_s26 }
  0xcc   : > { %s2599_s30 = sld [smem:[#allocation4 + %s3584_s12]]  ;;  %s2617_s12 = sadd.s32 20, %s2129_s26  ;;  %v411_v39 = vmul.f32 %v410_v29, %v2152_v0 }
  0xcd   : > { %s2605_s25 = sld [smem:[#allocation2 + %s1092_s2]]  ;;  %s1135_s2 = sadd.s32 98, %s2129_s26 }
  0xce   : > { %927 = vrot.lane.b32.xlu1 %v925_v44, %s3642_s27  ;;  %902 = vrot.lane.b32.xlu0 %v900_v46, %s3647_s18  ;;  %s2609_s17 = sld [smem:[#allocation2 + %s2593_s15]]  ;;  %v1069_v25 = vstv %s2574_s16  ;;  %v406_v44 = vstv %s2564_s21 }
  0xcf   : > { %s2614_s19 = sld [smem:[#allocation2 + %s1126_s1]]  ;;  %v1070_v35 = vmul.f32 %v1069_v25, %v2152_v0 }
  0xd0   : > { %s2622_s29 = sld [smem:[#allocation6 + %s2132_s28]]  ;;  %v1044_v31 = vstv %s2585_s0 }
  0xd1   : > { %s2628_s11 = sld [smem:[#allocation2 + %s1101_s13]]  ;;  %v1078_v36 = vstv %s2590_s9  ;;  %v1045_v45 = vmul.f32 %v1044_v31, %v2152_v0  ;;  %s612_s9 = sadd.s32 36, %s2129_s26 }
  0xd2   : > { %936 = vrot.lane.b32.xlu1 %v934_v48, %s3647_s18  ;;  %911 = vrot.lane.b32.xlu0 %v909_v50, %s3638_s7  ;;  %s2633_s28 = sld [smem:[#allocation2 + %s2617_s12]]  ;;  %v1557_v40 = vstv %s2599_s30  ;;  %v1079_v48 = vmul.f32 %v1078_v36, %v2152_v0  ;;  %s1194_s30 = sadd.s32 105, %s2129_s26 }
  0xd3   : > { %s2640_s22 = sld [smem:[#allocation6 + %s2484_s6]]  ;;  %v1094_v49 = vstv %s2605_s25 }
  0xd4   : > { %s2644_s16 = sld [smem:[#allocation2 + %s1135_s2]]  ;;  %s1203_s2 = sadd.s32 106, %s2129_s26 }
  0xd5   : > { %s2655_s0 = sld [smem:[#allocation4 + %s2484_s6]]  ;;  %v1128_v53 = vstv %s2614_s19  ;;  %s2668_s6 = sadd.s32 24, %s2129_s26 }
  0xd6   : > { %945 = vrot.lane.b32.xlu1 %v943_v52, %s3638_s7  ;;  %961 = vrot.lane.b32.xlu0 %v959_v54, %s3642_s27  ;;  %s2659_s4 = sld [smem:[#allocation2 + %s1110_s3]]  ;;  %v444_v52 = vstv %s2609_s17  ;;  %s1169_s19 = sadd.s32 102, %s2129_s26 }
  0xd7   : > { %s2665_s21 = sld [smem:[#allocation2 + %s1144_s20]]  ;;  %v1103_v63 = vstv %s2628_s11  ;;  %s1178_s3 = sadd.s32 103, %s2129_s26 }
  0xd8   : > { %v334_v59 = vpop.permute.xlu1 %333  ;;  %v316_v1 = vpop.permute.xlu0 %315  ;;  %s2672_s1 = sld [smem:[#allocation4 + %s612_s9]]  ;;  %v1104_v13 = vmul.f32 %v1103_v63, %v2152_v0  ;;  %s1212_s20 = sadd.s32 107, %s2129_s26 }
  0xd9   : > { %v318_v7 = vadd.f32 %v316_v1, %v309_v62  ;;  %s2677_s25 = sld [smem:[#allocation2 + %s1160_s24]] }
  0xda   : > { %995 = vrot.lane.b32.xlu1 %v993_v57, %s3642_s27  ;;  %970 = vrot.lane.b32.xlu0 %v968_v60, %s3647_s18  ;;  %v1095_v60 = vmul.f32 %v1094_v49, %v2152_v0  ;;  %s2681_s17 = sld [smem:[#allocation2 + %s2668_s6]] }
  0xdb   : > { %s2688_s13 = sld [smem:[#allocation2 + %s1194_s30]] }
  0xdc   : > { %v350_v5 = vpop.permute.xlu1 %349  ;;  %v325_v9 = vpop.permute.xlu0 %324  ;;  %s2694_s11 = sld [smem:[#allocation6 + %s2149_s10]]  ;;  %v1112_v17 = vstv %s2659_s4 }
  0xdd   : > { %v352_v11 = vadd.f32 %v350_v5, %v343_v3  ;;  %v327_v12 = vadd.f32 %v325_v9, %v318_v7  ;;  %v1564_v3 = vstv %s2581_s8  ;;  %v445_v5 = vmul.f32 %v444_v52, %v2152_v0  ;;  %s2697_s8 = sadd.s32 28, %s2129_s26  ;;  %s2728_s24 = sld [smem:[#allocation2 + %s1178_s3]] }
  0xde   : > { %1004 = vrot.lane.b32.xlu1 %v1002_v2, %s3647_s18  ;;  %979 = vrot.lane.b32.xlu0 %v977_v6, %s3638_s7  ;;  %v1434_v2 = vstv %s2569_s14  ;;  %v1129_v6 = vmul.f32 %v1128_v53, %v2152_v0  ;;  %v478_v9 = vstv %s2633_s28  ;;  %3663 = sst [smem:[#allocation43_spill]] %s2697_s8  ;;  %v1113_v29 = vmul.f32 %v1112_v17, %v2152_v0  ;;  %s1271_s3 = sadd.s32 114, %s2129_s26 }
  0xdf   : > { %v336_v18 = vadd.f32 %v334_v59, %v327_v12  ;;  %s2703_s14 = sld [smem:[#allocation4 + %s2149_s10]]  ;;  %v479_v19 = vmul.f32 %v478_v9, %v2152_v0  ;;  %v1572_v49 = vstv %s2672_s1 }
  0xe0   : > { %v368_v15 = vpop.permute.xlu1 %367  ;;  %v359_v20 = vpop.permute.xlu0 %358  ;;  %s2707_s28 = sld [smem:[#allocation2 + %s1169_s19]]  ;;  %v512_v36 = vstv %s2681_s17  ;;  %s3666_s17 = sadd.s32 32, %s2129_s26 }
  0xe1   : > { %v339_v22 = vadd.f32 %v338_v14, %v336_v18  ;;  %v361_v23 = vadd.f32 %v359_v20, %v352_v11  ;;  %v440_v11 = vstv %s2622_s29  ;;  %s3664_s29 = sld [smem:[#allocation19_spill]] }
  0xe2   : > { %1013 = vrot.lane.b32.xlu1 %v1011_v10, %s3638_s7  ;;  %1029 = vrot.lane.b32.xlu0 %v1027_v16, %s3642_s27  ;;  %v1137_v10 = vstv %s2644_s16  ;;  %s2714_s10 = sld [smem:[#allocation2 + %s2697_s8]] }
  0xe3   : > { %v370_v30 = vadd.f32 %v368_v15, %v361_v23  ;;  %v1394_v33 = vmax.f32 %v339_v22, 0.0  ;;  %v1138_v20 = vmul.f32 %v1137_v10, %v2152_v0  ;;  %s2717_s16 = sld [smem:[#allocation2 + %s1203_s2]]  ;;  %v1180_v63 = vstv %s2728_s24 }
  0xe4   : > { %v393_v27 = vpop.permute.xlu1 %392  ;;  %v384_v34 = vpop.permute.xlu0 %383  ;;  %s3667_s19 = sld [smem:[#allocation18_spill]] }
  0xe5   : > { %v373_v37 = vadd.f32 %v372_v26, %v370_v30  ;;  %v386_v38 = vadd.f32 %v384_v34, %v377_v24  ;;  %v1428_v50 = vmul.f32 %v1427_v32, %v1394_v33  ;;  %v1558_v54 = vmul.f32 %v1557_v40, %v1394_v33  ;;  %s2787_s24 = sld [smem:[#allocation2 + %s1271_s3]] }
  0xe6   : > { %1063 = vrot.lane.b32.xlu1 %v1061_v21, %s3642_s27  ;;  %1038 = vrot.lane.b32.xlu0 %v1036_v28, %s3647_s18  ;;  %v1146_v21 = vstv %s2665_s21  ;;  %v1438_v26 = vstv %s2415_s5  ;;  %s1228_s21 = sadd.s32 109, %s2129_s26  ;;  %s2736_s5 = sld [smem:[#allocation2 + %s1212_s20]] }
  0xe7   : > { %v1395_v46 = vmax.f32 %v373_v37, 0.0  ;;  %v395_v47 = vadd.f32 %v393_v27, %v386_v38  ;;  %v1568_v27 = vstv %s2445_s23  ;;  %s2725_s4 = sld [smem:[#allocation6 + %s3664_s29]]  ;;  %v1162_v32 = vstv %s2677_s25  ;;  %s1246_s20 = sadd.s32 111, %s2129_s26 }
  0xe8   : > { %v418_v43 = vpop.permute.xlu1 %417  ;;  %v402_v51 = vpop.permute.xlu0 %401  ;;  %v474_v33 = vstv %s2640_s22  ;;  %v1196_v37 = vstv %s2688_s13  ;;  %s3665_s23 = sld [smem:[#allocation17_spill]]  ;;  %s1262_s22 = sadd.s32 113, %s2129_s26  ;;  %v1446_v9 = vstv %s2703_s14 }
  0xe9   : > { %v1431_v55 = vmul.f32 %v1430_v41, %v1395_v46  ;;  %v1561_v56 = vmul.f32 %v1560_v42, %v1395_v46  ;;  %v420_v57 = vadd.f32 %v418_v43, %v411_v39  ;;  %v404_v58 = vadd.f32 %v402_v51, %v395_v47  ;;  %s2739_s30 = sld [smem:[#allocation4 + %s3664_s29]]  ;;  %s646_s14 = sadd.s32 40, %s2129_s26 }
  0xea   : > { %1072 = vrot.lane.b32.xlu1 %v1070_v35, %s3647_s18  ;;  %1047 = vrot.lane.b32.xlu0 %v1045_v45, %s3638_s7  ;;  %v1147_v35 = vmul.f32 %v1146_v21, %v2152_v0  ;;  %v1163_v43 = vmul.f32 %v1162_v32, %v2152_v0  ;;  %s2744_s25 = sld [smem:[#allocation2 + %s1228_s21]]  ;;  %v1171_v46 = vstv %s2707_s28  ;;  %s1237_s28 = sadd.s32 110, %s2129_s26 }
  0xeb   : > { %v407_v61 = vadd.f32 %v406_v44, %v404_v58  ;;  %v1432_v62 = vadd.f32 %v1431_v55, %v1428_v50  ;;  %v1562_v1 = vadd.f32 %v1561_v56, %v1558_v54  ;;  %s2749_s13 = sld [smem:[#allocation2 + %s3666_s17]]  ;;  %v546_v55 = vstv %s2714_s10  ;;  %s1280_s21 = sadd.s32 115, %s2129_s26 }
  0xec   : > { %v436_v59 = vpop.permute.xlu1 %435  ;;  %v427_v4 = vpop.permute.xlu0 %426  ;;  %s2759_s2 = sld [smem:[#allocation2 + %s1262_s22]]  ;;  %v1205_v56 = vstv %s2717_s16  ;;  %s1296_s17 = sadd.s32 117, %s2129_s26 }
  0xed   : > { %v1396_v7 = vmax.f32 %v407_v61, 0.0  ;;  %v429_v8 = vadd.f32 %v427_v4, %v420_v57  ;;  %v508_v57 = vstv %s2694_s11  ;;  %s2772_s29 = sld [smem:[#allocation6 + %s3667_s19]]  ;;  %v1214_v4 = vstv %s2736_s5 }
  0xee   : > { %1081 = vrot.lane.b32.xlu1 %v1079_v48, %s3638_s7  ;;  %1097 = vrot.lane.b32.xlu0 %v1095_v60, %s3642_s27  ;;  %v1442_v48 = vstv %s2655_s0  ;;  %v2755_v0 = vld [vmem:[%s3665_s23] sm:$0x3]  ;;  %s3668_s0 = sadd.s32 38, %s2129_s26  ;;  %s3669_s10 = sld [smem:[#allocation38_spill]] }
  0xef   : > { %v1435_v14 = vmul.f32 %v1434_v2, %v1396_v7  ;;  %v1565_v15 = vmul.f32 %v1564_v3, %v1396_v7  ;;  %v438_v16 = vadd.f32 %v436_v59, %v429_v8  ;;  %v513_v51 = vmul.f32 %v2755_v0, %v512_v36  ;;  %s2765_s1 = sld [smem:[#allocation4 + %s3668_s0]]  ;;  %s1305_s0 = sadd.s32 118, %s2129_s26 }
  0xf0   : > { %v461_v12 = vpop.permute.xlu1 %460  ;;  %v452_v18 = vpop.permute.xlu0 %451  ;;  %v1197_v52 = vmul.f32 %v2755_v0, %v1196_v37  ;;  %v1172_v59 = vmul.f32 %v2755_v0, %v1171_v46  ;;  %s2776_s16 = sld [smem:[#allocation2 + %s1237_s28]]  ;;  %v547_v2 = vmul.f32 %v2755_v0, %v546_v55  ;;  %v1206_v3 = vmul.f32 %v2755_v0, %v1205_v56 }
  0xf1   : > { %v1436_v22 = vadd.f32 %v1435_v14, %v1432_v62  ;;  %v441_v23 = vadd.f32 %v440_v11, %v438_v16  ;;  %v454_v24 = vadd.f32 %v452_v18, %v445_v5  ;;  %v1566_v25 = vadd.f32 %v1565_v15, %v1562_v1  ;;  %s2784_s11 = sld [smem:[#allocation2 + %s612_s9]] }
  0xf2   : > { %1131 = vrot.lane.b32.xlu1 %v1129_v6, %s3642_s27  ;;  %1106 = vrot.lane.b32.xlu0 %v1104_v13, %s3647_s18  ;;  %s2795_s9 = sld [smem:[#allocation4 + %s3667_s19]]  ;;  %v1230_v15 = vstv %s2744_s25  ;;  %v542_v16 = vstv %s2725_s4  ;;  %v1215_v18 = vmul.f32 %v2755_v0, %v1214_v4  ;;  %s1330_s4 = sadd.s32 121, %s2129_s26 }
  0xf3   : > { %v1397_v30 = vmax.f32 %v441_v23, 0.0  ;;  %v463_v31 = vadd.f32 %v461_v12, %v454_v24  ;;  %v1181_v12 = vmul.f32 %v2755_v0, %v1180_v63  ;;  %s3670_s5 = sld [smem:[#allocation41_spill]] }
  0xf4   : > { %v486_v28 = vpop.permute.xlu1 %485  ;;  %v470_v34 = vpop.permute.xlu0 %469  ;;  %v1576_v10 = vstv %s3669_s10  ;;  %s2798_s22 = sld [smem:[#allocation2 + %s1246_s20]]  ;;  %s1339_s10 = sadd.s32 122, %s2129_s26 }
  0xf5   : > { %v1439_v38 = vmul.f32 %v1438_v26, %v1397_v30  ;;  %v1569_v39 = vmul.f32 %v1568_v27, %v1397_v30  ;;  %v488_v40 = vadd.f32 %v486_v28, %v479_v19  ;;  %v472_v41 = vadd.f32 %v470_v34, %v463_v31  ;;  %s2807_s19 = sld [smem:[#allocation2 + %s1280_s21]] }
  0xf6   : > { %1140 = vrot.lane.b32.xlu1 %v1138_v20, %s3647_s18  ;;  %1115 = vrot.lane.b32.xlu0 %v1113_v29, %s3638_s7  ;;  %v580_v19 = vstv %s2749_s13  ;;  %v1264_v20 = vstv %s2759_s2  ;;  %v1231_v26 = vmul.f32 %v2755_v0, %v1230_v15  ;;  %s2815_s13 = sld [smem:[#allocation2 + %s1296_s17]] }
  0xf7   : > { %v475_v44 = vadd.f32 %v474_v33, %v472_v41  ;;  %v1440_v45 = vadd.f32 %v1439_v38, %v1436_v22  ;;  %v1570_v47 = vadd.f32 %v1569_v39, %v1566_v25  ;;  %v1239_v29 = vstv %s2776_s16  ;;  %s2820_s2 = sld [smem:[#allocation2 + %s646_s14]] }
  0xf8   : > { %v504_v42 = vpop.permute.xlu1 %503  ;;  %v495_v50 = vpop.permute.xlu0 %494  ;;  %v1450_v31 = vstv %s2739_s30  ;;  %v1580_v32 = vstv %s2765_s1  ;;  %v581_v34 = vmul.f32 %v2755_v0, %v580_v19  ;;  %s2827_s28 = sld [smem:[#allocation2 + %s1330_s4]]  ;;  %v614_v38 = vstv %s2784_s11  ;;  %s680_s30 = sadd.s32 44, %s2129_s26 }
  0xf9   : > { %v1398_v53 = vmax.f32 %v475_v44, 0.0  ;;  %v497_v54 = vadd.f32 %v495_v50, %v488_v40  ;;  %s2810_s25 = sld [smem:[#allocation6 + %s3670_s5]]  ;;  %v1273_v39 = vstv %s2787_s24  ;;  %v576_v40 = vstv %s2772_s29  ;;  %s1314_s24 = sadd.s32 119, %s2129_s26 }
  0xfa   : > { %1149 = vrot.lane.b32.xlu1 %v1147_v35, %s3638_s7  ;;  %1165 = vrot.lane.b32.xlu0 %v1163_v43, %s3642_s27  ;;  %v1265_v35 = vmul.f32 %v2755_v0, %v1264_v20  ;;  %s2832_s3 = sld [smem:[#allocation4 + %s3670_s5]]  ;;  %v1248_v46 = vstv %s2798_s22  ;;  %s1348_s5 = sadd.s32 123, %s2129_s26  ;;  %v1454_v55 = vstv %s2795_s9 }
  0xfb   : > { %v1443_v60 = vmul.f32 %v1442_v48, %v1398_v53  ;;  %v1573_v61 = vmul.f32 %v1572_v49, %v1398_v53  ;;  %v506_v62 = vadd.f32 %v504_v42, %v497_v54  ;;  %v1240_v42 = vmul.f32 %v2755_v0, %v1239_v29  ;;  %s2841_s1 = sld [smem:[#allocation4 + %s646_s14]]  ;;  %s1382_s4 = sadd.s32 127, %s2129_s26 }
  0xfc   : > { %v529_v58 = vpop.permute.xlu1 %528  ;;  %v520_v1 = vpop.permute.xlu0 %519  ;;  %s3671_s16 = sld [smem:[#allocation39_spill]]  ;;  %v615_v48 = vmul.f32 %v2755_v0, %v614_v38  ;;  %v1274_v49 = vmul.f32 %v2755_v0, %v1273_v39  ;;  %v1282_v50 = vstv %s2807_s19  ;;  %s1364_s19 = sadd.s32 125, %s2129_s26 }
  0xfd   : > { %v1444_v5 = vadd.f32 %v1443_v60, %v1440_v45  ;;  %v509_v6 = vadd.f32 %v508_v57, %v506_v62  ;;  %v522_v7 = vadd.f32 %v520_v1, %v513_v51  ;;  %v1574_v8 = vadd.f32 %v1573_v61, %v1570_v47  ;;  %s2845_s11 = sld [smem:[#allocation2 + %s1305_s0]]  ;;  %s1373_s0 = sadd.s32 126, %s2129_s26 }
  0xfe   : > { %1199 = vrot.lane.b32.xlu1 %v1197_v52, %s3642_s27  ;;  %1174 = vrot.lane.b32.xlu0 %v1172_v59, %s3647_s18  ;;  %s3672_s29 = sld [smem:[#allocation21_spill]]  ;;  %v1298_v61 = vstv %s2815_s13  ;;  %v1283_v1 = vmul.f32 %v2755_v0, %v1282_v50 }
  0xff   : > { %v1399_v13 = vmax.f32 %v509_v6, 0.0  ;;  %v531_v14 = vadd.f32 %v529_v58, %v522_v7  ;;  %s2853_s20 = sld [smem:[#allocation2 + %s680_s30]]  ;;  %v1249_v58 = vmul.f32 %v2755_v0, %v1248_v46  ;;  %v610_v62 = vstv %s2810_s25 }
 0x100   : > { %v554_v11 = vpop.permute.xlu1 %553  ;;  %v538_v17 = vpop.permute.xlu0 %537  ;;  %s2856_s21 = sld [smem:[#allocation2 + %s1339_s10]] }
 0x101   : > { %v1447_v21 = vmul.f32 %v1446_v9, %v1399_v13  ;;  %v1577_v22 = vmul.f32 %v1576_v10, %v1399_v13  ;;  %v556_v23 = vadd.f32 %v554_v11, %v547_v2  ;;  %v540_v24 = vadd.f32 %v538_v17, %v531_v14  ;;  %s2867_s17 = sld [smem:[#allocation2 + %s1314_s24]]  ;;  %s3676_s24 = sadd.s32 42, %s2129_s26 }
 0x102   : > { %1208 = vrot.lane.b32.xlu1 %v1206_v3, %s3647_s18  ;;  %1183 = vrot.lane.b32.xlu0 %v1181_v12, %s3638_s7  ;;  %v1584_v56 = vstv %s3671_s16  ;;  %s3673_s9 = sld [smem:[#allocation20_spill]]  ;;  %v648_v2 = vstv %s2820_s2  ;;  %v1299_v9 = vmul.f32 %v2755_v0, %v1298_v61 }
 0x103   : > { %v543_v27 = vadd.f32 %v542_v16, %v540_v24  ;;  %v1448_v28 = vadd.f32 %v1447_v21, %v1444_v5  ;;  %v1578_v30 = vadd.f32 %v1577_v22, %v1574_v8  ;;  %v1332_v3 = vstv %s2827_s28  ;;  %s2874_s14 = sld [smem:[#allocation2 + %s1348_s5]]  ;;  %s714_s28 = sadd.s32 48, %s2129_s26 }
 0x104   : > { %v572_v25 = vpop.permute.xlu1 %571  ;;  %v563_v33 = vpop.permute.xlu0 %562  ;;  %s2864_s22 = sld [smem:[#allocation6 + %s3672_s29]]  ;;  %v1307_v13 = vstv %s2845_s11  ;;  %v1458_v14 = vstv %s2832_s3  ;;  %v1588_v15 = vstv %s2841_s1  ;;  %v649_v17 = vmul.f32 %v2755_v0, %v648_v2  ;;  %s748_s1 = sadd.s32 52, %s2129_s26 }
 0x105   : > { %v1400_v36 = vmax.f32 %v543_v27, 0.0  ;;  %v565_v37 = vadd.f32 %v563_v33, %v556_v23  ;;  %s2878_s25 = sld [smem:[#allocation4 + %s3672_s29]]  ;;  %v682_v21 = vstv %s2853_s20 }
 0x106   : > { %1217 = vrot.lane.b32.xlu1 %v1215_v18, %s3638_s7  ;;  %1233 = vrot.lane.b32.xlu0 %v1231_v26, %s3642_s27  ;;  %s2887_s2 = sld [smem:[#allocation2 + %s1364_s19]]  ;;  %v1333_v18 = vmul.f32 %v2755_v0, %v1332_v3  ;;  %v1341_v22 = vstv %s2856_s21 }
 0x107   : > { %v1451_v43 = vmul.f32 %v1450_v31, %v1400_v36  ;;  %v1581_v44 = vmul.f32 %v1580_v32, %v1400_v36  ;;  %v574_v45 = vadd.f32 %v572_v25, %v565_v37  ;;  %s2896_s10 = sld [smem:[#allocation2 + %s1382_s4]]  ;;  %v1308_v25 = vmul.f32 %v2755_v0, %v1307_v13 }
 0x108   : > { %v597_v41 = vpop.permute.xlu1 %596  ;;  %v588_v47 = vpop.permute.xlu0 %587  ;;  %s2884_s13 = sld [smem:[#allocation6 + %s3673_s9]]  ;;  %v1316_v29 = vstv %s2867_s17  ;;  %v683_v31 = vmul.f32 %v2755_v0, %v682_v21  ;;  %v1342_v32 = vmul.f32 %v2755_v0, %v1341_v22  ;;  %s3677_s17 = sadd.s32 43, %s2129_s26 }
 0x109   : > { %v1452_v51 = vadd.f32 %v1451_v43, %v1448_v28  ;;  %v577_v52 = vadd.f32 %v576_v40, %v574_v45  ;;  %v590_v53 = vadd.f32 %v588_v47, %v581_v34  ;;  %v1582_v54 = vadd.f32 %v1581_v44, %v1578_v30  ;;  %s2900_s16 = sld [smem:[#allocation4 + %s3673_s9]] }
 0x10a   : > { %1267 = vrot.lane.b32.xlu1 %v1265_v35, %s3642_s27  ;;  %1242 = vrot.lane.b32.xlu0 %v1240_v42, %s3647_s18  ;;  %v644_v23 = vstv %s2864_s22  ;;  %s2908_s3 = sld [smem:[#allocation2 + %s714_s28]]  ;;  %v1350_v33 = vstv %s2874_s14 }
 0x10b   : > { %v1401_v59 = vmax.f32 %v577_v52, 0.0  ;;  %v599_v60 = vadd.f32 %v597_v41, %v590_v53  ;;  %s3674_s11 = sld [smem:[#allocation40_spill]]  ;;  %v1462_v38 = vstv %s2878_s25  ;;  %v1317_v41 = vmul.f32 %v2755_v0, %v1316_v29  ;;  %s782_s25 = sadd.s32 56, %s2129_s26 }
 0x10c   : > { %v622_v57 = vpop.permute.xlu1 %621  ;;  %v606_v63 = vpop.permute.xlu0 %605  ;;  %s2912_s29 = sld [smem:[#allocation2 + %s1373_s0]]  ;;  %v1366_v44 = vstv %s2887_s2  ;;  %v1351_v47 = vmul.f32 %v2755_v0, %v1350_v33 }
 0x10d   : > { %v1455_v4 = vmul.f32 %v1454_v55, %v1401_v59  ;;  %v1585_v5 = vmul.f32 %v1584_v56, %v1401_v59  ;;  %v624_v6 = vadd.f32 %v622_v57, %v615_v48  ;;  %v608_v7 = vadd.f32 %v606_v63, %v599_v60  ;;  %s3675_s20 = sld [smem:[#allocation23_spill]] }
 0x10e   : > { %1276 = vrot.lane.b32.xlu1 %v1274_v49, %s3647_s18  ;;  %1251 = vrot.lane.b32.xlu0 %v1249_v58, %s3638_s7  ;;  %s2918_s21 = sld [smem:[#allocation4 + %s3676_s24]]  ;;  %v678_v45 = vstv %s2884_s13  ;;  %v1384_v48 = vstv %s2896_s10 }
 0x10f   : > { %v611_v10 = vadd.f32 %v610_v62, %v608_v7  ;;  %v1456_v11 = vadd.f32 %v1455_v4, %v1452_v51  ;;  %v1586_v12 = vadd.f32 %v1585_v5, %v1582_v54  ;;  %s2924_s5 = sld [smem:[#allocation2 + %s748_s1]]  ;;  %v1367_v54 = vmul.f32 %v2755_v0, %v1366_v44 }
 0x110   : > { %v640_v8 = vpop.permute.xlu1 %639  ;;  %v631_v16 = vpop.permute.xlu0 %630  ;;  %s2940_s9 = sld [smem:[#allocation4 + %s3677_s17]]  ;;  %v716_v55 = vstv %s2908_s3  ;;  %v1466_v60 = vstv %s2900_s16  ;;  %v1385_v63 = vmul.f32 %v2755_v0, %v1384_v48  ;;  %s3681_s3 = sadd.s32 45, %s2129_s26 }
 0x111   : > { %v1402_v19 = vmax.f32 %v611_v10, 0.0  ;;  %v633_v20 = vadd.f32 %v631_v16, %v624_v6  ;;  %v1592_v39 = vstv %s3674_s11  ;;  %s3678_s14 = sld [smem:[#allocation42_spill]]  ;;  %v717_v3 = vmul.f32 %v2755_v0, %v716_v55 }
 0x112   : > { %1285 = vrot.lane.b32.xlu1 %v1283_v1, %s3638_s7  ;;  %1301 = vrot.lane.b32.xlu0 %v1299_v9, %s3642_s27  ;;  %v1375_v59 = vstv %s2912_s29  ;;  %s2964_s13 = sld [smem:[#allocation2 + %s782_s25]] }
 0x113   : > { %v1459_v26 = vmul.f32 %v1458_v14, %v1402_v19  ;;  %v1589_v27 = vmul.f32 %v1588_v15, %v1402_v19  ;;  %v642_v28 = vadd.f32 %v640_v8, %v633_v20  ;;  %s2931_s22 = sld [smem:[#allocation6 + %s3675_s20]]  ;;  %v1376_v7 = vmul.f32 %v2755_v0, %v1375_v59 }
 0x114   : > { %v665_v24 = vpop.permute.xlu1 %664  ;;  %v656_v30 = vpop.permute.xlu0 %655  ;;  %s2944_s19 = sld [smem:[#allocation4 + %s3675_s20]]  ;;  %v1596_v61 = vstv %s2918_s21  ;;  %s3683_s21 = sadd.s32 46, %s2129_s26 }
 0x115   : > { %v1460_v34 = vadd.f32 %v1459_v26, %v1456_v11  ;;  %v1590_v35 = vadd.f32 %v1589_v27, %v1586_v12  ;;  %v645_v36 = vadd.f32 %v644_v23, %v642_v28  ;;  %v658_v37 = vadd.f32 %v656_v30, %v649_v17  ;;  %s2968_s2 = sld [smem:[#allocation4 + %s680_s30]]  ;;  %s3585_s30 = sadd.s32 60, %s2129_s26 }
 0x116   : > { %1335 = vrot.lane.b32.xlu1 %v1333_v18, %s3642_s27  ;;  %1310 = vrot.lane.b32.xlu0 %v1308_v25, %s3647_s18  ;;  %v750_v4 = vstv %s2924_s5  ;;  %s3679_s0 = sld [smem:[#allocation22_spill]]  ;;  %v1600_v18 = vstv %s2940_s9  ;;  %s3684_s9 = sadd.s32 47, %s2129_s26 }
 0x117   : > { %v1403_v42 = vmax.f32 %v645_v36, 0.0  ;;  %v667_v43 = vadd.f32 %v665_v24, %v658_v37  ;;  %s2955_s4 = sld [smem:[#allocation6 + %s3678_s14]]  ;;  %v751_v12 = vmul.f32 %v2755_v0, %v750_v4 }
 0x118   : > { %v690_v40 = vpop.permute.xlu1 %689  ;;  %v674_v46 = vpop.permute.xlu0 %673  ;;  %s2985_s16 = sld [smem:[#allocation2 + %s3585_s30]]  ;;  %v784_v29 = vstv %s2964_s13  ;;  %s850_s13 = sadd.s32 64, %s2129_s26 }
 0x119   : > { %v1463_v49 = vmul.f32 %v1462_v38, %v1403_v42  ;;  %v1593_v50 = vmul.f32 %v1592_v39, %v1403_v42  ;;  %v692_v51 = vadd.f32 %v690_v40, %v683_v31  ;;  %v676_v52 = vadd.f32 %v674_v46, %v667_v43  ;;  %s2989_s11 = sld [smem:[#allocation4 + %s3681_s3]] }
 0x11a   : > { %1344 = vrot.lane.b32.xlu1 %v1342_v32, %s3647_s18  ;;  %1319 = vrot.lane.b32.xlu0 %v1317_v41, %s3638_s7  ;;  %v712_v5 = vstv %s2931_s22  ;;  %v1470_v17 = vstv %s2944_s19  ;;  %v785_v38 = vmul.f32 %v2755_v0, %v784_v29  ;;  %s3682_s24 = sld [smem:[#allocation24_spill]] }
 0x11b   : > { %v679_v56 = vadd.f32 %v678_v45, %v676_v52  ;;  %v1464_v57 = vadd.f32 %v1463_v49, %v1460_v34  ;;  %v1594_v58 = vadd.f32 %v1593_v50, %v1590_v35  ;;  %v1604_v34 = vstv %s2968_s2  ;;  %s3005_s5 = sld [smem:[#allocation4 + %s3683_s21]]  ;;  %s952_s21 = sadd.s32 76, %s2129_s26 }
 0x11c   : > { %v708_v53 = vpop.permute.xlu1 %707  ;;  %v699_v62 = vpop.permute.xlu0 %698  ;;  %s2980_s10 = sld [smem:[#allocation6 + %s3679_s0]] }
 0x11d   : > { %v1404_v1 = vmax.f32 %v679_v56, 0.0  ;;  %v701_v2 = vadd.f32 %v699_v62, %v692_v51  ;;  %v746_v22 = vstv %s2955_s4  ;;  %s3685_s19 = sld [smem:[#allocation27_spill]] }
 0x11e   : > { %1353 = vrot.lane.b32.xlu1 %v1351_v47, %s3638_s7  ;;  %1369 = vrot.lane.b32.xlu0 %v1367_v54, %s3642_s27  ;;  %s2973_s27 = sld [smem:[#allocation4 + %s3678_s14]]  ;;  %v818_v45 = vstv %s2985_s16 }
 0x11f   : > { %v1467_v8 = vmul.f32 %v1466_v60, %v1404_v1  ;;  %v1597_v9 = vmul.f32 %v1596_v61, %v1404_v1  ;;  %v710_v10 = vadd.f32 %v708_v53, %v701_v2  ;;  %v1608_v51 = vstv %s2989_s11  ;;  %s1615_s14 = sld [smem:[#allocation4 + %s3684_s9]] }
 0x120   : > { %v733_v6 = vpop.permute.xlu1 %732  ;;  %v724_v11 = vpop.permute.xlu0 %723  ;;  %v819_v55 = vmul.f32 %v2755_v0, %v818_v45  ;;  %s847_s22 = sld [smem:[#allocation6 + %s3682_s24]] }
 0x121   : > { %v1468_v13 = vadd.f32 %v1467_v8, %v1464_v57  ;;  %v1598_v14 = vadd.f32 %v1597_v9, %v1594_v58  ;;  %v713_v15 = vadd.f32 %v712_v5, %v710_v10  ;;  %v726_v16 = vadd.f32 %v724_v11, %v717_v3  ;;  %s1485_s17 = sld [smem:[#allocation4 + %s3682_s24]] }
 0x122   : > { %1387 = vrot.lane.b32.xlu1 %v1385_v63, %s3638_s7  ;;  %1378 = vrot.lane.b32.xlu0 %v1376_v7, %s3647_s18  ;;  %s3680_s7 = sld [smem:[#allocation25_spill]]  ;;  %v780_v39 = vstv %s2980_s10  ;;  %v1612_v4 = vstv %s3005_s5 }
 0x123   : > { %v1405_v20 = vmax.f32 %v713_v15, 0.0  ;;  %v735_v21 = vadd.f32 %v733_v6, %v726_v16  ;;  %s2992_s18 = sld [smem:[#allocation4 + %s3679_s0]] }
 0x124   : > { %v758_v19 = vpop.permute.xlu1 %757  ;;  %v742_v23 = vpop.permute.xlu0 %741  ;;  %v1474_v33 = vstv %s2973_s27  ;;  %s3037_s4 = sld [smem:[#allocation4 + %s714_s28]] }
 0x125   : > { %v1471_v24 = vmul.f32 %v1470_v17, %v1405_v20  ;;  %v1601_v25 = vmul.f32 %v1600_v18, %v1405_v20  ;;  %v760_v26 = vadd.f32 %v758_v19, %v751_v12  ;;  %v744_v27 = vadd.f32 %v742_v23, %v735_v21  ;;  %s3042_s2 = sld [smem:[#allocation4 + %s748_s1]]  ;;  %s918_s1 = sadd.s32 72, %s2129_s26 }
 0x126   : > { %v848_v11 = vstv %s847_s22  ;;  %v1616_v19 = vstv %s1615_s14  ;;  %s3688_s0 = sld [smem:[#allocation26_spill]]  ;;  %s986_s22 = sadd.s32 80, %s2129_s26 }
 0x127   : > { %v747_v30 = vadd.f32 %v746_v22, %v744_v27  ;;  %v1472_v31 = vadd.f32 %v1471_v24, %v1468_v13  ;;  %v1602_v32 = vadd.f32 %v1601_v25, %v1598_v14  ;;  %v1486_v18 = vstv %s1485_s17  ;;  %s3048_s27 = sld [smem:[#allocation4 + %s782_s25]]  ;;  %s3694_s17 = sadd.s32 50, %s2129_s26 }
 0x128   : > { %v776_v28 = vpop.permute.xlu1 %775  ;;  %v767_v35 = vpop.permute.xlu0 %766  ;;  %s813_s29 = sld [smem:[#allocation6 + %s3680_s7]] }
 0x129   : > { %v1406_v36 = vmax.f32 %v747_v30, 0.0  ;;  %v769_v37 = vadd.f32 %v767_v35, %v760_v26  ;;  %s3001_s20 = sld [smem:[#allocation4 + %s3680_s7]]  ;;  %v1478_v50 = vstv %s2992_s18  ;;  %s884_s7 = sadd.s32 68, %s2129_s26 }
 0x12a   : > { %3686 = sst [smem:[#allocation19_spill]] %s3037_s4 }
 0x12b   : > { %v1475_v41 = vmul.f32 %v1474_v33, %v1406_v36  ;;  %v1605_v42 = vmul.f32 %v1604_v34, %v1406_v36  ;;  %v778_v43 = vadd.f32 %v776_v28, %v769_v37  ;;  %3687 = sst [smem:[#allocation18_spill]] %s3042_s2 }
 0x12c   : > { %v801_v40 = vpop.permute.xlu1 %800  ;;  %v792_v44 = vpop.permute.xlu0 %791  ;;  %s3050_s10 = sld [smem:[#allocation2 + %s850_s13]] }
 0x12d   : > { %v1476_v46 = vadd.f32 %v1475_v41, %v1472_v31  ;;  %v1606_v47 = vadd.f32 %v1605_v42, %v1602_v32  ;;  %v781_v48 = vadd.f32 %v780_v39, %v778_v43  ;;  %v794_v49 = vadd.f32 %v792_v44, %v785_v38  ;;  %3689 = sst [smem:[#allocation38_spill]] %s3048_s27  ;;  %s1224_s27 = sadd.s32 108, %s2129_s26 }
 0x12e   : > { %v814_v56 = vstv %s813_s29  ;;  %s3056_s28 = sld [smem:[#allocation6 + %s2593_s15]] }
 0x12f   : > { %v1407_v53 = vmax.f32 %v781_v48, 0.0  ;;  %v803_v54 = vadd.f32 %v801_v40, %v794_v49  ;;  %v1482_v3 = vstv %s3001_s20  ;;  %s3060_s16 = sld [smem:[#allocation4 + %s2593_s15]]  ;;  %s3691_s20 = sadd.s32 49, %s2129_s26 }
 0x130   : > { %v810_v52 = vpop.permute.xlu1 %809  ;;  %v826_v57 = vpop.permute.xlu0 %825  ;;  %s3064_s3 = sld [smem:[#allocation2 + %s884_s7]] }
 0x131   : > { %v1479_v58 = vmul.f32 %v1478_v50, %v1407_v53  ;;  %v1609_v59 = vmul.f32 %v1608_v51, %v1407_v53  ;;  %v812_v60 = vadd.f32 %v810_v52, %v803_v54  ;;  %v828_v2 = vadd.f32 %v826_v57, %v819_v55  ;;  %s3066_s25 = sld [smem:[#allocation2 + %s918_s1]] }
 0x132   : > { %s3690_s11 = sld [smem:[#allocation29_spill]]  ;;  %v852_v43 = vstv %s3050_s10  ;;  %s3713_s10 = sadd.s32 55, %s2129_s26  ;;  %v1620_v50 = vstv %s3037_s4  ;;  %v1636_v53 = vstv %s3042_s2 }
 0x133   : > { %v815_v62 = vadd.f32 %v814_v56, %v812_v60  ;;  %v1480_v63 = vadd.f32 %v1479_v58, %v1476_v46  ;;  %v1610_v1 = vadd.f32 %v1609_v59, %v1606_v47  ;;  %s3071_s18 = sld [smem:[#allocation6 + %s3685_s19]]  ;;  %v853_v46 = vmul.f32 %v2755_v0, %v852_v43  ;;  %s3721_s2 = sadd.s32 57, %s2129_s26 }
 0x134   : > { %v3012_v61 = vpop.permute.xlu1 %859  ;;  %v835_v5 = vpop.permute.xlu0 %834  ;;  %s3074_s29 = sld [smem:[#allocation4 + %s3685_s19]]  ;;  %v882_v51 = vstv %s3056_s28  ;;  %s1326_s28 = sadd.s32 120, %s2129_s26 }
 0x135   : > { %v1408_v6 = vmax.f32 %v815_v62, 0.0  ;;  %v837_v7 = vadd.f32 %v835_v5, %v828_v2  ;;  %s3080_s15 = sld [smem:[#allocation4 + %s3691_s20]]  ;;  %s3700_s20 = sadd.s32 51, %s2129_s26  ;;  %v862_v56 = vadd.f32 %v3012_v61, %v853_v46  ;;  %v1490_v60 = vstv %s3060_s16 }
 0x136   : > { %s3083_s24 = sld [smem:[#allocation6 + %s3688_s0]]  ;;  %v886_v47 = vstv %s3064_s3 }
 0x137   : > { %v1483_v9 = vmul.f32 %v1482_v3, %v1408_v6  ;;  %v1613_v10 = vmul.f32 %v1612_v4, %v1408_v6  ;;  %s3089_s5 = sld [smem:[#allocation4 + %s3688_s0]]  ;;  %v920_v48 = vstv %s3066_s25  ;;  %v887_v52 = vmul.f32 %v2755_v0, %v886_v47 }
 0x138   : > { %v3019_v8 = vpop.permute.xlu1 %868  ;;  %v844_v12 = vpop.permute.xlu0 %843  ;;  %s3094_s9 = sld [smem:[#allocation4 + %s3694_s17]]  ;;  %v921_v57 = vmul.f32 %v2755_v0, %v920_v48 }
 0x139   : > { %v1484_v13 = vadd.f32 %v1483_v9, %v1480_v63  ;;  %v1614_v14 = vadd.f32 %v1613_v10, %v1610_v1  ;;  %v846_v15 = vadd.f32 %v844_v12, %v837_v7  ;;  %s3098_s14 = sld [smem:[#allocation2 + %s952_s21]]  ;;  %s1020_s21 = sadd.s32 84, %s2129_s26  ;;  %v916_v62 = vstv %s3071_s18 }
 0x13a   : > { %s3696_s19 = sld [smem:[#allocation28_spill]]  ;;  %v1494_v63 = vstv %s3074_s29  ;;  %v871_v12 = vadd.f32 %v3019_v8, %v862_v56 }
 0x13b   : > { %v849_v17 = vadd.f32 %v848_v11, %v846_v15  ;;  %3692 = sst [smem:[#allocation41_spill]] %s3080_s15  ;;  %v1624_v1 = vstv %s3080_s15  ;;  %s1292_s15 = sadd.s32 116, %s2129_s26 }
 0x13c   : > { %v3021_v16 = vpop.permute.xlu1 %877  ;;  %v3023_v20 = vpop.permute.xlu0 %893  ;;  %s3100_s13 = sld [smem:[#allocation2 + %s986_s22]]  ;;  %s1054_s22 = sadd.s32 88, %s2129_s26  ;;  %v950_v61 = vstv %s3083_s24 }
 0x13d   : > { %v1409_v21 = vmax.f32 %v849_v17, 0.0  ;;  %3693 = sst [smem:[#allocation39_spill]] %s3089_s5  ;;  %v1498_v3 = vstv %s3089_s5 }
 0x13e   : > { %3695 = sst [smem:[#allocation21_spill]] %s3094_s9  ;;  %v1628_v4 = vstv %s3094_s9 }
 0x13f   : > { %v1487_v23 = vmul.f32 %v1486_v18, %v1409_v21  ;;  %v1617_v24 = vmul.f32 %v1616_v19, %v1409_v21  ;;  %s3105_s7 = sld [smem:[#allocation6 + %s3690_s11]]  ;;  %v954_v58 = vstv %s3098_s14 }
 0x140   : > { %v3025_v22 = vpop.permute.xlu1 %927  ;;  %v3027_v25 = vpop.permute.xlu0 %902  ;;  %s3108_s1 = sld [smem:[#allocation4 + %s3690_s11]]  ;;  %v955_v6 = vmul.f32 %v2755_v0, %v954_v58 }
 0x141   : > { %v3029_v26 = vadd.f32 %v1487_v23, %v1484_v13  ;;  %v3031_v27 = vadd.f32 %v1617_v24, %v1614_v14  ;;  %s3699_s0 = sld [smem:[#allocation31_spill]]  ;;  %v896_v13 = vadd.f32 %v3023_v20, %v887_v52  ;;  %v930_v14 = vadd.f32 %v3025_v22, %v921_v57 }
 0x142   : > { %s3114_s17 = sld [smem:[#allocation4 + %s3700_s20]]  ;;  %v988_v59 = vstv %s3100_s13  ;;  %v880_v20 = vadd.f32 %v3021_v16, %v871_v12 }
 0x143   : > { %s3118_s30 = sld [smem:[#allocation6 + %s2617_s12]]  ;;  %v989_v7 = vmul.f32 %v2755_v0, %v988_v59  ;;  %v905_v22 = vadd.f32 %v3027_v25, %v896_v13 }
 0x144   : > { %v3033_v28 = vpop.permute.xlu1 %936  ;;  %v3044_v29 = vpop.permute.xlu0 %911  ;;  %s3124_s23 = sld [smem:[#allocation4 + %s2617_s12]] }
 0x145   : > { %3697 = sst [smem:[#allocation20_spill]] %s3105_s7  ;;  %v939_v16 = vadd.f32 %v3033_v28, %v930_v14  ;;  %v914_v25 = vadd.f32 %v3044_v29, %v905_v22  ;;  %v883_v28 = vadd.f32 %v882_v51, %v880_v20 }
 0x146   : > { %3698 = sst [smem:[#allocation40_spill]] %s3108_s1  ;;  %s3707_s1 = sadd.s32 53, %s2129_s26 }
 0x147   : > { %s3126_s11 = sld [smem:[#allocation2 + %s1020_s21]]  ;;  %s1088_s21 = sadd.s32 92, %s2129_s26  ;;  %v917_v51 = vadd.f32 %v916_v62, %v914_v25 }
 0x148   : > { %v3053_v30 = vpop.permute.xlu1 %945  ;;  %v3062_v31 = vpop.permute.xlu0 %961  ;;  %3701 = sst [smem:[#allocation23_spill]] %s3114_s17 }
 0x149   : > { %3702 = sst [smem:[#allocation42_spill]] %s3118_s30  ;;  %v948_v29 = vadd.f32 %v3053_v30, %v939_v16  ;;  %v964_v14 = vadd.f32 %v3062_v31, %v955_v6 }
 0x14a   : > { %3703 = sst [smem:[#allocation22_spill]] %s3124_s23  ;;  %v1506_v19 = vstv %s3124_s23  ;;  %s1258_s23 = sadd.s32 112, %s2129_s26 }
 0x14b   : > { %s3130_s8 = sld [smem:[#allocation2 + %s1054_s22]]  ;;  %v951_v62 = vadd.f32 %v950_v61, %v948_v29 }
 0x14c   : > { %v3068_v32 = vpop.permute.xlu1 %995  ;;  %v3076_v33 = vpop.permute.xlu0 %970  ;;  %s3704_s20 = sld [smem:[#allocation30_spill]] }
 0x14d   : > { %s3135_s17 = sld [smem:[#allocation6 + %s3696_s19]]  ;;  %v1022_v5 = vstv %s3126_s11  ;;  %v998_v22 = vadd.f32 %v3068_v32, %v989_v7  ;;  %v973_v30 = vadd.f32 %v3076_v33, %v964_v14  ;;  %v1410_v33 = vmax.f32 %v883_v28, 0.0 }
 0x14e   : > { %s3138_s30 = sld [smem:[#allocation4 + %s3696_s19]]  ;;  %s1122_s19 = sadd.s32 96, %s2129_s26  ;;  %v1023_v21 = vmul.f32 %v2755_v0, %v1022_v5  ;;  %v1411_v28 = vmax.f32 %v917_v51, 0.0 }
 0x14f   : > { %s3142_s7 = sld [smem:[#allocation4 + %s3707_s1]] }
 0x150   : > { %v3086_v34 = vpop.permute.xlu1 %1004  ;;  %v3096_v35 = vpop.permute.xlu0 %979  ;;  %s3147_s12 = sld [smem:[#allocation6 + %s3699_s0]] }
 0x151   : > { %s3151_s22 = sld [smem:[#allocation4 + %s3699_s0]]  ;;  %v1056_v15 = vstv %s3130_s8  ;;  %v982_v25 = vadd.f32 %v3096_v35, %v973_v30 }
 0x152   : > { %s3161_s1 = sld [smem:[#allocation2 + %s1088_s21]]  ;;  %v1057_v43 = vmul.f32 %v2755_v0, %v1056_v15 }
 0x153   : > { %3705 = sst [smem:[#allocation25_spill]] %s3135_s17 }
 0x154   : > { %v3102_v36 = vpop.permute.xlu1 %1013  ;;  %v3110_v37 = vpop.permute.xlu0 %1029  ;;  %3706 = sst [smem:[#allocation24_spill]] %s3138_s30  ;;  %s3710_s30 = sadd.s32 54, %s2129_s26 }
 0x155   : > { %3708 = sst [smem:[#allocation27_spill]] %s3142_s7  ;;  %v1640_v48 = vstv %s3142_s7 }
 0x156   : > { %3709 = sst [smem:[#allocation26_spill]] %s3147_s12 }
 0x157   : > { %s3158_s17 = sld [smem:[#allocation4 + %s3710_s30]] }
 0x158   : > { %v3121_v38 = vpop.permute.xlu1 %1063  ;;  %v3128_v39 = vpop.permute.xlu0 %1038  ;;  %s3165_s12 = sld [smem:[#allocation2 + %s1122_s19]]  ;;  %s1156_s19 = sadd.s32 100, %s2129_s26  ;;  %v1090_v23 = vstv %s3161_s1 }
 0x159   : > { %s3170_s0 = sld [smem:[#allocation6 + %s3704_s20]]  ;;  %v1091_v59 = vmul.f32 %v2755_v0, %v1090_v23  ;;  %v1066_v16 = vadd.f32 %v3121_v38, %v1057_v43  ;;  %v1491_v43 = vmul.f32 %v1490_v60, %v1410_v33  ;;  %v1621_v60 = vmul.f32 %v1620_v50, %v1410_v33 }
 0x15a   : > { %s3175_s30 = sld [smem:[#allocation4 + %s3704_s20]] }
 0x15b   : > { %s3182_s21 = sld [smem:[#allocation4 + %s3713_s10]] }
 0x15c   : > { %v3132_v40 = vpop.permute.xlu1 %1072  ;;  %v3144_v41 = vpop.permute.xlu0 %1047  ;;  %s3196_s3 = sld [smem:[#allocation4 + %s2668_s6]] }
 0x15d   : > { %3711 = sst [smem:[#allocation29_spill]] %s3158_s17  ;;  %s1190_s17 = sadd.s32 104, %s2129_s26 }
 0x15e   : > { %s3714_s25 = sld [smem:[#allocation33_spill]]  ;;  %v1124_v24 = vstv %s3165_s12  ;;  %s3726_s12 = sadd.s32 58, %s2129_s26 }
 0x15f   : > { %3712 = sst [smem:[#allocation28_spill]] %s3170_s0  ;;  %v1125_v5 = vmul.f32 %v2755_v0, %v1124_v24 }
 0x160   : > { %v3153_v42 = vpop.permute.xlu1 %1081  ;;  %v3163_v44 = vpop.permute.xlu0 %1097  ;;  %s3187_s0 = sld [smem:[#allocation6 + %s2668_s6]] }
 0x161   : > { %s3715_s20 = sld [smem:[#allocation20_spill]] }
 0x162   : > { %s3716_s10 = sld [smem:[#allocation40_spill]] }
 0x163   : > { %s3203_s4 = sld [smem:[#allocation2 + %s1156_s19]] }
 0x164   : > { %v3167_v45 = vpop.permute.xlu1 %1131  ;;  %v3178_v49 = vpop.permute.xlu0 %1106  ;;  %s3211_s6 = sld [smem:[#allocation2 + %s1190_s17]] }
 0x165   : > { %s3717_s14 = sld [smem:[#allocation23_spill]] }
 0x166   : > { %s3718_s13 = sld [smem:[#allocation42_spill]]  ;;  %v1154_v20 = vstv %s3187_s0 }
 0x167   : > { %s3218_s19 = sld [smem:[#allocation6 + %s3714_s25]]  ;;  %v984_v9 = vstv %s3715_s20 }
 0x168   : > { %v3193_v54 = vpop.permute.xlu1 %1140  ;;  %v3209_v2 = vpop.permute.xlu0 %1115  ;;  %s3719_s18 = sld [smem:[#allocation32_spill]]  ;;  %v1502_v10 = vstv %s3716_s10  ;;  %v985_v51 = vadd.f32 %v984_v9, %v982_v25  ;;  %v1495_v9 = vmul.f32 %v1494_v63, %v1411_v28 }
 0x169   : > { %s3227_s17 = sld [smem:[#allocation4 + %s3714_s25]]  ;;  %v1158_v12 = vstv %s3203_s4 }
 0x16a   : > { %s3720_s11 = sld [smem:[#allocation25_spill]]  ;;  %v1192_v15 = vstv %s3211_s6  ;;  %v1159_v6 = vmul.f32 %v2755_v0, %v1158_v12  ;;  %v1007_v12 = vadd.f32 %v3086_v34, %v998_v22  ;;  %v1412_v22 = vmax.f32 %v951_v62, 0.0  ;;  %s3743_s6 = sadd.s32 60, %s2129_s26 }
 0x16b   : > { %s3722_s9 = sld [smem:[#allocation24_spill]]  ;;  %v1632_v17 = vstv %s3717_s14  ;;  %v1193_v32 = vmul.f32 %v2755_v0, %v1192_v15  ;;  %v1032_v15 = vadd.f32 %v3110_v37, %v1023_v21 }
 0x16c   : > { %v3224_v11 = vpop.permute.xlu1 %1149  ;;  %s3236_s5 = sld [smem:[#allocation4 + %s3721_s2]]  ;;  %v1018_v18 = vstv %s3718_s13  ;;  %v3242_v8 = vpop.permute.xlu0 %1165  ;;  %v1016_v35 = vadd.f32 %v3102_v36, %v1007_v12  ;;  %v1075_v36 = vadd.f32 %v3132_v40, %v1066_v16  ;;  %v1134_v12 = vadd.f32 %v3167_v45, %v1125_v5  ;;  %s1360_s13 = sadd.s32 124, %s2129_s26 }
 0x16d   : > { %s3723_s10 = sld [smem:[#allocation26_spill]]  ;;  %v1188_v7 = vstv %s3218_s19  ;;  %v1041_v34 = vadd.f32 %v3128_v39, %v1032_v15  ;;  %v1492_v45 = vadd.f32 %v1491_v43, %v3029_v26  ;;  %v1499_v50 = vmul.f32 %v1498_v3, %v1412_v22 }
 0x16e   : > { %s3245_s25 = sld [smem:[#allocation6 + %s3719_s18]]  ;;  %v1019_v29 = vadd.f32 %v1018_v18, %v1016_v35  ;;  %v1084_v40 = vadd.f32 %v3153_v42, %v1075_v36  ;;  %v1413_v18 = vmax.f32 %v985_v51, 0.0  ;;  %v1622_v26 = vadd.f32 %v1621_v60, %v3031_v27 }
 0x16f   : > { %s3251_s2 = sld [smem:[#allocation2 + %s1224_s27]]  ;;  %v1050_v39 = vadd.f32 %v3144_v41, %v1041_v34  ;;  %v1168_v3 = vadd.f32 %v3242_v8, %v1159_v6 }
 0x170   : > { %v1052_v46 = vstv %s3720_s11  ;;  %v3258_v52 = vpop.permute.xlu1 %1199  ;;  %s3261_s14 = sld [smem:[#allocation4 + %s3719_s18]]  ;;  %v3276_v13 = vpop.permute.xlu0 %1174  ;;  %v1503_v8 = vmul.f32 %v1502_v10, %v1413_v18 }
 0x171   : > { %v1510_v47 = vstv %s3722_s9  ;;  %s3725_s27 = sld [smem:[#allocation28_spill]]  ;;  %v1053_v42 = vadd.f32 %v1052_v46, %v1050_v39  ;;  %v1414_v46 = vmax.f32 %v1019_v29, 0.0  ;;  %v1177_v27 = vadd.f32 %v3276_v13, %v1168_v3  ;;  %s3745_s9 = sadd.s32 59, %s2129_s26 }
 0x172   : > { %s3270_s1 = sld [smem:[#allocation4 + %s3726_s12]]  ;;  %v1656_v31 = vstv %s3236_s5  ;;  %s3758_s5 = sadd.s32 63, %s2129_s26 }
 0x173   : > { %v1086_v56 = vstv %s3723_s10  ;;  %s3728_s18 = sld [smem:[#allocation35_spill]]  ;;  %v1415_v6 = vmax.f32 %v1053_v42, 0.0 }
 0x174   : > { %s3278_s7 = sld [smem:[#allocation2 + %s1258_s23]]  ;;  %v3291_v58 = vpop.permute.xlu1 %1208  ;;  %v3303_v55 = vpop.permute.xlu0 %1183  ;;  %v1222_v57 = vstv %s3245_s25 }
 0x175   : > { %s3285_s12 = sld [smem:[#allocation2 + %s1292_s15]]  ;;  %v1226_v14 = vstv %s3251_s2 }
 0x176   : > { %s3729_s8 = sld [smem:[#allocation43_spill]]  ;;  %v1530_v61 = vstv %s3261_s14  ;;  %v1227_v37 = vmul.f32 %v2755_v0, %v1226_v14  ;;  %v1100_v14 = vadd.f32 %v3163_v44, %v1091_v59  ;;  %v1625_v59 = vmul.f32 %v1624_v1, %v1411_v28 }
 0x177   : > { %v1120_v23 = vstv %s3725_s27  ;;  %s3331_s24 = sld [smem:[#allocation2 + %s1326_s28]]  ;;  %v1496_v1 = vadd.f32 %v1495_v9, %v1492_v45  ;;  %v1629_v28 = vmul.f32 %v1628_v4, %v1412_v22 }
 0x178   : > { %3727 = sst [smem:[#allocation31_spill]] %s3270_s1  ;;  %v3316_v24 = vpop.permute.xlu1 %1217  ;;  %v1234_v21 = vpop.permute.xlu0 %1233  ;;  %v1109_v41 = vadd.f32 %v3178_v49, %v1100_v14  ;;  %v1143_v49 = vadd.f32 %v3193_v54, %v1134_v12  ;;  %v1087_v54 = vadd.f32 %v1086_v56, %v1084_v40  ;;  %v1626_v34 = vadd.f32 %v1625_v59, %v1622_v26 }
 0x179   : > { %s3297_s23 = sld [smem:[#allocation6 + %s3728_s18]]  ;;  %v1236_v13 = vadd.f32 %v1234_v21, %v1227_v37 }
 0x17a   : > { %v1260_v38 = vstv %s3278_s7  ;;  %s3733_s1 = sld [smem:[#allocation34_spill]]  ;;  %v1118_v5 = vadd.f32 %v3209_v2, %v1109_v41  ;;  %v1152_v35 = vadd.f32 %v3224_v11, %v1143_v49  ;;  %v1630_v10 = vadd.f32 %v1629_v28, %v1626_v34 }
 0x17b   : > { %v1294_v30 = vstv %s3285_s12  ;;  %v1261_v62 = vmul.f32 %v2755_v0, %v1260_v38  ;;  %v1500_v38 = vadd.f32 %v1499_v50, %v1496_v1  ;;  %s3738_s12 = sld [smem:[#allocation17_spill]]  ;;  %v1416_v22 = vmax.f32 %v1087_v54, 0.0 }
 0x17c   : > { %s3306_s4 = sld [smem:[#allocation6 + %s3729_s8]]  ;;  %v1268_v15 = vpop.permute.xlu1 %1267  ;;  %v1243_v16 = vpop.permute.xlu0 %1242  ;;  %v1295_v63 = vmul.f32 %v2755_v0, %v1294_v30  ;;  %v1202_v0 = vadd.f32 %v3258_v52, %v1193_v32  ;;  %v1633_v52 = vmul.f32 %v1632_v17, %v1413_v18  ;;  %v1121_v4 = vadd.f32 %v1120_v23, %v1118_v5 }
 0x17d   : > { %v1328_v43 = vstv %s3331_s24  ;;  %s3378_s10 = sld [smem:[#allocation2 + %s1360_s13]]  ;;  %v1186_v32 = vadd.f32 %v3303_v55, %v1177_v27  ;;  %v1270_v29 = vadd.f32 %v1268_v15, %v1261_v62  ;;  %v1507_v17 = vmul.f32 %v1506_v19, %v1414_v46 }
 0x17e   : > { %v1211_v11 = vadd.f32 %v3291_v58, %v1202_v0  ;;  %s3740_s15 = sld [smem:[#allocation37_spill]]  ;;  %v1155_v23 = vadd.f32 %v1154_v20, %v1152_v35  ;;  %v1245_v36 = vadd.f32 %v1243_v16, %v1236_v13  ;;  %v1504_v21 = vadd.f32 %v1503_v8, %v1500_v38 }
 0x17f   : > { %v1256_v25 = vstv %s3297_s23  ;;  %s3388_s27 = sld [smem:[#allocation4 + %s3728_s18]]  ;;  %v1634_v39 = vadd.f32 %v1633_v52, %v1630_v10  ;;  %v1637_v19 = vmul.f32 %v1636_v53, %v1414_v46  ;;  %v1511_v20 = vmul.f32 %v1510_v47, %v1415_v6 }
 0x180   : > { %s3355_s29 = sld [smem:[#allocation6 + %s3733_s1]]  ;;  %v1277_v33 = vpop.permute.xlu1 %1276  ;;  %v1252_v2 = vpop.permute.xlu0 %1251  ;;  %v1220_v30 = vadd.f32 %v3316_v24, %v1211_v11  ;;  %v1417_v24 = vmax.f32 %v1121_v4, 0.0  ;;  %v1189_v12 = vadd.f32 %v1188_v7, %v1186_v32  ;;  %v1508_v9 = vadd.f32 %v1507_v17, %v1504_v21 }
 0x181   : > { %v1902_v55 = vld [vmem:[%s3738_s12] sm:$0x3]  ;;  %s3742_s18 = sld [smem:[#allocation29_spill]]  ;;  %v1279_v15 = vadd.f32 %v1277_v33, %v1270_v29  ;;  %v1254_v60 = vadd.f32 %v1252_v2, %v1245_v36  ;;  %v1641_v53 = vmul.f32 %v1640_v48, %v1415_v6  ;;  %v3744_v62 = vstv %s3151_s22 }
 0x182   : > { %v1290_v44 = vstv %s3306_s4  ;;  %v1329_v58 = vmul.f32 %v1902_v55, %v1328_v43  ;;  %s3403_s2 = sld [smem:[#allocation4 + %s3743_s6]]  ;;  %v1515_v47 = vmul.f32 %v3744_v62, %v1416_v22  ;;  %v1418_v40 = vmax.f32 %v1155_v23, 0.0 }
 0x183   : > { %v1223_v7 = vadd.f32 %v1222_v57, %v1220_v30  ;;  %s3413_s19 = sld [smem:[#allocation4 + %s3745_s9]]  ;;  %v1638_v50 = vadd.f32 %v1637_v19, %v1634_v39  ;;  %v1512_v18 = vadd.f32 %v1511_v20, %v1508_v9  ;;  %v1362_v5 = vstv %s3378_s10 }
 0x184   : > { %v1286_v56 = vpop.permute.xlu1 %1285  ;;  %v1302_v51 = vpop.permute.xlu0 %1301  ;;  %s3397_s0 = sld [smem:[#allocation6 + %s3740_s15]]  ;;  %v3747_v33 = vstv %s3175_s30  ;;  %v1419_v26 = vmax.f32 %v1189_v12, 0.0  ;;  %v1257_v1 = vadd.f32 %v1256_v25, %v1254_v60  ;;  %v3749_v28 = vstv %s3182_s21  ;;  %s3751_s30 = sadd.s32 61, %s2129_s26 }
 0x185   : > { %v1288_v16 = vadd.f32 %v1286_v56, %v1279_v15  ;;  %v1304_v45 = vadd.f32 %v1302_v51, %v1295_v63  ;;  %s3418_s22 = sld [smem:[#allocation4 + %s3729_s8]]  ;;  %v1519_v57 = vmul.f32 %v3747_v33, %v1417_v24  ;;  %v1642_v3 = vadd.f32 %v1641_v53, %v1638_v50  ;;  %s3754_s21 = sadd.s32 62, %s2129_s26 }
 0x186   : > { %v1324_v37 = vstv %s3355_s29  ;;  %s3748_s25 = sld [smem:[#allocation38_spill]]  ;;  %v1516_v0 = vadd.f32 %v1515_v47, %v1512_v18  ;;  %v1649_v46 = vmul.f32 %v3749_v28, %v1417_v24  ;;  %v3750_v54 = vstv %s3196_s3 }
 0x187   : > { %v3746_v48 = vstv %s3742_s18  ;;  %s3426_s16 = sld [smem:[#allocation4 + %s3733_s1]]  ;;  %v1523_v35 = vmul.f32 %v3750_v54, %v1418_v40  ;;  %v1420_v34 = vmax.f32 %v1223_v7, 0.0  ;;  %v1291_v25 = vadd.f32 %v1290_v44, %v1288_v16 }
 0x188   : > { %v1336_v14 = vpop.permute.xlu1 %1335  ;;  %v1311_v41 = vpop.permute.xlu0 %1310  ;;  %v1645_v42 = vmul.f32 %v3746_v48, %v1416_v22  ;;  %s3434_s8 = sld [smem:[#allocation4 + %s3751_s30]]  ;;  %v1534_v6 = vstv %s3388_s27  ;;  %v1520_v11 = vadd.f32 %v1519_v57, %v1516_v0  ;;  %v3756_v32 = vstv %s3227_s17 }
 0x189   : > { %v1338_v59 = vadd.f32 %v1336_v14, %v1329_v58  ;;  %v1313_v63 = vadd.f32 %v1311_v41, %v1304_v45  ;;  %s3752_s23 = sld [smem:[#allocation36_spill]]  ;;  %v1527_v44 = vmul.f32 %v3756_v32, %v1419_v26  ;;  %v1421_v13 = vmax.f32 %v1257_v1, 0.0 }
 0x18a   : > { %s3439_s1 = sld [smem:[#allocation4 + %s3740_s15]]  ;;  %v1646_v43 = vadd.f32 %v1645_v42, %v1642_v3  ;;  %v1358_v4 = vstv %s3397_s0  ;;  %v1657_v17 = vmul.f32 %v1656_v31, %v1419_v26  ;;  %v1363_v23 = vmul.f32 %v1902_v55, %v1362_v5 }
 0x18b   : > { %s3447_s3 = sld [smem:[#allocation4 + %s3754_s21]]  ;;  %v1524_v30 = vadd.f32 %v1523_v35, %v1520_v11  ;;  %v1531_v36 = vmul.f32 %v1530_v61, %v1420_v34  ;;  %v1664_v58 = vstv %s3413_s19  ;;  %v1422_v21 = vmax.f32 %v1291_v25, 0.0 }
 0x18c   : > { %v1345_v49 = vpop.permute.xlu1 %1344  ;;  %v1320_v2 = vpop.permute.xlu0 %1319  ;;  %v3753_v8 = vstv %s3748_s25  ;;  %s3755_s29 = sld [smem:[#allocation31_spill]]  ;;  %v1650_v10 = vadd.f32 %v1649_v46, %v1646_v43  ;;  %v1538_v14 = vstv %s3418_s22  ;;  %v1535_v31 = vmul.f32 %v1534_v6, %v1421_v13 }
 0x18d   : > { %v1347_v38 = vadd.f32 %v1345_v49, %v1338_v59  ;;  %v1322_v27 = vadd.f32 %v1320_v2, %v1313_v63  ;;  %v1653_v52 = vmul.f32 %v3753_v8, %v1418_v40  ;;  %v1528_v12 = vadd.f32 %v1527_v44, %v1524_v30  ;;  %s3468_s7 = sld [smem:[#allocation4 + %s3758_s5]] }
 0x18e   : > { %v1668_v15 = vstv %s3403_s2  ;;  %v1665_v61 = vmul.f32 %v1664_v58, %v1421_v13  ;;  %s3759_s14 = sld [smem:[#allocation16_spill]]  ;;  %v1539_v62 = vmul.f32 %v1538_v14, %v1422_v21  ;;  %v1542_v47 = vstv %s3426_s16 }
 0x18f   : > { %s3452_s4 = sld [smem:[#allocation6 + %s3752_s23]]  ;;  %v1325_v22 = vadd.f32 %v1324_v37, %v1322_v27  ;;  %v1654_v39 = vadd.f32 %v1653_v52, %v1650_v10  ;;  %v1532_v53 = vadd.f32 %v1531_v36, %v1528_v12  ;;  %v1672_v40 = vstv %s3434_s8 }
 0x190   : > { %v1354_v56 = vpop.permute.xlu1 %1353  ;;  %v1370_v51 = vpop.permute.xlu0 %1369  ;;  %s3463_s17 = sld [smem:[#allocation4 + %s3752_s23]]  ;;  %v1669_v16 = vmul.f32 %v1668_v15, %v1422_v21  ;;  %v1546_v18 = vstv %s3439_s1 }
 0x191   : > { %v1356_v29 = vadd.f32 %v1354_v56, %v1347_v38  ;;  %v1658_v55 = vadd.f32 %v1657_v17, %v1654_v39  ;;  %v1423_v37 = vmax.f32 %v1325_v22, 0.0  ;;  %v1372_v60 = vadd.f32 %v1370_v51, %v1363_v23  ;;  %s3473_s20 = sld [smem:[#allocation7 + %s2129_s26]] }
 0x192   : > { %v3757_v19 = vstv %s3755_s29  ;;  %v1536_v50 = vadd.f32 %v1535_v31, %v1532_v53  ;;  %v1676_v48 = vstv %s3447_s3  ;;  %s3760_s11 = sld [smem:[#allocation15_spill]] }
 0x193   : > { %v1661_v20 = vmul.f32 %v3757_v19, %v1420_v34  ;;  %v1359_v24 = vadd.f32 %v1358_v4, %v1356_v29  ;;  %v1543_v5 = vmul.f32 %v1542_v47, %v1423_v37  ;;  %v1673_v33 = vmul.f32 %v1672_v40, %v1423_v37  ;;  %s3761_s28 = sld [smem:[#allocation49_spill]] }
 0x194   : > { %v1379_v9 = vpop.permute.xlu0 %1378  ;;  %v1388_v41 = vpop.permute.xlu1 %1387  ;;  %s1683_s13 = sld [smem:[#allocation7 + %s3759_s14]]  ;;  %v1540_v26 = vadd.f32 %v1539_v62, %v1536_v50  ;;  %v1680_v46 = vstv %s3468_s7 }
 0x195   : > { %v1662_v7 = vadd.f32 %v1661_v20, %v1658_v55  ;;  %v1424_v45 = vmax.f32 %v1359_v24, 0.0  ;;  %v1381_v59 = vadd.f32 %v1379_v9, %v1372_v60  ;;  %v1392_v42 = vstv %s3452_s4 }
 0x196   : > { %v1550_v28 = vstv %s3463_s17  ;;  %v1544_v54 = vadd.f32 %v1543_v5, %v1540_v26 }
 0x197   : > { %v1666_v49 = vadd.f32 %v1665_v61, %v1662_v7  ;;  %v1390_v57 = vadd.f32 %v1388_v41, %v1381_v59  ;;  %v1547_v63 = vmul.f32 %v1546_v18, %v1424_v45  ;;  %v1677_v3 = vmul.f32 %v1676_v48, %v1424_v45 }
 0x198   : > { %s1832_s26 = sshll.u32 %s3760_s11, 2  ;;  %v1554_v43 = vstv %s3473_s20 }
 0x199   : > { %v1670_v1 = vadd.f32 %v1669_v16, %v1666_v49  ;;  %v1393_v0 = vadd.f32 %v1392_v42, %v1390_v57  ;;  %v1548_v34 = vadd.f32 %v1547_v63, %v1544_v54  ;;  %s304_s15 = scalar_lea.vmem %s3761_s28, %s1832_s26 }
 0x19a   : > { %v1684_v8 = vstv %s1683_s13 }
 0x19b   : > { %v1674_v35 = vadd.f32 %v1673_v33, %v1670_v1  ;;  %v1425_v2 = vmax.f32 %v1393_v0, 0.0 }
 0x19d   : > { %v1678_v25 = vadd.f32 %v1677_v3, %v1674_v35  ;;  %v1551_v38 = vmul.f32 %v1550_v28, %v1425_v2  ;;  %v1681_v27 = vmul.f32 %v1680_v46, %v1425_v2 }
 0x19f   : > { %v1552_v52 = vadd.f32 %v1551_v38, %v1548_v34  ;;  %v1682_v6 = vadd.f32 %v1681_v27, %v1678_v25 }
 0x1a1   : > { %v1555_v4 = vadd.f32 %v1554_v43, %v1552_v52  ;;  %v1685_v56 = vadd.f32 %v1684_v8, %v1682_v6 }
 0x1a3   : > { %1687 = vst.msk [vmem:[%s304_s15] sm:$0x3] %vm1686_vm0, %v1555_v4  ;;  %1829 = vst.msk [vmem:[%s304_s15 + $0x2] sm:$0x3] %vm1686_vm0, %v1685_v56 }
 0x1a4 PF: > { %s3762_s27 = sld [smem:[#allocation13_spill]] }
 0x1a5   : > { %s3763_s18 = sld [smem:[#allocation12_spill]] }
 0x1a6   : > { %s3764_s19 = sld [smem:[#allocation14_spill]] }
 0x1aa   : > { %s18_s20 = sadd.s32 1, %s3762_s27  }
 0x1ab   : > { %p15_p8 = scmp.ge.s32.totalorder %s18_s20, 5  }
 0x1ad   :  { %17 = sbr.rel (!%p15_p8) target bundleno = 11 (0xb), region = 88 }
 0x1b2   :  { %1717 = vsyncpa [#allocation3], 1 }
 0x1b3   :  { %1719 = vsyncpa [#allocation3 + $0x1], 1 }
 0x1b4   :  { %1720 = vsyncpa [#allocation5], 1 }
 0x1b5   :  { %1721 = vsyncpa [#allocation8], 1 }

</bundles_post_ra>
